<compile_context>
chip_gen: v5e
topology: v5e:2x2
jax: 0.10.0
libtpu: 0.0.40
codegen_flags: <defaults>
</compile_context>

<pallas_src>
import functools

import jax
import jax.numpy as jnp
from jax.experimental import pallas as pl
from jax.experimental.pallas import tpu as pltpu


# --------------------------------------------------------------------------
# helpers
# --------------------------------------------------------------------------
def _round_up(x, m):
    return ((x + m - 1) // m) * m


def _tile(dim, pref, align):
    """Largest block <= pref that is a multiple of `align` and divides `dim`.
    Falls back to the full extent (always a legal block shape)."""
    if dim % align != 0:
        return dim
    t = min(pref, dim)
    t -= t % align
    while t > 0 and dim % t != 0:
        t -= align
    return t if t > 0 else dim


def _device_kind():
    try:
        return jax.devices()[0].device_kind.lower()
    except Exception:  # pragma: no cover
        return ""


def _default_tiles():
    """(tm, tn, tk) preferences.  (512,1024,1024) is ~10-14 MiB of VMEM per
    fused-matmul step with bf16 blocks + f32 acc -> safe even on v7x."""
    return 512, 1024, 1024


def _vmem_limit():
    kind = _device_kind()
    if "v5" in kind or "v6" in kind:
        return 96 * 1024 * 1024     # 128 MiB parts
    return 48 * 1024 * 1024         # v7x (64 MiB / TC) and unknown


def _pad_seq(s):
    """Sequence padding: lane-dense (mult of 128) for real sizes, 8 minimum."""
    return _round_up(s, 128) if s >= 128 else _round_up(s, 8)


# --------------------------------------------------------------------------
# fused (LayerNorm? -> matmul -> bias -> act? -> +residual?) kernel
# --------------------------------------------------------------------------
def _fused_linear_kernel(*refs, has_ln, has_res, act, eps, multi_k):
    it = iter(refs)
    x_ref = next(it)
    w_ref = next(it)
    b_ref = next(it)
    if has_ln:
        g_ref = next(it)
        beta_ref = next(it)
    if has_res:
        res_ref = next(it)
    o_ref = next(it)
    xn_ref = next(it) if has_ln else None        # cached LN(x), (tm, K)
    acc_ref = next(it) if multi_k else None      # f32 accumulator, (tm, tn)

    def _finish(y):
        y = y + b_ref[...].astype(jnp.float32)
        if act == "quick_gelu":
            y = y * jax.nn.sigmoid(1.702 * y)            # CLIP quick_gelu
        if has_res:
            y = y + res_ref[...].astype(jnp.float32)     # fused residual add
        o_ref[...] = y.astype(o_ref.dtype)

    if has_ln:
        # LN is fused only with a single (full-K) reduction step; compute the
        # normalized row tile once per row tile (N-grid index 0) and reuse it
        # for every output column tile.
        @pl.when(pl.program_id(1) == 0)
        def _compute_ln():
            xf = x_ref[...].astype(jnp.float32)
            mean = jnp.mean(xf, axis=-1, keepdims=True)
            var = jnp.mean(jnp.square(xf - mean), axis=-1, keepdims=True)
            xf = (xf - mean) * jax.lax.rsqrt(var + eps)
            xn_ref[...] = (xf * g_ref[...].astype(jnp.float32)
                           + beta_ref[...].astype(jnp.float32)
                           ).astype(xn_ref.dtype)
        x = xn_ref[...]
    else:
        x = x_ref[...]

    partial = jnp.dot(x, w_ref[...], preferred_element_type=jnp.float32)

    if multi_k:
        k = pl.program_id(2)

        @pl.when(k == 0)
        def _first():
            acc_ref[...] = partial          # no zero-init + add

        @pl.when(k > 0)
        def _accum():
            acc_ref[...] += partial

        @pl.when(k == pl.num_programs(2) - 1)
        def _finalize():
            _finish(acc_ref[...])
    else:
        _finish(partial)


def pallas_matmul(x, w, b, *, ln=None, residual=None, act=None,
                  out_dtype=None, eps=1e-5):
    """y = [act](LN?(x) @ w + b) [+ residual].

    x: (M, K), w: (K, N), b: (1, N) f32, ln: optional (gamma(1,K), beta(1,K))
    f32, residual: optional (M, N).  Accumulation / LN stats in f32."""
    M, K = x.shape
    K2, N = w.shape
    assert K == K2
    out_dtype = out_dtype or x.dtype

    TM, TN, TK = _default_tiles()
    tm = _tile(M, TM, 8)
    tn = _tile(N, TN, 128)
    # LayerNorm needs the whole row, so K stays un-tiled when LN is fused.
    tk = K if ln is not None else _tile(K, TK, 128)
    if ln is not None:
        assert tk == K, "fused LayerNorm requires a single (full-K) reduction step"
    multi_k = (K // tk) > 1
    grid = (M // tm, N // tn, K // tk)

    in_specs = [
        pl.BlockSpec((tm, tk), lambda i, j, k: (i, k)),
        pl.BlockSpec((tk, tn), lambda i, j, k: (k, j)),
        pl.BlockSpec((1, tn), lambda i, j, k: (0, j)),
    ]
    args = [x, w, b]
    if ln is not None:
        gamma, beta = ln
        in_specs += [pl.BlockSpec((1, tk), lambda i, j, k: (0, k)),
                     pl.BlockSpec((1, tk), lambda i, j, k: (0, k))]
        args += [gamma, beta]
    if residual is not None:
        in_specs.append(pl.BlockSpec((tm, tn), lambda i, j, k: (i, j)))
        args.append(residual)

    scratch = []
    if ln is not None:
        scratch.append(pltpu.VMEM((tm, K), x.dtype))        # cached LN(x)
    if multi_k:
        scratch.append(pltpu.VMEM((tm, tn), jnp.float32))   # f32 accumulator

    if ln is not None:
        # N axis must stay on one core so the j==0 LN-cache guard is sound.
        dims = ("parallel", "arbitrary", "arbitrary")
    else:
        dims = ("parallel", "parallel", "arbitrary")

    kernel = functools.partial(_fused_linear_kernel, has_ln=ln is not None,
                               has_res=residual is not None, act=act, eps=eps,
                               multi_k=multi_k)
    return pl.pallas_call(
        kernel,
        out_shape=jax.ShapeDtypeStruct((M, N), out_dtype),
        grid=grid,
        in_specs=in_specs,
        out_specs=pl.BlockSpec((tm, tn), lambda i, j, k: (i, j)),
        scratch_shapes=scratch,
        compiler_params=pltpu.CompilerParams(
            dimension_semantics=dims,
            vmem_limit_bytes=_vmem_limit()),
    )(*args)


# --------------------------------------------------------------------------
# standalone LayerNorm (only the pre-LN uses it), tiled over rows
# --------------------------------------------------------------------------
def _layernorm_kernel(x_ref, g_ref, b_ref, o_ref, *, eps):
    x = x_ref[...].astype(jnp.float32)
    mean = jnp.mean(x, axis=-1, keepdims=True)
    var = jnp.mean(jnp.square(x - mean), axis=-1, keepdims=True)
    y = (x - mean) * jax.lax.rsqrt(var + eps)
    o_ref[...] = (y * g_ref[...] + b_ref[...]).astype(o_ref.dtype)


def pallas_layernorm(x, gamma, beta, eps=1e-5):
    """x: (M, D), gamma/beta: (1, D) f32 -> (M, D)."""
    M, D = x.shape
    tm = _tile(M, 512, 8)
    return pl.pallas_call(
        functools.partial(_layernorm_kernel, eps=eps),
        out_shape=jax.ShapeDtypeStruct((M, D), x.dtype),
        grid=(M // tm,),
        in_specs=[pl.BlockSpec((tm, D), lambda i: (i, 0)),
                  pl.BlockSpec((1, D), lambda i: (0, 0)),
                  pl.BlockSpec((1, D), lambda i: (0, 0))],
        out_specs=pl.BlockSpec((tm, D), lambda i: (i, 0)),
        compiler_params=pltpu.CompilerParams(
            dimension_semantics=("parallel",),
            vmem_limit_bytes=_vmem_limit()),
    )(x, gamma, beta)


# --------------------------------------------------------------------------
# attention: q-tiled, head-packed, reads q/k/v slices straight from the
# fused (B, S_pad, 3D) QKV tensor via BlockSpec index_maps
# --------------------------------------------------------------------------
def _attention_kernel(q_ref, k_ref, v_ref, o_ref, *, hb, hd, scale,
                      s_valid, s_pad, tq):
    # q block: (1, tq, hb*hd); k/v blocks: (1, s_pad, hb*hd)
    need_mask = s_valid < s_pad
    if need_mask:
        col = jax.lax.broadcasted_iota(jnp.int32, (tq, s_pad), 1)
        key_mask = col < s_valid
    outs = []
    for h in range(hb):
        sl = slice(h * hd, (h + 1) * hd)
        q = q_ref[0, :, sl]                       # (tq, hd) bf16 straight to MXU
        k = k_ref[0, :, sl]                       # (s_pad, hd)
        v = v_ref[0, :, sl]
        s = jax.lax.dot_general(q, k, (((1,), (1,)), ((), ())),
                                preferred_element_type=jnp.float32) * scale
        if need_mask:
            s = jnp.where(key_mask, s, -1e30)     # padded keys get no mass
        s = s - jnp.max(s, axis=-1, keepdims=True)
        p = jnp.exp(s)
        p = p * pl.reciprocal(jnp.sum(p, axis=-1, keepdims=True), approx=True)
        o = jnp.dot(p.astype(v.dtype), v, preferred_element_type=jnp.float32)
        outs.append(o)
    # lane-dense store: hb*hd lanes written in one go
    o_ref[0] = jnp.concatenate(outs, axis=-1).astype(o_ref.dtype)


def _heads_per_block(num_heads, head_dim):
    """Smallest divisor of num_heads giving a 256-lane (preferred on the
    256-wide-MXU parts) or at least 128-lane block."""
    for target in (256, 128):
        for c in range(1, num_heads + 1):
            if num_heads % c == 0 and (c * head_dim) % target == 0:
                return c
    return num_heads  # fall back to all heads in one block (width = D)


def pallas_attention(qkv, num_heads, head_dim, scale, s_valid):
    """qkv: (B, S_pad, 3*D) fused projection output -> (B, S_pad, D).

    Key columns >= s_valid are masked to -inf (sequence padding).  Per-head
    q/k/v slices are selected via BlockSpec index_maps, so no head split /
    merge transposes ever touch HBM."""
    B, S_pad, threeD = qkv.shape
    D = num_heads * head_dim
    assert threeD == 3 * D
    hb = _heads_per_block(num_heads, head_dim)
    n_hblk = num_heads // hb
    bw = hb * head_dim
    assert bw % 128 == 0, "hidden size must make head blocks a multiple of 128 lanes"

    tq = _tile(S_pad, 256, 8)          # query tile: keeps scores at (tq, S_pad)
    n_qblk = S_pad // tq

    q_map = lambda b, h, q: (b, q, h)
    k_map = lambda b, h, q: (b, 0, n_hblk + h)
    v_map = lambda b, h, q: (b, 0, 2 * n_hblk + h)
    o_map = lambda b, h, q: (b, q, h)

    kernel = functools.partial(_attention_kernel, hb=hb, hd=head_dim,
                               scale=scale, s_valid=s_valid, s_pad=S_pad, tq=tq)
    return pl.pallas_call(
        kernel,
        out_shape=jax.ShapeDtypeStruct((B, S_pad, D), qkv.dtype),
        grid=(B, n_hblk, n_qblk),
        in_specs=[pl.BlockSpec((1, tq, bw), q_map),
                  pl.BlockSpec((1, S_pad, bw), k_map),
                  pl.BlockSpec((1, S_pad, bw), v_map)],
        out_specs=pl.BlockSpec((1, tq, bw), o_map),
        compiler_params=pltpu.CompilerParams(
            dimension_semantics=("parallel", "parallel", "parallel"),
            vmem_limit_bytes=_vmem_limit()),
    )(qkv, qkv, qkv)


# --------------------------------------------------------------------------
# Parameter init (deterministic, synthetic — CLIPVisionModel shapes, f32 "checkpoint")
# --------------------------------------------------------------------------
def init_params(key, cfg):
    D, C, P = cfg["hidden"], cfg["channels"], cfg["patch"]
    I, L = cfg["intermediate"], cfg["layers"]
    num_pos = (cfg["image"] // P) ** 2 + 1

    keys = iter(jax.random.split(key, 8 + 16 * L))

    def nrm(shape, s=0.02):
        return jax.random.normal(next(keys), shape, jnp.float32) * s

    params = {
        # conv2d(C, D, kernel=P, stride=P, bias=False) flattened to (D, C*P*P)
        "patch_w": nrm((D, C * P * P)),
        "class_emb": nrm((D,)),
        "pos_emb": nrm((num_pos, D)),
        "pre_ln_g": jnp.ones((D,), jnp.float32),
        "pre_ln_b": jnp.zeros((D,), jnp.float32),
        "layers": [],
    }
    for _ in range(L):
        params["layers"].append({
            "ln1_g": jnp.ones((D,), jnp.float32), "ln1_b": jnp.zeros((D,), jnp.float32),
            "q_w": nrm((D, D)), "q_b": nrm((D,)),
            "k_w": nrm((D, D)), "k_b": nrm((D,)),
            "v_w": nrm((D, D)), "v_b": nrm((D,)),
            "o_w": nrm((D, D)), "o_b": nrm((D,)),
            "ln2_g": jnp.ones((D,), jnp.float32), "ln2_b": jnp.zeros((D,), jnp.float32),
            "fc1_w": nrm((I, D)), "fc1_b": nrm((I,)),
            "fc2_w": nrm((D, I)), "fc2_b": nrm((D,)),
        })
    return params


def prepare_params(params, compute_dtype=jnp.bfloat16):
    """One-time weight repacking: transpose to (K, N), fuse QKV, cast to bf16,
    pad the patch-embedding K dim to a multiple of 128.  Done OUTSIDE the
    traced forward so it is not re-materialized every call."""
    patch_w = params["patch_w"]                       # (D, Kp)
    D, Kp = patch_w.shape
    Kp_pad = _round_up(Kp, 128)
    patch_w_t = jnp.zeros((Kp_pad, D), jnp.float32).at[:Kp].set(patch_w.T)

    prep = {
        "patch_w": patch_w_t.astype(compute_dtype),                 # (Kp_pad, D)
        "patch_b": jnp.zeros((1, D), jnp.float32),                  # conv has no bias
        "class_emb": params["class_emb"],                           # f32
        "pos_emb": params["pos_emb"],                               # f32
        "pre_ln_g": params["pre_ln_g"][None].astype(jnp.float32),   # (1, D)
        "pre_ln_b": params["pre_ln_b"][None].astype(jnp.float32),
        "layers": [],
    }
    for p in params["layers"]:
        prep["layers"].append({
            "ln1_g": p["ln1_g"][None].astype(jnp.float32),
            "ln1_b": p["ln1_b"][None].astype(jnp.float32),
            "qkv_w": jnp.concatenate(
                [p["q_w"].T, p["k_w"].T, p["v_w"].T], axis=1).astype(compute_dtype),  # (D, 3D)
            "qkv_b": jnp.concatenate(
                [p["q_b"], p["k_b"], p["v_b"]])[None].astype(jnp.float32),            # (1, 3D)
            "o_w": p["o_w"].T.astype(compute_dtype),
            "o_b": p["o_b"][None].astype(jnp.float32),
            "ln2_g": p["ln2_g"][None].astype(jnp.float32),
            "ln2_b": p["ln2_b"][None].astype(jnp.float32),
            "fc1_w": p["fc1_w"].T.astype(compute_dtype),
            "fc1_b": p["fc1_b"][None].astype(jnp.float32),
            "fc2_w": p["fc2_w"].T.astype(compute_dtype),
            "fc2_b": p["fc2_b"][None].astype(jnp.float32),
        })
    return prep


# --------------------------------------------------------------------------
# Forward pass: CLIPVisionTower.forward (batched-tensor path)
# --------------------------------------------------------------------------
def clip_vision_tower_forward(images, prep, cfg,
                              select_layer=-2, select_feature="patch",
                              compute_dtype=jnp.bfloat16):
    B, C, H, W = images.shape
    P, D, Hn = cfg["patch"], cfg["hidden"], cfg["heads"]
    hd = D // Hn
    L = cfg["layers"]
    Hp, Wp = H // P, W // P
    n_patch = Hp * Wp
    S = n_patch + 1
    S_pad = _pad_seq(S)          # pad once; padded keys masked, pad rows dropped
    scale = hd ** -0.5

    # --- patch embedding (conv stride=patch == unfold + matmul), bf16 -------
    x = images.astype(compute_dtype)
    patches = x.reshape(B, C, Hp, P, Wp, P).transpose(0, 2, 4, 1, 3, 5)
    patches = patches.reshape(B * n_patch, C * P * P)
    Kp_pad = prep["patch_w"].shape[0]
    patches = jnp.pad(patches, ((0, 0), (0, Kp_pad - patches.shape[1])))
    patch_emb = pallas_matmul(patches, prep["patch_w"], prep["patch_b"])  # (B*n_patch, D)
    patch_emb = patch_emb.reshape(B, n_patch, D)

    # --- class token + positional embedding (tiny, plain JAX, f32) ----------
    cls = jnp.broadcast_to(prep["class_emb"][None, None, :], (B, 1, D))
    h = jnp.concatenate([cls, patch_emb.astype(jnp.float32)], axis=1)
    h = h + prep["pos_emb"][None]
    # pad the sequence dim to S_pad with zeros (done once, kept throughout)
    h = jnp.pad(h, ((0, 0), (0, S_pad - S), (0, 0))).astype(compute_dtype)
    M = B * S_pad

    # --- pre layernorm (hidden_states[0]) ------------------------------------
    h = pallas_layernorm(h.reshape(M, D), prep["pre_ln_g"], prep["pre_ln_b"])

    # Only hidden_states[sel] is needed: run exactly `sel` encoder layers.
    sel = select_layer % (L + 1)

    for lyr in prep["layers"][:sel]:
        # --- attention block: fused LN1+QKV matmul, q-tiled head-packed
        #     attention, o_proj with fused residual add ---------------------
        qkv = pallas_matmul(h, lyr["qkv_w"], lyr["qkv_b"],
                            ln=(lyr["ln1_g"], lyr["ln1_b"]))          # (M, 3D)
        attn = pallas_attention(qkv.reshape(B, S_pad, 3 * D), Hn, hd, scale,
                                s_valid=S)
        h = pallas_matmul(attn.reshape(M, D), lyr["o_w"], lyr["o_b"],
                          residual=h)

        # --- MLP block: fused LN2+fc1+quick_gelu, fc2 with fused residual --
        m = pallas_matmul(h, lyr["fc1_w"], lyr["fc1_b"],
                          ln=(lyr["ln2_g"], lyr["ln2_b"]), act="quick_gelu")
        h = pallas_matmul(m, lyr["fc2_w"], lyr["fc2_b"], residual=h)

    # --- feature_select -------------------------------------------------------
    feats = h.reshape(B, S_pad, D)
    if select_feature == "patch":
        feats = feats[:, 1:S]
    elif select_feature == "cls_patch":
        feats = feats[:, :S]
    else:
        raise ValueError(f"Unexpected select feature: {select_feature}")
    return feats.astype(images.dtype)


# --------------------------------------------------------------------------
if __name__ == "__main__":
    # Small but lane-aligned test config (hidden a multiple of 128 so the
    # head-sliced attention BlockSpecs satisfy the (8,128) tiling rule).
    cfg = dict(image=16, patch=8, channels=3,
               hidden=128, heads=4, layers=3, intermediate=512)

    key = jax.random.PRNGKey(0)
    k_img, k_par = jax.random.split(key)
    images = jax.random.normal(
        k_img, (2, cfg["channels"], cfg["image"], cfg["image"]), jnp.float32)  # NCHW
    params = init_params(k_par, cfg)
    prep = prepare_params(params)

    fwd = jax.jit(functools.partial(clip_vision_tower_forward, cfg=cfg,
                                    select_layer=-2, select_feature="patch"))
    out = fwd(images, prep)
    out = jax.block_until_ready(out)

    n_patches = (cfg["image"] // cfg["patch"]) ** 2
    assert out.shape == (2, n_patches, cfg["hidden"]), out.shape
    assert out.dtype == images.dtype
    assert bool(jnp.all(jnp.isfinite(out)))
    print("KERNEL_OK")
</pallas_src>

<mosaic_0001>
module attributes {stable_mosaic.version = 11 : i64} {
  func.func @_fused_linear_kernel(%arg0: i32, %arg1: i32, %arg2: i32, %arg3: memref<8x256xbf16, #tpu.memory_space<vmem>>, %arg4: memref<256x128xbf16, #tpu.memory_space<vmem>>, %arg5: memref<1x128xf32, #tpu.memory_space<vmem>>, %arg6: memref<8x128xbf16, #tpu.memory_space<vmem>>) attributes {dimension_semantics = [#tpu.dimension_semantics<parallel>, #tpu.dimension_semantics<parallel>, #tpu.dimension_semantics<arbitrary>], iteration_bounds = array<i64: 1, 1, 1>, scalar_prefetch = 0 : i64, scratch_operands = 0 : i64, tpu.core_type = #tpu.core_type<tc>, window_params = [{transform_indices = @transform_0, window_bounds = array<i64: 8, 256>}, {transform_indices = @transform_1, window_bounds = array<i64: 256, 128>}, {transform_indices = @transform_2, window_bounds = array<i64: 1, 128>}, {transform_indices = @transform_3, window_bounds = array<i64: 8, 128>}]} {
    %c0 = arith.constant 0 : index
    %c0_0 = arith.constant 0 : index
    %0 = vector.load %arg3[%c0, %c0_0] : memref<8x256xbf16, #tpu.memory_space<vmem>>, vector<8x256xbf16>
    %c0_1 = arith.constant 0 : index
    %c0_2 = arith.constant 0 : index
    %1 = vector.load %arg4[%c0_1, %c0_2] : memref<256x128xbf16, #tpu.memory_space<vmem>>, vector<256x128xbf16>
    %cst = arith.constant dense<0.000000e+00> : vector<8x128xf32>
    %2 = tpu.matmul %0, %1, %cst {dimension_numbers = #tpu.dot_dimension_numbers<[1], [0], [0], [1], [0, 0, 1, 1], [], []>} : vector<8x256xbf16>, vector<256x128xbf16>, vector<8x128xf32> -> vector<8x128xf32>
    %c0_3 = arith.constant 0 : index
    %c0_4 = arith.constant 0 : index
    %3 = vector.load %arg5[%c0_3, %c0_4] : memref<1x128xf32, #tpu.memory_space<vmem>>, vector<1x128xf32>
    %4 = vector.broadcast %3 : vector<1x128xf32> to vector<8x128xf32>
    %5 = arith.addf %2, %4 : vector<8x128xf32>
    %6 = arith.truncf %5 : vector<8x128xf32> to vector<8x128xbf16>
    %c0_5 = arith.constant 0 : index
    %c0_6 = arith.constant 0 : index
    %7 = vector.load %arg6[%c0_5, %c0_6] : memref<8x128xbf16, #tpu.memory_space<vmem>>, vector<8x128xbf16>
    tpu.vector_store %arg6[%c0_5, %c0_6], %6 {strides = array<i32>} : memref<8x128xbf16, #tpu.memory_space<vmem>>, vector<8x128xbf16>,
    return
  }
  func.func @transform_0(%arg0: i32, %arg1: i32, %arg2: i32) -> (i32, i32) {
    %c0_i32 = arith.constant 0 : i32
    return %arg0, %arg2 : i32, i32
  }
  func.func @transform_1(%arg0: i32, %arg1: i32, %arg2: i32) -> (i32, i32) {
    %c0_i32 = arith.constant 0 : i32
    return %arg2, %arg1 : i32, i32
  }
  func.func @transform_2(%arg0: i32, %arg1: i32, %arg2: i32) -> (i32, i32) {
    %c0_i32 = arith.constant 0 : i32
    %c0_i32_0 = arith.constant 0 : i32
    return %c0_i32, %arg1 : i32, i32
  }
  func.func @transform_3(%arg0: i32, %arg1: i32, %arg2: i32) -> (i32, i32) {
    %c0_i32 = arith.constant 0 : i32
    return %arg0, %arg1 : i32, i32
  }
}

module attributes {stable_mosaic.version = 11 : i64} {
  func.func @_layernorm_kernel(%arg0: i32, %arg1: memref<16x128xbf16, #tpu.memory_space<vmem>>, %arg2: memref<1x128xf32, #tpu.memory_space<vmem>>, %arg3: memref<1x128xf32, #tpu.memory_space<vmem>>, %arg4: memref<16x128xbf16, #tpu.memory_space<vmem>>) attributes {dimension_semantics = [#tpu.dimension_semantics<parallel>], iteration_bounds = array<i64: 1>, scalar_prefetch = 0 : i64, scratch_operands = 0 : i64, tpu.core_type = #tpu.core_type<tc>, window_params = [{transform_indices = @transform_0, window_bounds = array<i64: 16, 128>}, {pipeline_mode = #tpu.pipeline_mode<synchronous>, transform_indices = @transform_1, window_bounds = array<i64: 1, 128>}, {pipeline_mode = #tpu.pipeline_mode<synchronous>, transform_indices = @transform_2, window_bounds = array<i64: 1, 128>}, {transform_indices = @transform_3, window_bounds = array<i64: 16, 128>}]} {
    %c0 = arith.constant 0 : index
    %c0_0 = arith.constant 0 : index
    %0 = vector.load %arg1[%c0, %c0_0] : memref<16x128xbf16, #tpu.memory_space<vmem>>, vector<16x128xbf16>
    %1 = arith.extf %0 : vector<16x128xbf16> to vector<16x128xf32>
    %cst = arith.constant dense<0.000000e+00> : vector<16xf32>
    %2 = vector.multi_reduction <add>, %1, %cst [1] : vector<16x128xf32> to vector<16xf32>
    %3 = vector.shape_cast %2 : vector<16xf32> to vector<16x1xf32>
    %cst_1 = arith.constant 1.280000e+02 : f32
    %4 = vector.broadcast %cst_1 : f32 to vector<16x1xf32>
    %5 = arith.divf %3, %4 : vector<16x1xf32>
    %6 = vector.broadcast %5 : vector<16x1xf32> to vector<16x128xf32>
    %7 = arith.subf %1, %6 : vector<16x128xf32>
    %8 = arith.mulf %7, %7 : vector<16x128xf32>
    %cst_2 = arith.constant dense<0.000000e+00> : vector<16xf32>
    %9 = vector.multi_reduction <add>, %8, %cst_2 [1] : vector<16x128xf32> to vector<16xf32>
    %10 = vector.shape_cast %9 : vector<16xf32> to vector<16x1xf32>
    %cst_3 = arith.constant 1.280000e+02 : f32
    %11 = vector.broadcast %cst_3 : f32 to vector<16x1xf32>
    %12 = arith.divf %10, %11 : vector<16x1xf32>
    %13 = vector.broadcast %5 : vector<16x1xf32> to vector<16x128xf32>
    %14 = arith.subf %1, %13 : vector<16x128xf32>
    %cst_4 = arith.constant 9.99999974E-6 : f32
    %15 = vector.broadcast %cst_4 : f32 to vector<16x1xf32>
    %16 = arith.addf %12, %15 : vector<16x1xf32>
    %17 = math.rsqrt %16 : vector<16x1xf32>
    %18 = vector.broadcast %17 : vector<16x1xf32> to vector<16x128xf32>
    %19 = arith.mulf %14, %18 : vector<16x128xf32>
    %c0_5 = arith.constant 0 : index
    %c0_6 = arith.constant 0 : index
    %20 = vector.load %arg2[%c0_5, %c0_6] : memref<1x128xf32, #tpu.memory_space<vmem>>, vector<1x128xf32>
    %21 = vector.broadcast %20 : vector<1x128xf32> to vector<16x128xf32>
    %22 = arith.mulf %19, %21 : vector<16x128xf32>
    %c0_7 = arith.constant 0 : index
    %c0_8 = arith.constant 0 : index
    %23 = vector.load %arg3[%c0_7, %c0_8] : memref<1x128xf32, #tpu.memory_space<vmem>>, vector<1x128xf32>
    %24 = vector.broadcast %23 : vector<1x128xf32> to vector<16x128xf32>
    %25 = arith.addf %22, %24 : vector<16x128xf32>
    %26 = arith.truncf %25 : vector<16x128xf32> to vector<16x128xbf16>
    %c0_9 = arith.constant 0 : index
    %c0_10 = arith.constant 0 : index
    %27 = vector.load %arg4[%c0_9, %c0_10] : memref<16x128xbf16, #tpu.memory_space<vmem>>, vector<16x128xbf16>
    tpu.vector_store %arg4[%c0_9, %c0_10], %26 {strides = array<i32>} : memref<16x128xbf16, #tpu.memory_space<vmem>>, vector<16x128xbf16>,
    return
  }
  func.func @transform_0(%arg0: i32) -> (i32, i32) {
    %c0_i32 = arith.constant 0 : i32
    %c0_i32_0 = arith.constant 0 : i32
    return %arg0, %c0_i32 : i32, i32
  }
  func.func @transform_1(%arg0: i32) -> (i32, i32) {
    %c0_i32 = arith.constant 0 : i32
    %c0_i32_0 = arith.constant 0 : i32
    %c0_i32_1 = arith.constant 0 : i32
    return %c0_i32, %c0_i32_0 : i32, i32
  }
  func.func @transform_2(%arg0: i32) -> (i32, i32) {
    %c0_i32 = arith.constant 0 : i32
    %c0_i32_0 = arith.constant 0 : i32
    %c0_i32_1 = arith.constant 0 : i32
    return %c0_i32, %c0_i32_0 : i32, i32
  }
  func.func @transform_3(%arg0: i32) -> (i32, i32) {
    %c0_i32 = arith.constant 0 : i32
    %c0_i32_0 = arith.constant 0 : i32
    return %arg0, %c0_i32 : i32, i32
  }
}

module attributes {stable_mosaic.version = 11 : i64} {
  func.func @_fused_linear_kernel(%arg0: i32, %arg1: i32, %arg2: i32, %arg3: memref<16x128xbf16, #tpu.memory_space<vmem>>, %arg4: memref<128x384xbf16, #tpu.memory_space<vmem>>, %arg5: memref<1x384xf32, #tpu.memory_space<vmem>>, %arg6: memref<1x128xf32, #tpu.memory_space<vmem>>, %arg7: memref<1x128xf32, #tpu.memory_space<vmem>>, %arg8: memref<16x384xbf16, #tpu.memory_space<vmem>>, %arg9: memref<16x128xbf16, #tpu.memory_space<vmem>>) attributes {dimension_semantics = [#tpu.dimension_semantics<parallel>, #tpu.dimension_semantics<arbitrary>, #tpu.dimension_semantics<arbitrary>], iteration_bounds = array<i64: 1, 1, 1>, scalar_prefetch = 0 : i64, scratch_operands = 1 : i64, tpu.core_type = #tpu.core_type<tc>, window_params = [{transform_indices = @transform_0, window_bounds = array<i64: 16, 128>}, {transform_indices = @transform_1, window_bounds = array<i64: 128, 384>}, {transform_indices = @transform_2, window_bounds = array<i64: 1, 384>}, {transform_indices = @transform_3, window_bounds = array<i64: 1, 128>}, {transform_indices = @transform_4, window_bounds = array<i64: 1, 128>}, {transform_indices = @transform_5, window_bounds = array<i64: 16, 384>}]} {
    %c0_i32 = arith.constant 0 : i32
    %0 = arith.cmpi eq, %arg1, %c0_i32 : i32
    %1 = arith.extui %0 : i1 to i32
    %c0_i32_0 = arith.constant 0 : i32
    %2 = arith.cmpi ne, %1, %c0_i32_0 : i32
    scf.if %2 {
      %c0_8 = arith.constant 0 : index
      %c0_9 = arith.constant 0 : index
      %11 = vector.load %arg3[%c0_8, %c0_9] : memref<16x128xbf16, #tpu.memory_space<vmem>>, vector<16x128xbf16>
      %12 = arith.extf %11 : vector<16x128xbf16> to vector<16x128xf32>
      %cst_10 = arith.constant dense<0.000000e+00> : vector<16xf32>
      %13 = vector.multi_reduction <add>, %12, %cst_10 [1] : vector<16x128xf32> to vector<16xf32>
      %14 = vector.shape_cast %13 : vector<16xf32> to vector<16x1xf32>
      %cst_11 = arith.constant 1.280000e+02 : f32
      %15 = vector.broadcast %cst_11 : f32 to vector<16x1xf32>
      %16 = arith.divf %14, %15 : vector<16x1xf32>
      %17 = vector.broadcast %16 : vector<16x1xf32> to vector<16x128xf32>
      %18 = arith.subf %12, %17 : vector<16x128xf32>
      %19 = arith.mulf %18, %18 : vector<16x128xf32>
      %cst_12 = arith.constant dense<0.000000e+00> : vector<16xf32>
      %20 = vector.multi_reduction <add>, %19, %cst_12 [1] : vector<16x128xf32> to vector<16xf32>
      %21 = vector.shape_cast %20 : vector<16xf32> to vector<16x1xf32>
      %cst_13 = arith.constant 1.280000e+02 : f32
      %22 = vector.broadcast %cst_13 : f32 to vector<16x1xf32>
      %23 = arith.divf %21, %22 : vector<16x1xf32>
      %24 = vector.broadcast %16 : vector<16x1xf32> to vector<16x128xf32>
      %25 = arith.subf %12, %24 : vector<16x128xf32>
      %cst_14 = arith.constant 9.99999974E-6 : f32
      %26 = vector.broadcast %cst_14 : f32 to vector<16x1xf32>
      %27 = arith.addf %23, %26 : vector<16x1xf32>
      %28 = math.rsqrt %27 : vector<16x1xf32>
      %29 = vector.broadcast %28 : vector<16x1xf32> to vector<16x128xf32>
      %30 = arith.mulf %25, %29 : vector<16x128xf32>
      %c0_15 = arith.constant 0 : index
      %c0_16 = arith.constant 0 : index
      %31 = vector.load %arg6[%c0_15, %c0_16] : memref<1x128xf32, #tpu.memory_space<vmem>>, vector<1x128xf32>
      %32 = vector.broadcast %31 : vector<1x128xf32> to vector<16x128xf32>
      %33 = arith.mulf %30, %32 : vector<16x128xf32>
      %c0_17 = arith.constant 0 : index
      %c0_18 = arith.constant 0 : index
      %34 = vector.load %arg7[%c0_17, %c0_18] : memref<1x128xf32, #tpu.memory_space<vmem>>, vector<1x128xf32>
      %35 = vector.broadcast %34 : vector<1x128xf32> to vector<16x128xf32>
      %36 = arith.addf %33, %35 : vector<16x128xf32>
      %37 = arith.truncf %36 : vector<16x128xf32> to vector<16x128xbf16>
      %c0_19 = arith.constant 0 : index
      %c0_20 = arith.constant 0 : index
      %38 = vector.load %arg9[%c0_19, %c0_20] : memref<16x128xbf16, #tpu.memory_space<vmem>>, vector<16x128xbf16>
      tpu.vector_store %arg9[%c0_19, %c0_20], %37 {strides = array<i32>} : memref<16x128xbf16, #tpu.memory_space<vmem>>, vector<16x128xbf16>,
    } else {
    }
    %c0 = arith.constant 0 : index
    %c0_1 = arith.constant 0 : index
    %3 = vector.load %arg9[%c0, %c0_1] : memref<16x128xbf16, #tpu.memory_space<vmem>>, vector<16x128xbf16>
    %c0_2 = arith.constant 0 : index
    %c0_3 = arith.constant 0 : index
    %4 = vector.load %arg4[%c0_2, %c0_3] : memref<128x384xbf16, #tpu.memory_space<vmem>>, vector<128x384xbf16>
    %cst = arith.constant dense<0.000000e+00> : vector<16x384xf32>
    %5 = tpu.matmul %3, %4, %cst {dimension_numbers = #tpu.dot_dimension_numbers<[1], [0], [0], [1], [0, 0, 1, 1], [], []>} : vector<16x128xbf16>, vector<128x384xbf16>, vector<16x384xf32> -> vector<16x384xf32>
    %c0_4 = arith.constant 0 : index
    %c0_5 = arith.constant 0 : index
    %6 = vector.load %arg5[%c0_4, %c0_5] : memref<1x384xf32, #tpu.memory_space<vmem>>, vector<1x384xf32>
    %7 = vector.broadcast %6 : vector<1x384xf32> to vector<16x384xf32>
    %8 = arith.addf %5, %7 : vector<16x384xf32>
    %9 = arith.truncf %8 : vector<16x384xf32> to vector<16x384xbf16>
    %c0_6 = arith.constant 0 : index
    %c0_7 = arith.constant 0 : index
    %10 = vector.load %arg8[%c0_6, %c0_7] : memref<16x384xbf16, #tpu.memory_space<vmem>>, vector<16x384xbf16>
    tpu.vector_store %arg8[%c0_6, %c0_7], %9 {strides = array<i32>} : memref<16x384xbf16, #tpu.memory_space<vmem>>, vector<16x384xbf16>,
    return
  }
  func.func @transform_0(%arg0: i32, %arg1: i32, %arg2: i32) -> (i32, i32) {
    %c0_i32 = arith.constant 0 : i32
    return %arg0, %arg2 : i32, i32
  }
  func.func @transform_1(%arg0: i32, %arg1: i32, %arg2: i32) -> (i32, i32) {
    %c0_i32 = arith.constant 0 : i32
    return %arg2, %arg1 : i32, i32
  }
  func.func @transform_2(%arg0: i32, %arg1: i32, %arg2: i32) -> (i32, i32) {
    %c0_i32 = arith.constant 0 : i32
    %c0_i32_0 = arith.constant 0 : i32
    return %c0_i32, %arg1 : i32, i32
  }
  func.func @transform_3(%arg0: i32, %arg1: i32, %arg2: i32) -> (i32, i32) {
    %c0_i32 = arith.constant 0 : i32
    %c0_i32_0 = arith.constant 0 : i32
    return %c0_i32, %arg2 : i32, i32
  }
  func.func @transform_4(%arg0: i32, %arg1: i32, %arg2: i32) -> (i32, i32) {
    %c0_i32 = arith.constant 0 : i32
    %c0_i32_0 = arith.constant 0 : i32
    return %c0_i32, %arg2 : i32, i32
  }
  func.func @transform_5(%arg0: i32, %arg1: i32, %arg2: i32) -> (i32, i32) {
    %c0_i32 = arith.constant 0 : i32
    return %arg0, %arg1 : i32, i32
  }
}

module attributes {stable_mosaic.version = 11 : i64} {
  func.func @_attention_kernel(%arg0: i32, %arg1: i32, %arg2: i32, %arg3: memref<1x8x128xbf16, #tpu.memory_space<vmem>>, %arg4: memref<1x8x128xbf16, #tpu.memory_space<vmem>>, %arg5: memref<1x8x128xbf16, #tpu.memory_space<vmem>>, %arg6: memref<1x8x128xbf16, #tpu.memory_space<vmem>>) attributes {dimension_semantics = [#tpu.dimension_semantics<parallel>, #tpu.dimension_semantics<parallel>, #tpu.dimension_semantics<parallel>], iteration_bounds = array<i64: 2, 1, 1>, scalar_prefetch = 0 : i64, scratch_operands = 0 : i64, tpu.core_type = #tpu.core_type<tc>, window_params = [{transform_indices = @transform_0, window_bounds = array<i64: 1, 8, 128>}, {transform_indices = @transform_1, window_bounds = array<i64: 1, 8, 128>}, {transform_indices = @transform_2, window_bounds = array<i64: 1, 8, 128>}, {transform_indices = @transform_3, window_bounds = array<i64: 1, 8, 128>}]} {
    %0 = tpu.iota {dimensions = array<i32: 1>} : vector<8x8xi32>
    %c5_i32 = arith.constant 5 : i32
    %1 = vector.broadcast %c5_i32 : i32 to vector<8x8xi32>
    %2 = arith.cmpi slt, %0, %1 : vector<8x8xi32>
    %c0 = arith.constant 0 : index
    %c0_0 = arith.constant 0 : index
    %c0_1 = arith.constant 0 : index
    %3 = vector.load %arg3[%c0, %c0_0, %c0_1] : memref<1x8x128xbf16, #tpu.memory_space<vmem>>, vector<1x8x32xbf16>
    %4 = vector.shape_cast %3 : vector<1x8x32xbf16> to vector<8x32xbf16>
    %c0_2 = arith.constant 0 : index
    %c0_3 = arith.constant 0 : index
    %c0_4 = arith.constant 0 : index
    %5 = vector.load %arg4[%c0_2, %c0_3, %c0_4] : memref<1x8x128xbf16, #tpu.memory_space<vmem>>, vector<1x8x32xbf16>
    %6 = vector.shape_cast %5 : vector<1x8x32xbf16> to vector<8x32xbf16>
    %c0_5 = arith.constant 0 : index
    %c0_6 = arith.constant 0 : index
    %c0_7 = arith.constant 0 : index
    %7 = vector.load %arg5[%c0_5, %c0_6, %c0_7] : memref<1x8x128xbf16, #tpu.memory_space<vmem>>, vector<1x8x32xbf16>
    %8 = vector.shape_cast %7 : vector<1x8x32xbf16> to vector<8x32xbf16>
    %cst = arith.constant dense<0.000000e+00> : vector<8x8xf32>
    %9 = tpu.matmul %4, %6, %cst {dimension_numbers = #tpu.dot_dimension_numbers<[1], [1], [0], [0], [0, 0, 1, 0], [], []>} : vector<8x32xbf16>, vector<8x32xbf16>, vector<8x8xf32> -> vector<8x8xf32>
    %cst_8 = arith.constant 0.176776692 : f32
    %10 = vector.broadcast %cst_8 : f32 to vector<8x8xf32>
    %11 = arith.mulf %9, %10 : vector<8x8xf32>
    %cst_9 = arith.constant -1.000000e+30 : f32
    %12 = vector.broadcast %cst_9 : f32 to vector<8x8xf32>
    %13 = arith.select %2, %11, %12 : vector<8x8xi1>, vector<8x8xf32>
    %cst_10 = arith.constant dense<0xFF800000> : vector<8xf32>
    %14 = vector.multi_reduction <maximumf>, %13, %cst_10 [1] : vector<8x8xf32> to vector<8xf32>
    %15 = vector.shape_cast %14 : vector<8xf32> to vector<8x1xf32>
    %16 = vector.broadcast %15 : vector<8x1xf32> to vector<8x8xf32>
    %17 = arith.subf %13, %16 : vector<8x8xf32>
    %18 = math.exp %17 : vector<8x8xf32>
    %cst_11 = arith.constant dense<0.000000e+00> : vector<8xf32>
    %19 = vector.multi_reduction <add>, %18, %cst_11 [1] : vector<8x8xf32> to vector<8xf32>
    %20 = vector.shape_cast %19 : vector<8xf32> to vector<8x1xf32>
    %21 = tpu.reciprocal %20 {approx = true} : vector<8x1xf32> -> vector<8x1xf32>
    %22 = vector.broadcast %21 : vector<8x1xf32> to vector<8x8xf32>
    %23 = arith.mulf %18, %22 : vector<8x8xf32>
    %24 = arith.truncf %23 : vector<8x8xf32> to vector<8x8xbf16>
    %cst_12 = arith.constant dense<0.000000e+00> : vector<8x32xf32>
    %25 = tpu.matmul %24, %8, %cst_12 {dimension_numbers = #tpu.dot_dimension_numbers<[1], [0], [0], [1], [0, 0, 1, 1], [], []>} : vector<8x8xbf16>, vector<8x32xbf16>, vector<8x32xf32> -> vector<8x32xf32>
    %c0_13 = arith.constant 0 : index
    %c0_14 = arith.constant 0 : index
    %c32 = arith.constant 32 : index
    %26 = vector.load %arg3[%c0_13, %c0_14, %c32] : memref<1x8x128xbf16, #tpu.memory_space<vmem>>, vector<1x8x32xbf16>
    %27 = vector.shape_cast %26 : vector<1x8x32xbf16> to vector<8x32xbf16>
    %c0_15 = arith.constant 0 : index
    %c0_16 = arith.constant 0 : index
    %c32_17 = arith.constant 32 : index
    %28 = vector.load %arg4[%c0_15, %c0_16, %c32_17] : memref<1x8x128xbf16, #tpu.memory_space<vmem>>, vector<1x8x32xbf16>
    %29 = vector.shape_cast %28 : vector<1x8x32xbf16> to vector<8x32xbf16>
    %c0_18 = arith.constant 0 : index
    %c0_19 = arith.constant 0 : index
    %c32_20 = arith.constant 32 : index
    %30 = vector.load %arg5[%c0_18, %c0_19, %c32_20] : memref<1x8x128xbf16, #tpu.memory_space<vmem>>, vector<1x8x32xbf16>
    %31 = vector.shape_cast %30 : vector<1x8x32xbf16> to vector<8x32xbf16>
    %cst_21 = arith.constant dense<0.000000e+00> : vector<8x8xf32>
    %32 = tpu.matmul %27, %29, %cst_21 {dimension_numbers = #tpu.dot_dimension_numbers<[1], [1], [0], [0], [0, 0, 1, 0], [], []>} : vector<8x32xbf16>, vector<8x32xbf16>, vector<8x8xf32> -> vector<8x8xf32>
    %cst_22 = arith.constant 0.176776692 : f32
    %33 = vector.broadcast %cst_22 : f32 to vector<8x8xf32>
    %34 = arith.mulf %32, %33 : vector<8x8xf32>
    %cst_23 = arith.constant -1.000000e+30 : f32
    %35 = vector.broadcast %cst_23 : f32 to vector<8x8xf32>
    %36 = arith.select %2, %34, %35 : vector<8x8xi1>, vector<8x8xf32>
    %cst_24 = arith.constant dense<0xFF800000> : vector<8xf32>
    %37 = vector.multi_reduction <maximumf>, %36, %cst_24 [1] : vector<8x8xf32> to vector<8xf32>
    %38 = vector.shape_cast %37 : vector<8xf32> to vector<8x1xf32>
    %39 = vector.broadcast %38 : vector<8x1xf32> to vector<8x8xf32>
    %40 = arith.subf %36, %39 : vector<8x8xf32>
    %41 = math.exp %40 : vector<8x8xf32>
    %cst_25 = arith.constant dense<0.000000e+00> : vector<8xf32>
    %42 = vector.multi_reduction <add>, %41, %cst_25 [1] : vector<8x8xf32> to vector<8xf32>
    %43 = vector.shape_cast %42 : vector<8xf32> to vector<8x1xf32>
    %44 = tpu.reciprocal %43 {approx = true} : vector<8x1xf32> -> vector<8x1xf32>
    %45 = vector.broadcast %44 : vector<8x1xf32> to vector<8x8xf32>
    %46 = arith.mulf %41, %45 : vector<8x8xf32>
    %47 = arith.truncf %46 : vector<8x8xf32> to vector<8x8xbf16>
    %cst_26 = arith.constant dense<0.000000e+00> : vector<8x32xf32>
    %48 = tpu.matmul %47, %31, %cst_26 {dimension_numbers = #tpu.dot_dimension_numbers<[1], [0], [0], [1], [0, 0, 1, 1], [], []>} : vector<8x8xbf16>, vector<8x32xbf16>, vector<8x32xf32> -> vector<8x32xf32>
    %c0_27 = arith.constant 0 : index
    %c0_28 = arith.constant 0 : index
    %c64 = arith.constant 64 : index
    %49 = vector.load %arg3[%c0_27, %c0_28, %c64] : memref<1x8x128xbf16, #tpu.memory_space<vmem>>, vector<1x8x32xbf16>
    %50 = vector.shape_cast %49 : vector<1x8x32xbf16> to vector<8x32xbf16>
    %c0_29 = arith.constant 0 : index
    %c0_30 = arith.constant 0 : index
    %c64_31 = arith.constant 64 : index
    %51 = vector.load %arg4[%c0_29, %c0_30, %c64_31] : memref<1x8x128xbf16, #tpu.memory_space<vmem>>, vector<1x8x32xbf16>
    %52 = vector.shape_cast %51 : vector<1x8x32xbf16> to vector<8x32xbf16>
    %c0_32 = arith.constant 0 : index
    %c0_33 = arith.constant 0 : index
    %c64_34 = arith.constant 64 : index
    %53 = vector.load %arg5[%c0_32, %c0_33, %c64_34] : memref<1x8x128xbf16, #tpu.memory_space<vmem>>, vector<1x8x32xbf16>
    %54 = vector.shape_cast %53 : vector<1x8x32xbf16> to vector<8x32xbf16>
    %cst_35 = arith.constant dense<0.000000e+00> : vector<8x8xf32>
    %55 = tpu.matmul %50, %52, %cst_35 {dimension_numbers = #tpu.dot_dimension_numbers<[1], [1], [0], [0], [0, 0, 1, 0], [], []>} : vector<8x32xbf16>, vector<8x32xbf16>, vector<8x8xf32> -> vector<8x8xf32>
    %cst_36 = arith.constant 0.176776692 : f32
    %56 = vector.broadcast %cst_36 : f32 to vector<8x8xf32>
    %57 = arith.mulf %55, %56 : vector<8x8xf32>
    %cst_37 = arith.constant -1.000000e+30 : f32
    %58 = vector.broadcast %cst_37 : f32 to vector<8x8xf32>
    %59 = arith.select %2, %57, %58 : vector<8x8xi1>, vector<8x8xf32>
    %cst_38 = arith.constant dense<0xFF800000> : vector<8xf32>
    %60 = vector.multi_reduction <maximumf>, %59, %cst_38 [1] : vector<8x8xf32> to vector<8xf32>
    %61 = vector.shape_cast %60 : vector<8xf32> to vector<8x1xf32>
    %62 = vector.broadcast %61 : vector<8x1xf32> to vector<8x8xf32>
    %63 = arith.subf %59, %62 : vector<8x8xf32>
    %64 = math.exp %63 : vector<8x8xf32>
    %cst_39 = arith.constant dense<0.000000e+00> : vector<8xf32>
    %65 = vector.multi_reduction <add>, %64, %cst_39 [1] : vector<8x8xf32> to vector<8xf32>
    %66 = vector.shape_cast %65 : vector<8xf32> to vector<8x1xf32>
    %67 = tpu.reciprocal %66 {approx = true} : vector<8x1xf32> -> vector<8x1xf32>
    %68 = vector.broadcast %67 : vector<8x1xf32> to vector<8x8xf32>
    %69 = arith.mulf %64, %68 : vector<8x8xf32>
    %70 = arith.truncf %69 : vector<8x8xf32> to vector<8x8xbf16>
    %cst_40 = arith.constant dense<0.000000e+00> : vector<8x32xf32>
    %71 = tpu.matmul %70, %54, %cst_40 {dimension_numbers = #tpu.dot_dimension_numbers<[1], [0], [0], [1], [0, 0, 1, 1], [], []>} : vector<8x8xbf16>, vector<8x32xbf16>, vector<8x32xf32> -> vector<8x32xf32>
    %c0_41 = arith.constant 0 : index
    %c0_42 = arith.constant 0 : index
    %c96 = arith.constant 96 : index
    %72 = vector.load %arg3[%c0_41, %c0_42, %c96] : memref<1x8x128xbf16, #tpu.memory_space<vmem>>, vector<1x8x32xbf16>
    %73 = vector.shape_cast %72 : vector<1x8x32xbf16> to vector<8x32xbf16>
    %c0_43 = arith.constant 0 : index
    %c0_44 = arith.constant 0 : index
    %c96_45 = arith.constant 96 : index
    %74 = vector.load %arg4[%c0_43, %c0_44, %c96_45] : memref<1x8x128xbf16, #tpu.memory_space<vmem>>, vector<1x8x32xbf16>
    %75 = vector.shape_cast %74 : vector<1x8x32xbf16> to vector<8x32xbf16>
    %c0_46 = arith.constant 0 : index
    %c0_47 = arith.constant 0 : index
    %c96_48 = arith.constant 96 : index
    %76 = vector.load %arg5[%c0_46, %c0_47, %c96_48] : memref<1x8x128xbf16, #tpu.memory_space<vmem>>, vector<1x8x32xbf16>
    %77 = vector.shape_cast %76 : vector<1x8x32xbf16> to vector<8x32xbf16>
    %cst_49 = arith.constant dense<0.000000e+00> : vector<8x8xf32>
    %78 = tpu.matmul %73, %75, %cst_49 {dimension_numbers = #tpu.dot_dimension_numbers<[1], [1], [0], [0], [0, 0, 1, 0], [], []>} : vector<8x32xbf16>, vector<8x32xbf16>, vector<8x8xf32> -> vector<8x8xf32>
    %cst_50 = arith.constant 0.176776692 : f32
    %79 = vector.broadcast %cst_50 : f32 to vector<8x8xf32>
    %80 = arith.mulf %78, %79 : vector<8x8xf32>
    %cst_51 = arith.constant -1.000000e+30 : f32
    %81 = vector.broadcast %cst_51 : f32 to vector<8x8xf32>
    %82 = arith.select %2, %80, %81 : vector<8x8xi1>, vector<8x8xf32>
    %cst_52 = arith.constant dense<0xFF800000> : vector<8xf32>
    %83 = vector.multi_reduction <maximumf>, %82, %cst_52 [1] : vector<8x8xf32> to vector<8xf32>
    %84 = vector.shape_cast %83 : vector<8xf32> to vector<8x1xf32>
    %85 = vector.broadcast %84 : vector<8x1xf32> to vector<8x8xf32>
    %86 = arith.subf %82, %85 : vector<8x8xf32>
    %87 = math.exp %86 : vector<8x8xf32>
    %cst_53 = arith.constant dense<0.000000e+00> : vector<8xf32>
    %88 = vector.multi_reduction <add>, %87, %cst_53 [1] : vector<8x8xf32> to vector<8xf32>
    %89 = vector.shape_cast %88 : vector<8xf32> to vector<8x1xf32>
    %90 = tpu.reciprocal %89 {approx = true} : vector<8x1xf32> -> vector<8x1xf32>
    %91 = vector.broadcast %90 : vector<8x1xf32> to vector<8x8xf32>
    %92 = arith.mulf %87, %91 : vector<8x8xf32>
    %93 = arith.truncf %92 : vector<8x8xf32> to vector<8x8xbf16>
    %cst_54 = arith.constant dense<0.000000e+00> : vector<8x32xf32>
    %94 = tpu.matmul %93, %77, %cst_54 {dimension_numbers = #tpu.dot_dimension_numbers<[1], [0], [0], [1], [0, 0, 1, 1], [], []>} : vector<8x8xbf16>, vector<8x32xbf16>, vector<8x32xf32> -> vector<8x32xf32>
    %95 = tpu.concatenate %25, %48, %71, %94 in 1 : vector<8x32xf32>, vector<8x32xf32>, vector<8x32xf32>, vector<8x32xf32> -> vector<8x128xf32>
    %96 = arith.truncf %95 : vector<8x128xf32> to vector<8x128xbf16>
    %c0_55 = arith.constant 0 : index
    %c0_56 = arith.constant 0 : index
    %c0_57 = arith.constant 0 : index
    %97 = vector.load %arg6[%c0_55, %c0_56, %c0_57] : memref<1x8x128xbf16, #tpu.memory_space<vmem>>, vector<1x8x128xbf16>
    %98 = vector.shape_cast %97 : vector<1x8x128xbf16> to vector<8x128xbf16>
    %99 = vector.shape_cast %96 : vector<8x128xbf16> to vector<1x8x128xbf16>
    tpu.vector_store %arg6[%c0_55, %c0_56, %c0_57], %99 {strides = array<i32>} : memref<1x8x128xbf16, #tpu.memory_space<vmem>>, vector<1x8x128xbf16>,
    return
  }
  func.func @transform_0(%arg0: i32, %arg1: i32, %arg2: i32) -> (i32, i32, i32) {
    %c0_i32 = arith.constant 0 : i32
    return %arg0, %arg2, %arg1 : i32, i32, i32
  }
  func.func @transform_1(%arg0: i32, %arg1: i32, %arg2: i32) -> (i32, i32, i32) {
    %c1_i32 = arith.constant 1 : i32
    %0 = arith.addi %c1_i32, %arg1 : i32
    %c0_i32 = arith.constant 0 : i32
    %c0_i32_0 = arith.constant 0 : i32
    return %arg0, %c0_i32, %0 : i32, i32, i32
  }
  func.func @transform_2(%arg0: i32, %arg1: i32, %arg2: i32) -> (i32, i32, i32) {
    %c2_i32 = arith.constant 2 : i32
    %0 = arith.addi %c2_i32, %arg1 : i32
    %c0_i32 = arith.constant 0 : i32
    %c0_i32_0 = arith.constant 0 : i32
    return %arg0, %c0_i32, %0 : i32, i32, i32
  }
  func.func @transform_3(%arg0: i32, %arg1: i32, %arg2: i32) -> (i32, i32, i32) {
    %c0_i32 = arith.constant 0 : i32
    return %arg0, %arg2, %arg1 : i32, i32, i32
  }
}

module attributes {stable_mosaic.version = 11 : i64} {
  func.func @_fused_linear_kernel(%arg0: i32, %arg1: i32, %arg2: i32, %arg3: memref<16x128xbf16, #tpu.memory_space<vmem>>, %arg4: memref<128x512xbf16, #tpu.memory_space<vmem>>, %arg5: memref<1x512xf32, #tpu.memory_space<vmem>>, %arg6: memref<1x128xf32, #tpu.memory_space<vmem>>, %arg7: memref<1x128xf32, #tpu.memory_space<vmem>>, %arg8: memref<16x512xbf16, #tpu.memory_space<vmem>>, %arg9: memref<16x128xbf16, #tpu.memory_space<vmem>>) attributes {dimension_semantics = [#tpu.dimension_semantics<parallel>, #tpu.dimension_semantics<arbitrary>, #tpu.dimension_semantics<arbitrary>], iteration_bounds = array<i64: 1, 1, 1>, scalar_prefetch = 0 : i64, scratch_operands = 1 : i64, tpu.core_type = #tpu.core_type<tc>, window_params = [{transform_indices = @transform_0, window_bounds = array<i64: 16, 128>}, {transform_indices = @transform_1, window_bounds = array<i64: 128, 512>}, {transform_indices = @transform_2, window_bounds = array<i64: 1, 512>}, {transform_indices = @transform_3, window_bounds = array<i64: 1, 128>}, {transform_indices = @transform_4, window_bounds = array<i64: 1, 128>}, {transform_indices = @transform_5, window_bounds = array<i64: 16, 512>}]} {
    %c0_i32 = arith.constant 0 : i32
    %0 = arith.cmpi eq, %arg1, %c0_i32 : i32
    %1 = arith.extui %0 : i1 to i32
    %c0_i32_0 = arith.constant 0 : i32
    %2 = arith.cmpi ne, %1, %c0_i32_0 : i32
    scf.if %2 {
      %c0_10 = arith.constant 0 : index
      %c0_11 = arith.constant 0 : index
      %19 = vector.load %arg3[%c0_10, %c0_11] : memref<16x128xbf16, #tpu.memory_space<vmem>>, vector<16x128xbf16>
      %20 = arith.extf %19 : vector<16x128xbf16> to vector<16x128xf32>
      %cst_12 = arith.constant dense<0.000000e+00> : vector<16xf32>
      %21 = vector.multi_reduction <add>, %20, %cst_12 [1] : vector<16x128xf32> to vector<16xf32>
      %22 = vector.shape_cast %21 : vector<16xf32> to vector<16x1xf32>
      %cst_13 = arith.constant 1.280000e+02 : f32
      %23 = vector.broadcast %cst_13 : f32 to vector<16x1xf32>
      %24 = arith.divf %22, %23 : vector<16x1xf32>
      %25 = vector.broadcast %24 : vector<16x1xf32> to vector<16x128xf32>
      %26 = arith.subf %20, %25 : vector<16x128xf32>
      %27 = arith.mulf %26, %26 : vector<16x128xf32>
      %cst_14 = arith.constant dense<0.000000e+00> : vector<16xf32>
      %28 = vector.multi_reduction <add>, %27, %cst_14 [1] : vector<16x128xf32> to vector<16xf32>
      %29 = vector.shape_cast %28 : vector<16xf32> to vector<16x1xf32>
      %cst_15 = arith.constant 1.280000e+02 : f32
      %30 = vector.broadcast %cst_15 : f32 to vector<16x1xf32>
      %31 = arith.divf %29, %30 : vector<16x1xf32>
      %32 = vector.broadcast %24 : vector<16x1xf32> to vector<16x128xf32>
      %33 = arith.subf %20, %32 : vector<16x128xf32>
      %cst_16 = arith.constant 9.99999974E-6 : f32
      %34 = vector.broadcast %cst_16 : f32 to vector<16x1xf32>
      %35 = arith.addf %31, %34 : vector<16x1xf32>
      %36 = math.rsqrt %35 : vector<16x1xf32>
      %37 = vector.broadcast %36 : vector<16x1xf32> to vector<16x128xf32>
      %38 = arith.mulf %33, %37 : vector<16x128xf32>
      %c0_17 = arith.constant 0 : index
      %c0_18 = arith.constant 0 : index
      %39 = vector.load %arg6[%c0_17, %c0_18] : memref<1x128xf32, #tpu.memory_space<vmem>>, vector<1x128xf32>
      %40 = vector.broadcast %39 : vector<1x128xf32> to vector<16x128xf32>
      %41 = arith.mulf %38, %40 : vector<16x128xf32>
      %c0_19 = arith.constant 0 : index
      %c0_20 = arith.constant 0 : index
      %42 = vector.load %arg7[%c0_19, %c0_20] : memref<1x128xf32, #tpu.memory_space<vmem>>, vector<1x128xf32>
      %43 = vector.broadcast %42 : vector<1x128xf32> to vector<16x128xf32>
      %44 = arith.addf %41, %43 : vector<16x128xf32>
      %45 = arith.truncf %44 : vector<16x128xf32> to vector<16x128xbf16>
      %c0_21 = arith.constant 0 : index
      %c0_22 = arith.constant 0 : index
      %46 = vector.load %arg9[%c0_21, %c0_22] : memref<16x128xbf16, #tpu.memory_space<vmem>>, vector<16x128xbf16>
      tpu.vector_store %arg9[%c0_21, %c0_22], %45 {strides = array<i32>} : memref<16x128xbf16, #tpu.memory_space<vmem>>, vector<16x128xbf16>,
    } else {
    }
    %c0 = arith.constant 0 : index
    %c0_1 = arith.constant 0 : index
    %3 = vector.load %arg9[%c0, %c0_1] : memref<16x128xbf16, #tpu.memory_space<vmem>>, vector<16x128xbf16>
    %c0_2 = arith.constant 0 : index
    %c0_3 = arith.constant 0 : index
    %4 = vector.load %arg4[%c0_2, %c0_3] : memref<128x512xbf16, #tpu.memory_space<vmem>>, vector<128x512xbf16>
    %cst = arith.constant dense<0.000000e+00> : vector<16x512xf32>
    %5 = tpu.matmul %3, %4, %cst {dimension_numbers = #tpu.dot_dimension_numbers<[1], [0], [0], [1], [0, 0, 1, 1], [], []>} : vector<16x128xbf16>, vector<128x512xbf16>, vector<16x512xf32> -> vector<16x512xf32>
    %c0_4 = arith.constant 0 : index
    %c0_5 = arith.constant 0 : index
    %6 = vector.load %arg5[%c0_4, %c0_5] : memref<1x512xf32, #tpu.memory_space<vmem>>, vector<1x512xf32>
    %7 = vector.broadcast %6 : vector<1x512xf32> to vector<16x512xf32>
    %8 = arith.addf %5, %7 : vector<16x512xf32>
    %cst_6 = arith.constant 1.702000e+00 : f32
    %9 = vector.broadcast %cst_6 : f32 to vector<16x512xf32>
    %10 = arith.mulf %9, %8 : vector<16x512xf32>
    %11 = arith.negf %10 : vector<16x512xf32>
    %12 = math.exp %11 : vector<16x512xf32>
    %cst_7 = arith.constant 1.000000e+00 : f32
    %13 = vector.broadcast %cst_7 : f32 to vector<16x512xf32>
    %14 = arith.addf %13, %12 : vector<16x512xf32>
    %15 = arith.divf %13, %14 : vector<16x512xf32>
    %16 = arith.mulf %8, %15 : vector<16x512xf32>
    %17 = arith.truncf %16 : vector<16x512xf32> to vector<16x512xbf16>
    %c0_8 = arith.constant 0 : index
    %c0_9 = arith.constant 0 : index
    %18 = vector.load %arg8[%c0_8, %c0_9] : memref<16x512xbf16, #tpu.memory_space<vmem>>, vector<16x512xbf16>
    tpu.vector_store %arg8[%c0_8, %c0_9], %17 {strides = array<i32>} : memref<16x512xbf16, #tpu.memory_space<vmem>>, vector<16x512xbf16>,
    return
  }
  func.func @transform_0(%arg0: i32, %arg1: i32, %arg2: i32) -> (i32, i32) {
    %c0_i32 = arith.constant 0 : i32
    return %arg0, %arg2 : i32, i32
  }
  func.func @transform_1(%arg0: i32, %arg1: i32, %arg2: i32) -> (i32, i32) {
    %c0_i32 = arith.constant 0 : i32
    return %arg2, %arg1 : i32, i32
  }
  func.func @transform_2(%arg0: i32, %arg1: i32, %arg2: i32) -> (i32, i32) {
    %c0_i32 = arith.constant 0 : i32
    %c0_i32_0 = arith.constant 0 : i32
    return %c0_i32, %arg1 : i32, i32
  }
  func.func @transform_3(%arg0: i32, %arg1: i32, %arg2: i32) -> (i32, i32) {
    %c0_i32 = arith.constant 0 : i32
    %c0_i32_0 = arith.constant 0 : i32
    return %c0_i32, %arg2 : i32, i32
  }
  func.func @transform_4(%arg0: i32, %arg1: i32, %arg2: i32) -> (i32, i32) {
    %c0_i32 = arith.constant 0 : i32
    %c0_i32_0 = arith.constant 0 : i32
    return %c0_i32, %arg2 : i32, i32
  }
  func.func @transform_5(%arg0: i32, %arg1: i32, %arg2: i32) -> (i32, i32) {
    %c0_i32 = arith.constant 0 : i32
    return %arg0, %arg1 : i32, i32
  }
}

module attributes {stable_mosaic.version = 11 : i64} {
  func.func @_fused_linear_kernel(%arg0: i32, %arg1: i32, %arg2: i32, %arg3: memref<16x128xbf16, #tpu.memory_space<vmem>>, %arg4: memref<128x128xbf16, #tpu.memory_space<vmem>>, %arg5: memref<1x128xf32, #tpu.memory_space<vmem>>, %arg6: memref<16x128xbf16, #tpu.memory_space<vmem>>, %arg7: memref<16x128xbf16, #tpu.memory_space<vmem>>) attributes {dimension_semantics = [#tpu.dimension_semantics<parallel>, #tpu.dimension_semantics<parallel>, #tpu.dimension_semantics<arbitrary>], iteration_bounds = array<i64: 1, 1, 1>, scalar_prefetch = 0 : i64, scratch_operands = 0 : i64, tpu.core_type = #tpu.core_type<tc>, window_params = [{transform_indices = @transform_0, window_bounds = array<i64: 16, 128>}, {transform_indices = @transform_1, window_bounds = array<i64: 128, 128>}, {transform_indices = @transform_2, window_bounds = array<i64: 1, 128>}, {transform_indices = @transform_3, window_bounds = array<i64: 16, 128>}, {transform_indices = @transform_4, window_bounds = array<i64: 16, 128>}]} {
    %c0 = arith.constant 0 : index
    %c0_0 = arith.constant 0 : index
    %0 = vector.load %arg3[%c0, %c0_0] : memref<16x128xbf16, #tpu.memory_space<vmem>>, vector<16x128xbf16>
    %c0_1 = arith.constant 0 : index
    %c0_2 = arith.constant 0 : index
    %1 = vector.load %arg4[%c0_1, %c0_2] : memref<128x128xbf16, #tpu.memory_space<vmem>>, vector<128x128xbf16>
    %cst = arith.constant dense<0.000000e+00> : vector<16x128xf32>
    %2 = tpu.matmul %0, %1, %cst {dimension_numbers = #tpu.dot_dimension_numbers<[1], [0], [0], [1], [0, 0, 1, 1], [], []>} : vector<16x128xbf16>, vector<128x128xbf16>, vector<16x128xf32> -> vector<16x128xf32>
    %c0_3 = arith.constant 0 : index
    %c0_4 = arith.constant 0 : index
    %3 = vector.load %arg5[%c0_3, %c0_4] : memref<1x128xf32, #tpu.memory_space<vmem>>, vector<1x128xf32>
    %4 = vector.broadcast %3 : vector<1x128xf32> to vector<16x128xf32>
    %5 = arith.addf %2, %4 : vector<16x128xf32>
    %c0_5 = arith.constant 0 : index
    %c0_6 = arith.constant 0 : index
    %6 = vector.load %arg6[%c0_5, %c0_6] : memref<16x128xbf16, #tpu.memory_space<vmem>>, vector<16x128xbf16>
    %7 = arith.extf %6 : vector<16x128xbf16> to vector<16x128xf32>
    %8 = arith.addf %5, %7 : vector<16x128xf32>
    %9 = arith.truncf %8 : vector<16x128xf32> to vector<16x128xbf16>
    %c0_7 = arith.constant 0 : index
    %c0_8 = arith.constant 0 : index
    %10 = vector.load %arg7[%c0_7, %c0_8] : memref<16x128xbf16, #tpu.memory_space<vmem>>, vector<16x128xbf16>
    tpu.vector_store %arg7[%c0_7, %c0_8], %9 {strides = array<i32>} : memref<16x128xbf16, #tpu.memory_space<vmem>>, vector<16x128xbf16>,
    return
  }
  func.func @transform_0(%arg0: i32, %arg1: i32, %arg2: i32) -> (i32, i32) {
    %c0_i32 = arith.constant 0 : i32
    return %arg0, %arg2 : i32, i32
  }
  func.func @transform_1(%arg0: i32, %arg1: i32, %arg2: i32) -> (i32, i32) {
    %c0_i32 = arith.constant 0 : i32
    return %arg2, %arg1 : i32, i32
  }
  func.func @transform_2(%arg0: i32, %arg1: i32, %arg2: i32) -> (i32, i32) {
    %c0_i32 = arith.constant 0 : i32
    %c0_i32_0 = arith.constant 0 : i32
    return %c0_i32, %arg1 : i32, i32
  }
  func.func @transform_3(%arg0: i32, %arg1: i32, %arg2: i32) -> (i32, i32) {
    %c0_i32 = arith.constant 0 : i32
    return %arg0, %arg1 : i32, i32
  }
  func.func @transform_4(%arg0: i32, %arg1: i32, %arg2: i32) -> (i32, i32) {
    %c0_i32 = arith.constant 0 : i32
    return %arg0, %arg1 : i32, i32
  }
}

module attributes {stable_mosaic.version = 11 : i64} {
  func.func @_fused_linear_kernel(%arg0: i32, %arg1: i32, %arg2: i32, %arg3: memref<16x512xbf16, #tpu.memory_space<vmem>>, %arg4: memref<512x128xbf16, #tpu.memory_space<vmem>>, %arg5: memref<1x128xf32, #tpu.memory_space<vmem>>, %arg6: memref<16x128xbf16, #tpu.memory_space<vmem>>, %arg7: memref<16x128xbf16, #tpu.memory_space<vmem>>) attributes {dimension_semantics = [#tpu.dimension_semantics<parallel>, #tpu.dimension_semantics<parallel>, #tpu.dimension_semantics<arbitrary>], iteration_bounds = array<i64: 1, 1, 1>, scalar_prefetch = 0 : i64, scratch_operands = 0 : i64, tpu.core_type = #tpu.core_type<tc>, window_params = [{transform_indices = @transform_0, window_bounds = array<i64: 16, 512>}, {transform_indices = @transform_1, window_bounds = array<i64: 512, 128>}, {transform_indices = @transform_2, window_bounds = array<i64: 1, 128>}, {transform_indices = @transform_3, window_bounds = array<i64: 16, 128>}, {transform_indices = @transform_4, window_bounds = array<i64: 16, 128>}]} {
    %c0 = arith.constant 0 : index
    %c0_0 = arith.constant 0 : index
    %0 = vector.load %arg3[%c0, %c0_0] : memref<16x512xbf16, #tpu.memory_space<vmem>>, vector<16x512xbf16>
    %c0_1 = arith.constant 0 : index
    %c0_2 = arith.constant 0 : index
    %1 = vector.load %arg4[%c0_1, %c0_2] : memref<512x128xbf16, #tpu.memory_space<vmem>>, vector<512x128xbf16>
    %cst = arith.constant dense<0.000000e+00> : vector<16x128xf32>
    %2 = tpu.matmul %0, %1, %cst {dimension_numbers = #tpu.dot_dimension_numbers<[1], [0], [0], [1], [0, 0, 1, 1], [], []>} : vector<16x512xbf16>, vector<512x128xbf16>, vector<16x128xf32> -> vector<16x128xf32>
    %c0_3 = arith.constant 0 : index
    %c0_4 = arith.constant 0 : index
    %3 = vector.load %arg5[%c0_3, %c0_4] : memref<1x128xf32, #tpu.memory_space<vmem>>, vector<1x128xf32>
    %4 = vector.broadcast %3 : vector<1x128xf32> to vector<16x128xf32>
    %5 = arith.addf %2, %4 : vector<16x128xf32>
    %c0_5 = arith.constant 0 : index
    %c0_6 = arith.constant 0 : index
    %6 = vector.load %arg6[%c0_5, %c0_6] : memref<16x128xbf16, #tpu.memory_space<vmem>>, vector<16x128xbf16>
    %7 = arith.extf %6 : vector<16x128xbf16> to vector<16x128xf32>
    %8 = arith.addf %5, %7 : vector<16x128xf32>
    %9 = arith.truncf %8 : vector<16x128xf32> to vector<16x128xbf16>
    %c0_7 = arith.constant 0 : index
    %c0_8 = arith.constant 0 : index
    %10 = vector.load %arg7[%c0_7, %c0_8] : memref<16x128xbf16, #tpu.memory_space<vmem>>, vector<16x128xbf16>
    tpu.vector_store %arg7[%c0_7, %c0_8], %9 {strides = array<i32>} : memref<16x128xbf16, #tpu.memory_space<vmem>>, vector<16x128xbf16>,
    return
  }
  func.func @transform_0(%arg0: i32, %arg1: i32, %arg2: i32) -> (i32, i32) {
    %c0_i32 = arith.constant 0 : i32
    return %arg0, %arg2 : i32, i32
  }
  func.func @transform_1(%arg0: i32, %arg1: i32, %arg2: i32) -> (i32, i32) {
    %c0_i32 = arith.constant 0 : i32
    return %arg2, %arg1 : i32, i32
  }
  func.func @transform_2(%arg0: i32, %arg1: i32, %arg2: i32) -> (i32, i32) {
    %c0_i32 = arith.constant 0 : i32
    %c0_i32_0 = arith.constant 0 : i32
    return %c0_i32, %arg1 : i32, i32
  }
  func.func @transform_3(%arg0: i32, %arg1: i32, %arg2: i32) -> (i32, i32) {
    %c0_i32 = arith.constant 0 : i32
    return %arg0, %arg1 : i32, i32
  }
  func.func @transform_4(%arg0: i32, %arg1: i32, %arg2: i32) -> (i32, i32) {
    %c0_i32 = arith.constant 0 : i32
    return %arg0, %arg1 : i32, i32
  }
}

module attributes {stable_mosaic.version = 11 : i64} {
  func.func @_fused_linear_kernel(%arg0: i32, %arg1: i32, %arg2: i32, %arg3: memref<16x128xbf16, #tpu.memory_space<vmem>>, %arg4: memref<128x128xbf16, #tpu.memory_space<vmem>>, %arg5: memref<1x128xf32, #tpu.memory_space<vmem>>, %arg6: memref<16x128xbf16, #tpu.memory_space<vmem>>, %arg7: memref<16x128xbf16, #tpu.memory_space<vmem>>) attributes {dimension_semantics = [#tpu.dimension_semantics<parallel>, #tpu.dimension_semantics<parallel>, #tpu.dimension_semantics<arbitrary>], iteration_bounds = array<i64: 1, 1, 1>, scalar_prefetch = 0 : i64, scratch_operands = 0 : i64, tpu.core_type = #tpu.core_type<tc>, window_params = [{transform_indices = @transform_0, window_bounds = array<i64: 16, 128>}, {transform_indices = @transform_1, window_bounds = array<i64: 128, 128>}, {transform_indices = @transform_2, window_bounds = array<i64: 1, 128>}, {transform_indices = @transform_3, window_bounds = array<i64: 16, 128>}, {transform_indices = @transform_4, window_bounds = array<i64: 16, 128>}]} {
    %c0 = arith.constant 0 : index
    %c0_0 = arith.constant 0 : index
    %0 = vector.load %arg3[%c0, %c0_0] : memref<16x128xbf16, #tpu.memory_space<vmem>>, vector<16x128xbf16>
    %c0_1 = arith.constant 0 : index
    %c0_2 = arith.constant 0 : index
    %1 = vector.load %arg4[%c0_1, %c0_2] : memref<128x128xbf16, #tpu.memory_space<vmem>>, vector<128x128xbf16>
    %cst = arith.constant dense<0.000000e+00> : vector<16x128xf32>
    %2 = tpu.matmul %0, %1, %cst {dimension_numbers = #tpu.dot_dimension_numbers<[1], [0], [0], [1], [0, 0, 1, 1], [], []>} : vector<16x128xbf16>, vector<128x128xbf16>, vector<16x128xf32> -> vector<16x128xf32>
    %c0_3 = arith.constant 0 : index
    %c0_4 = arith.constant 0 : index
    %3 = vector.load %arg5[%c0_3, %c0_4] : memref<1x128xf32, #tpu.memory_space<vmem>>, vector<1x128xf32>
    %4 = vector.broadcast %3 : vector<1x128xf32> to vector<16x128xf32>
    %5 = arith.addf %2, %4 : vector<16x128xf32>
    %c0_5 = arith.constant 0 : index
    %c0_6 = arith.constant 0 : index
    %6 = vector.load %arg6[%c0_5, %c0_6] : memref<16x128xbf16, #tpu.memory_space<vmem>>, vector<16x128xbf16>
    %7 = arith.extf %6 : vector<16x128xbf16> to vector<16x128xf32>
    %8 = arith.addf %5, %7 : vector<16x128xf32>
    %9 = arith.truncf %8 : vector<16x128xf32> to vector<16x128xbf16>
    %c0_7 = arith.constant 0 : index
    %c0_8 = arith.constant 0 : index
    %10 = vector.load %arg7[%c0_7, %c0_8] : memref<16x128xbf16, #tpu.memory_space<vmem>>, vector<16x128xbf16>
    tpu.vector_store %arg7[%c0_7, %c0_8], %9 {strides = array<i32>} : memref<16x128xbf16, #tpu.memory_space<vmem>>, vector<16x128xbf16>,
    return
  }
  func.func @transform_0(%arg0: i32, %arg1: i32, %arg2: i32) -> (i32, i32) {
    %c0_i32 = arith.constant 0 : i32
    return %arg0, %arg2 : i32, i32
  }
  func.func @transform_1(%arg0: i32, %arg1: i32, %arg2: i32) -> (i32, i32) {
    %c0_i32 = arith.constant 0 : i32
    return %arg2, %arg1 : i32, i32
  }
  func.func @transform_2(%arg0: i32, %arg1: i32, %arg2: i32) -> (i32, i32) {
    %c0_i32 = arith.constant 0 : i32
    %c0_i32_0 = arith.constant 0 : i32
    return %c0_i32, %arg1 : i32, i32
  }
  func.func @transform_3(%arg0: i32, %arg1: i32, %arg2: i32) -> (i32, i32) {
    %c0_i32 = arith.constant 0 : i32
    return %arg0, %arg1 : i32, i32
  }
  func.func @transform_4(%arg0: i32, %arg1: i32, %arg2: i32) -> (i32, i32) {
    %c0_i32 = arith.constant 0 : i32
    return %arg0, %arg1 : i32, i32
  }
}

module attributes {stable_mosaic.version = 11 : i64} {
  func.func @_fused_linear_kernel(%arg0: i32, %arg1: i32, %arg2: i32, %arg3: memref<16x512xbf16, #tpu.memory_space<vmem>>, %arg4: memref<512x128xbf16, #tpu.memory_space<vmem>>, %arg5: memref<1x128xf32, #tpu.memory_space<vmem>>, %arg6: memref<16x128xbf16, #tpu.memory_space<vmem>>, %arg7: memref<16x128xbf16, #tpu.memory_space<vmem>>) attributes {dimension_semantics = [#tpu.dimension_semantics<parallel>, #tpu.dimension_semantics<parallel>, #tpu.dimension_semantics<arbitrary>], iteration_bounds = array<i64: 1, 1, 1>, scalar_prefetch = 0 : i64, scratch_operands = 0 : i64, tpu.core_type = #tpu.core_type<tc>, window_params = [{transform_indices = @transform_0, window_bounds = array<i64: 16, 512>}, {transform_indices = @transform_1, window_bounds = array<i64: 512, 128>}, {transform_indices = @transform_2, window_bounds = array<i64: 1, 128>}, {transform_indices = @transform_3, window_bounds = array<i64: 16, 128>}, {transform_indices = @transform_4, window_bounds = array<i64: 16, 128>}]} {
    %c0 = arith.constant 0 : index
    %c0_0 = arith.constant 0 : index
    %0 = vector.load %arg3[%c0, %c0_0] : memref<16x512xbf16, #tpu.memory_space<vmem>>, vector<16x512xbf16>
    %c0_1 = arith.constant 0 : index
    %c0_2 = arith.constant 0 : index
    %1 = vector.load %arg4[%c0_1, %c0_2] : memref<512x128xbf16, #tpu.memory_space<vmem>>, vector<512x128xbf16>
    %cst = arith.constant dense<0.000000e+00> : vector<16x128xf32>
    %2 = tpu.matmul %0, %1, %cst {dimension_numbers = #tpu.dot_dimension_numbers<[1], [0], [0], [1], [0, 0, 1, 1], [], []>} : vector<16x512xbf16>, vector<512x128xbf16>, vector<16x128xf32> -> vector<16x128xf32>
    %c0_3 = arith.constant 0 : index
    %c0_4 = arith.constant 0 : index
    %3 = vector.load %arg5[%c0_3, %c0_4] : memref<1x128xf32, #tpu.memory_space<vmem>>, vector<1x128xf32>
    %4 = vector.broadcast %3 : vector<1x128xf32> to vector<16x128xf32>
    %5 = arith.addf %2, %4 : vector<16x128xf32>
    %c0_5 = arith.constant 0 : index
    %c0_6 = arith.constant 0 : index
    %6 = vector.load %arg6[%c0_5, %c0_6] : memref<16x128xbf16, #tpu.memory_space<vmem>>, vector<16x128xbf16>
    %7 = arith.extf %6 : vector<16x128xbf16> to vector<16x128xf32>
    %8 = arith.addf %5, %7 : vector<16x128xf32>
    %9 = arith.truncf %8 : vector<16x128xf32> to vector<16x128xbf16>
    %c0_7 = arith.constant 0 : index
    %c0_8 = arith.constant 0 : index
    %10 = vector.load %arg7[%c0_7, %c0_8] : memref<16x128xbf16, #tpu.memory_space<vmem>>, vector<16x128xbf16>
    tpu.vector_store %arg7[%c0_7, %c0_8], %9 {strides = array<i32>} : memref<16x128xbf16, #tpu.memory_space<vmem>>, vector<16x128xbf16>,
    return
  }
  func.func @transform_0(%arg0: i32, %arg1: i32, %arg2: i32) -> (i32, i32) {
    %c0_i32 = arith.constant 0 : i32
    return %arg0, %arg2 : i32, i32
  }
  func.func @transform_1(%arg0: i32, %arg1: i32, %arg2: i32) -> (i32, i32) {
    %c0_i32 = arith.constant 0 : i32
    return %arg2, %arg1 : i32, i32
  }
  func.func @transform_2(%arg0: i32, %arg1: i32, %arg2: i32) -> (i32, i32) {
    %c0_i32 = arith.constant 0 : i32
    %c0_i32_0 = arith.constant 0 : i32
    return %c0_i32, %arg1 : i32, i32
  }
  func.func @transform_3(%arg0: i32, %arg1: i32, %arg2: i32) -> (i32, i32) {
    %c0_i32 = arith.constant 0 : i32
    return %arg0, %arg1 : i32, i32
  }
  func.func @transform_4(%arg0: i32, %arg1: i32, %arg2: i32) -> (i32, i32) {
    %c0_i32 = arith.constant 0 : i32
    return %arg0, %arg1 : i32, i32
  }
}

module attributes {stable_mosaic.version = 11 : i64} {
  func.func @_fused_linear_kernel(%arg0: i32, %arg1: i32, %arg2: i32, %arg3: memref<16x128xbf16, #tpu.memory_space<vmem>>, %arg4: memref<128x512xbf16, #tpu.memory_space<vmem>>, %arg5: memref<1x512xf32, #tpu.memory_space<vmem>>, %arg6: memref<1x128xf32, #tpu.memory_space<vmem>>, %arg7: memref<1x128xf32, #tpu.memory_space<vmem>>, %arg8: memref<16x512xbf16, #tpu.memory_space<vmem>>, %arg9: memref<16x128xbf16, #tpu.memory_space<vmem>>) attributes {dimension_semantics = [#tpu.dimension_semantics<parallel>, #tpu.dimension_semantics<arbitrary>, #tpu.dimension_semantics<arbitrary>], iteration_bounds = array<i64: 1, 1, 1>, scalar_prefetch = 0 : i64, scratch_operands = 1 : i64, tpu.core_type = #tpu.core_type<tc>, window_params = [{transform_indices = @transform_0, window_bounds = array<i64: 16, 128>}, {transform_indices = @transform_1, window_bounds = array<i64: 128, 512>}, {transform_indices = @transform_2, window_bounds = array<i64: 1, 512>}, {transform_indices = @transform_3, window_bounds = array<i64: 1, 128>}, {transform_indices = @transform_4, window_bounds = array<i64: 1, 128>}, {transform_indices = @transform_5, window_bounds = array<i64: 16, 512>}]} {
    %c0_i32 = arith.constant 0 : i32
    %0 = arith.cmpi eq, %arg1, %c0_i32 : i32
    %1 = arith.extui %0 : i1 to i32
    %c0_i32_0 = arith.constant 0 : i32
    %2 = arith.cmpi ne, %1, %c0_i32_0 : i32
    scf.if %2 {
      %c0_10 = arith.constant 0 : index
      %c0_11 = arith.constant 0 : index
      %19 = vector.load %arg3[%c0_10, %c0_11] : memref<16x128xbf16, #tpu.memory_space<vmem>>, vector<16x128xbf16>
      %20 = arith.extf %19 : vector<16x128xbf16> to vector<16x128xf32>
      %cst_12 = arith.constant dense<0.000000e+00> : vector<16xf32>
      %21 = vector.multi_reduction <add>, %20, %cst_12 [1] : vector<16x128xf32> to vector<16xf32>
      %22 = vector.shape_cast %21 : vector<16xf32> to vector<16x1xf32>
      %cst_13 = arith.constant 1.280000e+02 : f32
      %23 = vector.broadcast %cst_13 : f32 to vector<16x1xf32>
      %24 = arith.divf %22, %23 : vector<16x1xf32>
      %25 = vector.broadcast %24 : vector<16x1xf32> to vector<16x128xf32>
      %26 = arith.subf %20, %25 : vector<16x128xf32>
      %27 = arith.mulf %26, %26 : vector<16x128xf32>
      %cst_14 = arith.constant dense<0.000000e+00> : vector<16xf32>
      %28 = vector.multi_reduction <add>, %27, %cst_14 [1] : vector<16x128xf32> to vector<16xf32>
      %29 = vector.shape_cast %28 : vector<16xf32> to vector<16x1xf32>
      %cst_15 = arith.constant 1.280000e+02 : f32
      %30 = vector.broadcast %cst_15 : f32 to vector<16x1xf32>
      %31 = arith.divf %29, %30 : vector<16x1xf32>
      %32 = vector.broadcast %24 : vector<16x1xf32> to vector<16x128xf32>
      %33 = arith.subf %20, %32 : vector<16x128xf32>
      %cst_16 = arith.constant 9.99999974E-6 : f32
      %34 = vector.broadcast %cst_16 : f32 to vector<16x1xf32>
      %35 = arith.addf %31, %34 : vector<16x1xf32>
      %36 = math.rsqrt %35 : vector<16x1xf32>
      %37 = vector.broadcast %36 : vector<16x1xf32> to vector<16x128xf32>
      %38 = arith.mulf %33, %37 : vector<16x128xf32>
      %c0_17 = arith.constant 0 : index
      %c0_18 = arith.constant 0 : index
      %39 = vector.load %arg6[%c0_17, %c0_18] : memref<1x128xf32, #tpu.memory_space<vmem>>, vector<1x128xf32>
      %40 = vector.broadcast %39 : vector<1x128xf32> to vector<16x128xf32>
      %41 = arith.mulf %38, %40 : vector<16x128xf32>
      %c0_19 = arith.constant 0 : index
      %c0_20 = arith.constant 0 : index
      %42 = vector.load %arg7[%c0_19, %c0_20] : memref<1x128xf32, #tpu.memory_space<vmem>>, vector<1x128xf32>
      %43 = vector.broadcast %42 : vector<1x128xf32> to vector<16x128xf32>
      %44 = arith.addf %41, %43 : vector<16x128xf32>
      %45 = arith.truncf %44 : vector<16x128xf32> to vector<16x128xbf16>
      %c0_21 = arith.constant 0 : index
      %c0_22 = arith.constant 0 : index
      %46 = vector.load %arg9[%c0_21, %c0_22] : memref<16x128xbf16, #tpu.memory_space<vmem>>, vector<16x128xbf16>
      tpu.vector_store %arg9[%c0_21, %c0_22], %45 {strides = array<i32>} : memref<16x128xbf16, #tpu.memory_space<vmem>>, vector<16x128xbf16>,
    } else {
    }
    %c0 = arith.constant 0 : index
    %c0_1 = arith.constant 0 : index
    %3 = vector.load %arg9[%c0, %c0_1] : memref<16x128xbf16, #tpu.memory_space<vmem>>, vector<16x128xbf16>
    %c0_2 = arith.constant 0 : index
    %c0_3 = arith.constant 0 : index
    %4 = vector.load %arg4[%c0_2, %c0_3] : memref<128x512xbf16, #tpu.memory_space<vmem>>, vector<128x512xbf16>
    %cst = arith.constant dense<0.000000e+00> : vector<16x512xf32>
    %5 = tpu.matmul %3, %4, %cst {dimension_numbers = #tpu.dot_dimension_numbers<[1], [0], [0], [1], [0, 0, 1, 1], [], []>} : vector<16x128xbf16>, vector<128x512xbf16>, vector<16x512xf32> -> vector<16x512xf32>
    %c0_4 = arith.constant 0 : index
    %c0_5 = arith.constant 0 : index
    %6 = vector.load %arg5[%c0_4, %c0_5] : memref<1x512xf32, #tpu.memory_space<vmem>>, vector<1x512xf32>
    %7 = vector.broadcast %6 : vector<1x512xf32> to vector<16x512xf32>
    %8 = arith.addf %5, %7 : vector<16x512xf32>
    %cst_6 = arith.constant 1.702000e+00 : f32
    %9 = vector.broadcast %cst_6 : f32 to vector<16x512xf32>
    %10 = arith.mulf %9, %8 : vector<16x512xf32>
    %11 = arith.negf %10 : vector<16x512xf32>
    %12 = math.exp %11 : vector<16x512xf32>
    %cst_7 = arith.constant 1.000000e+00 : f32
    %13 = vector.broadcast %cst_7 : f32 to vector<16x512xf32>
    %14 = arith.addf %13, %12 : vector<16x512xf32>
    %15 = arith.divf %13, %14 : vector<16x512xf32>
    %16 = arith.mulf %8, %15 : vector<16x512xf32>
    %17 = arith.truncf %16 : vector<16x512xf32> to vector<16x512xbf16>
    %c0_8 = arith.constant 0 : index
    %c0_9 = arith.constant 0 : index
    %18 = vector.load %arg8[%c0_8, %c0_9] : memref<16x512xbf16, #tpu.memory_space<vmem>>, vector<16x512xbf16>
    tpu.vector_store %arg8[%c0_8, %c0_9], %17 {strides = array<i32>} : memref<16x512xbf16, #tpu.memory_space<vmem>>, vector<16x512xbf16>,
    return
  }
  func.func @transform_0(%arg0: i32, %arg1: i32, %arg2: i32) -> (i32, i32) {
    %c0_i32 = arith.constant 0 : i32
    return %arg0, %arg2 : i32, i32
  }
  func.func @transform_1(%arg0: i32, %arg1: i32, %arg2: i32) -> (i32, i32) {
    %c0_i32 = arith.constant 0 : i32
    return %arg2, %arg1 : i32, i32
  }
  func.func @transform_2(%arg0: i32, %arg1: i32, %arg2: i32) -> (i32, i32) {
    %c0_i32 = arith.constant 0 : i32
    %c0_i32_0 = arith.constant 0 : i32
    return %c0_i32, %arg1 : i32, i32
  }
  func.func @transform_3(%arg0: i32, %arg1: i32, %arg2: i32) -> (i32, i32) {
    %c0_i32 = arith.constant 0 : i32
    %c0_i32_0 = arith.constant 0 : i32
    return %c0_i32, %arg2 : i32, i32
  }
  func.func @transform_4(%arg0: i32, %arg1: i32, %arg2: i32) -> (i32, i32) {
    %c0_i32 = arith.constant 0 : i32
    %c0_i32_0 = arith.constant 0 : i32
    return %c0_i32, %arg2 : i32, i32
  }
  func.func @transform_5(%arg0: i32, %arg1: i32, %arg2: i32) -> (i32, i32) {
    %c0_i32 = arith.constant 0 : i32
    return %arg0, %arg1 : i32, i32
  }
}

</mosaic_0001>

<bundles_post_ra>
// kernel: clip_vision_tower_forward.13
= control target key start
LH: loop header
LB: loop body
LE: loop exit
PB: predicated region body
PF: predicated region fallthrough
CT: control target
= control target key end

     0   :  { %v103_v3 = vmov 128.0   ;;  %s136_s0 = inlined_call_operand.vmem [shape: bf16[16,128], index: 0, kind: input, shape index: {}]   ;;  %s137_s1 = inlined_call_operand.vmem [shape: f32[1,128], index: 1, kind: input, shape index: {}]   ;;  %s138_s2 = inlined_call_operand.vmem [shape: f32[1,128], index: 2, kind: input, shape index: {}]   ;;  %s139_s3 = inlined_call_operand.vmem [shape: bf16[16,128], index: 3, kind: output, shape index: {}]  }
   0x1   :  { %v86_v0 = vld [vmem:[%s136_s0] sm:$0xff]   ;;  %97 = vrcp.f32 %v103_v3 }
   0x2   :  { %v87_v1 = vunpack.c.l.bf16 %v86_v0  ;;  %v88_v2 = vunpack.c.h.bf16 %v86_v0  ;;  %v95_v36 = vld [vmem:[%s137_s1] ss:$0 sm:$0xff] }
   0x3   :  { %v96_v40 = vld [vmem:[%s138_s2] ss:$0 sm:$0xff] }
   0x4   :  { %18 = vadd.xlane.f32.xlu0 %v87_v1 }
   0x7   :  { %v98_v4 = vpop.eup %97 }
   0x8   :  { %v23_v5 = vmul.f32 128.0, %v98_v4  ;;  %vm27_vm0 = vweird.f32 %v98_v4 }
   0xa   :  { %v24_v6 = vsub.f32 1.0, %v23_v5 }
   0xc   :  { %20 = vadd.xlane.f32.xlu0 %v88_v2  ;;  %v25_v7 = vmul.f32 %v98_v4, %v24_v6 }
   0xe   :  { %v26_v8 = vadd.f32 %v98_v4, %v25_v7 }
  0x10   :  { %v28_v9 = vsel %vm27_vm0, %v98_v4, %v26_v8 }
  0x77   :  { %v19_v10 = vpop.xlane.xlu0 %18 }
  0x78   :  { %v29_v11 = vmul.f32 %v28_v9, %v19_v10 }
  0x7a   :  { %v31_v12 = vsub.f32 %v87_v1, %v29_v11 }
  0x7c   :  { %v33_v13 = vmul.f32 %v31_v12, %v31_v12 }
  0x7e   :  { %35 = vadd.xlane.f32.xlu1 %v33_v13 }
  0x7f   :  { %v21_v14 = vpop.xlane.xlu0 %20 }
  0x80   :  { %v30_v15 = vmul.f32 %v28_v9, %v21_v14 }
  0x82   :  { %v32_v16 = vsub.f32 %v88_v2, %v30_v15 }
  0x84   :  { %v34_v17 = vmul.f32 %v32_v16, %v32_v16 }
  0x86   :  { %37 = vadd.xlane.f32.xlu1 %v34_v17 }
  0xf1   :  { %v36_v18 = vpop.xlane.xlu1 %35 }
  0xf2   :  { %v39_v19 = vmul.f32 %v36_v18, %v28_v9 }
  0xf4   :  { %v41_v20 = vadd.f32 1e-05, %v39_v19 }
  0xf6   :  { %99 = vrsqrt.f32 %v41_v20  ;;  %vm49_vm2 = vweird.f32 %v41_v20 }
  0xf9   :  { %v38_v21 = vpop.xlane.xlu1 %37 }
  0xfa   :  { %v40_v22 = vmul.f32 %v38_v21, %v28_v9 }
  0xfc   :  { %v100_v23 = vpop.eup %99  ;;  %v42_v24 = vadd.f32 1e-05, %v40_v22 }
  0xfd   :  { %v44_v25 = vmul.f32 %v100_v23, %v41_v20  ;;  %vm50_vm1 = vweird.f32 %v100_v23 }
  0xfe   :  { %101 = vrsqrt.f32 %v42_v24  ;;  %vm51_vm3 = vmor %vm49_vm2, %vm50_vm1  ;;  %vm59_vm5 = vweird.f32 %v42_v24 }
  0xff   :  { %v45_v26 = vmul.f32 %v100_v23, %v44_v25 }
 0x101   :  { %v46_v27 = vmul.f32 0.5, %v45_v26 }
 0x103   :  { %v47_v28 = vsub.f32 1.5, %v46_v27 }
 0x104   :  { %v102_v29 = vpop.eup %101 }
 0x105   :  { %v48_v30 = vmul.f32 %v100_v23, %v47_v28  ;;  %v54_v31 = vmul.f32 %v102_v29, %v42_v24  ;;  %vm60_vm4 = vweird.f32 %v102_v29 }
 0x106   :  { %vm61_vm6 = vmor %vm59_vm5, %vm60_vm4 }
 0x107   :  { %v55_v32 = vmul.f32 %v102_v29, %v54_v31  ;;  %v52_v33 = vsel %vm51_vm3, %v100_v23, %v48_v30 }
 0x108   :  { %v63_v37 = vmul.f32 %v52_v33, %v31_v12 }
 0x109   :  { %v56_v34 = vmul.f32 0.5, %v55_v32 }
 0x10a   :  { %v69_v41 = vmul.f32 %v95_v36, %v63_v37 }
 0x10b   :  { %v57_v35 = vsub.f32 1.5, %v56_v34 }
 0x10c   :  { %v75_v44 = vadd.f32 %v96_v40, %v69_v41 }
 0x10d   :  { %v58_v38 = vmul.f32 %v102_v29, %v57_v35 }
 0x10f   :  { %v62_v39 = vsel %vm61_vm6, %v102_v29, %v58_v38 }
 0x110   :  { %v64_v42 = vmul.f32 %v62_v39, %v32_v16 }
 0x112   :  { %v70_v43 = vmul.f32 %v95_v36, %v64_v42 }
 0x114   :  { %v76_v45 = vadd.f32 %v96_v40, %v70_v43 }
 0x116   :  { %v92_v46 = vpack.c.bf16 %v76_v45, %v75_v44 }
 0x118   :  { %93 = vst [vmem:[%s139_s3] sm:$0xff] %v92_v46  }

// kernel: clip_vision_tower_forward.12
= control target key start
LH: loop header
LB: loop body
LE: loop exit
PB: predicated region body
PF: predicated region fallthrough
CT: control target
= control target key end

     0   :  { %8 = vsyncpa [#allocation3], 0  ;;  %s313_s15 = smov [#allocation2]   ;;  %s314_s17 = smov 64   ;;  %s348_s0 = inlined_call_operand.vmem [shape: bf16[8,256], index: 0, kind: input, shape index: {}]   ;;  %s349_s1 = inlined_call_operand.hbm [shape: bf16[256,128], index: 1, kind: input, shape index: {}]   ;;  %s350_s2 = inlined_call_operand.vmem [shape: f32[1,128], index: 2, kind: input, shape index: {}]   ;;  %s351_s3 = inlined_call_operand.vmem [shape: bf16[8,128], index: 3, kind: output, shape index: {}]  }
   0x1   :  { %s15_s14 = sshll.u32 %s349_s1, 4  ;;  %s17_s16 = sshll.u32 %s313_s15, 4  ;;  %s16_s14 = int_to_ptr.hbm [resolvable:$true] %s15_s14  ;;  %s18_s16 = int_to_ptr.vmem [resolvable:$true] %s17_s16 }
   0x2   :  { %s315_s18 = smov 4  }
   0x3   :  { %23 = dma.hbm_to_vmem [thread:$0]  %s16_s14, 2048, %s18_s16, [#allocation3], %s314_s17, %s314_s17, %s315_s18  }
   0x4   :  { %311 = dma.done.wait [#allocation3], 2048  }
   0x5   :  { %312 = vsyncadd [#allocation3], 4294965248  ;;  %v274_v0 = vld [vmem:[#allocation2 + $0x38] sm:$0xff]  ;;  %v273_v2 = vld [vmem:[#allocation2 + $0x30] sm:$0xff] }
   0x6   :  { %v282_v1 = vld [vmem:[#allocation2 + $0x78] sm:$0xff]  ;;  %170 = vmatpush.bf16.msra.mxu0 %v274_v0  ;;  %v281_v3 = vld [vmem:[#allocation2 + $0x70] sm:$0xff]  ;;  %v272_v4 = vld [vmem:[#allocation2 + $0x28] sm:$0xff] }
   0x7   :  { %183 = vmatpush.bf16.msra.mxu1 %v282_v1  ;;  %v280_v5 = vld [vmem:[#allocation2 + $0x68] sm:$0xff]  ;;  %v271_v6 = vld [vmem:[#allocation2 + $0x20] sm:$0xff]  ;;  %v270_v8 = vld [vmem:[#allocation2 + $0x18] sm:$0xff] }
   0x8   :  { %v279_v7 = vld [vmem:[#allocation2 + $0x60] sm:$0xff]  ;;  %v278_v9 = vld [vmem:[#allocation2 + $0x58] sm:$0xff]  ;;  %v269_v10 = vld [vmem:[#allocation2 + $0x10] sm:$0xff] }
   0x9   :  { %v277_v11 = vld [vmem:[#allocation2 + $0x50] sm:$0xff]  ;;  %v268_v12 = vld [vmem:[#allocation2 + $0x8] sm:$0xff]  ;;  %v30_v14 = vld [vmem:[%s348_s0] sm:$0xff] }
   0xa   :  { %171 = vmatpush.bf16.msra.mxu0 %v273_v2  ;;  %v276_v13 = vld [vmem:[#allocation2 + $0x48] sm:$0xff]  ;;  %v68_v15 = vunpack.c.l.b16 %v30_v14  ;;  %v69_v16 = vunpack.c.h.b16 %v30_v14  ;;  %v267_v17 = vld [vmem:[#allocation2] sm:$0xff] }
   0xb   :  { %184 = vmatpush.bf16.msra.mxu1 %v281_v3  ;;  %v275_v18 = vld [vmem:[#allocation2 + $0x40] sm:$0xff] }
   0xc   :  { %v70_v19 = vpack.c.b16 %v68_v15, %v68_v15  ;;  %v71_v20 = vpack.c.b16 %v69_v16, %v69_v16  ;;  %v286_v21 = vld [vmem:[%s350_s2] ss:$0 sm:$0xff] }
   0xe   :  { %172 = vmatpush.bf16.msra.mxu0 %v272_v4 }
   0xf   :  { %185 = vmatpush.bf16.msra.mxu1 %v280_v5 }
  0x12   :  { %173 = vmatpush.bf16.msra.mxu0 %v271_v6 }
  0x13   :  { %186 = vmatpush.bf16.msra.mxu1 %v279_v7 }
  0x16   :  { %174 = vmatpush.bf16.msra.mxu0 %v270_v8 }
  0x17   :  { %187 = vmatpush.bf16.msra.mxu1 %v278_v9 }
  0x1a   :  { %175 = vmatpush.bf16.msra.mxu0 %v269_v10 }
  0x1b   :  { %188 = vmatpush.bf16.msra.mxu1 %v277_v11 }
  0x1e   :  { %176 = vmatpush.bf16.msra.mxu0 %v268_v12 }
  0x1f   :  { %189 = vmatpush.bf16.msra.mxu1 %v276_v13 }
  0x22   :  { %177 = vmatpush.bf16.msra.mxu0 %v267_v17 }
  0x23   :  { %190 = vmatpush.bf16.msra.mxu1 %v275_v18 }
  0x25   :  { %178 = vmatmul.bf16.vlgmr.msra.gmra.mxu0 %v70_v19 }
  0x26   :  { %191 = vmatmul.bf16.vlgmr.msra.gmra.mxu1 %v71_v20 }
  0xa2   :  { %v179_v22 = vpop.f32.mrf.mxu0 }
  0xa3   :  { %v192_v23 = vpop.f32.mrf.mxu1  ;;  %v180_v24 = vadd.f32 %v286_v21, %v179_v22 }
  0xa5   :  { %v193_v25 = vadd.f32 %v192_v23, %v180_v24 }
  0xa7   :  { %v196_v26 = vpack.c.bf16 %v193_v25, %v193_v25 }
  0xa9   :  { %197 = vst [vmem:[%s351_s3] sm:$0xf] %v196_v26 }
  0xaa   :  { %v181_v27 = vpop.f32.mrf.mxu0 }
  0xab   :  { %v194_v28 = vpop.f32.mrf.mxu1 }
  0xac   :  { %202 = vsyncpa [#allocation3], 1 }

// kernel: clip_vision_tower_forward.14
= control target key start
LH: loop header
LB: loop body
LE: loop exit
PB: predicated region body
PF: predicated region fallthrough
CT: control target
= control target key end

     0   :  { %10 = vsyncpa [#allocation4], 0  ;;  %s510_s21 = smov [#allocation3]   ;;  %s511_s23 = smov 192   ;;  %s587_s0 = inlined_call_operand.vmem [shape: bf16[16,128], index: 0, kind: input, shape index: {}]   ;;  %s588_s1 = inlined_call_operand.hbm [shape: bf16[128,384], index: 1, kind: input, shape index: {}]   ;;  %s589_s2 = inlined_call_operand.vmem [shape: f32[1,384], index: 2, kind: input, shape index: {}]   ;;  %s590_s3 = inlined_call_operand.vmem [shape: f32[1,128], index: 3, kind: input, shape index: {}]   ;;  %s591_s4 = inlined_call_operand.vmem [shape: f32[1,128], index: 4, kind: input, shape index: {}]   ;;  %s592_s5 = inlined_call_operand.vmem [shape: bf16[16,384], index: 5, kind: output, shape index: {}]  }
   0x1   :  { %s17_s20 = sshll.u32 %s588_s1, 4  ;;  %s19_s22 = sshll.u32 %s510_s21, 4  ;;  %s18_s20 = int_to_ptr.hbm [resolvable:$true] %s17_s20  ;;  %s20_s22 = int_to_ptr.vmem [resolvable:$true] %s19_s22 }
   0x2   :  { %s512_s24 = smov 12  }
   0x3   :  { %25 = dma.hbm_to_vmem [thread:$0]  %s18_s20, 3072, %s20_s22, [#allocation4], %s511_s23, %s511_s23, %s512_s24  }
   0x4   :  { %508 = dma.done.wait [#allocation4], 3072  }
   0x5   :  { %509 = vsyncadd [#allocation4], 4294964224  ;;  %v464_v0 = vld [vmem:[%s587_s0] sm:$0xff]   ;;  %v513_v3 = vmov 128.0   ;;  %v428_v18 = vld [vmem:[#allocation3 + $0xa8] sm:$0xf] }
   0x6   :  { %v465_v1 = vunpack.c.l.bf16 %v464_v0  ;;  %v466_v2 = vunpack.c.h.bf16 %v464_v0  ;;  %478 = vrcp.f32 %v513_v3  ;;  %v461_v19 = vld [vmem:[#allocation3 + $0xb0] sm:$0xf0]  ;;  %v460_v20 = vld [vmem:[#allocation3 + $0xac] sm:$0xf]  ;;  %v430_v22 = vld [vmem:[#allocation3 + $0xb4] sm:$0xf0] }
   0x7   :  { %v429_v21 = vor.u32 %v461_v19, %v428_v18  ;;  %v436_v23 = vld [vmem:[#allocation3 + $0xb0] sm:$0xf]  ;;  %v462_v24 = vld [vmem:[#allocation3 + $0xb8] sm:$0xf0]  ;;  %v433_v25 = vor.u32 %v460_v20, %v430_v22  ;;  %v457_v29 = vld [vmem:[#allocation3 + $0x94] sm:$0xf] }
   0x8   :  { %44 = vadd.xlane.f32.xlu0 %v465_v1  ;;  %v437_v26 = vor.u32 %v462_v24, %v436_v23  ;;  %v416_v27 = vld [vmem:[#allocation3 + $0x90] sm:$0xf]  ;;  %v458_v28 = vld [vmem:[#allocation3 + $0x98] sm:$0xf0]  ;;  %v418_v31 = vld [vmem:[#allocation3 + $0x9c] sm:$0xf0] }
   0x9   :  { %283 = vmatpush.bf16.msra.mxu0 %v429_v21  ;;  %297 = vmatpush.bf16.msra.mxu1 %v433_v25  ;;  %v417_v30 = vor.u32 %v458_v28, %v416_v27  ;;  %v424_v32 = vld [vmem:[#allocation3 + $0x98] sm:$0xf]  ;;  %v459_v33 = vld [vmem:[#allocation3 + $0xa0] sm:$0xf0]  ;;  %v421_v34 = vor.u32 %v457_v29, %v418_v31  ;;  %v454_v38 = vld [vmem:[#allocation3 + $0x7c] sm:$0xf] }
   0xa   :  { %311 = vmatpush.bf16.msra.mxu2 %v437_v26  ;;  %v425_v35 = vor.u32 %v459_v33, %v424_v32  ;;  %v404_v36 = vld [vmem:[#allocation3 + $0x78] sm:$0xf]  ;;  %v455_v37 = vld [vmem:[#allocation3 + $0x80] sm:$0xf0]  ;;  %v406_v40 = vld [vmem:[#allocation3 + $0x84] sm:$0xf0] }
   0xb   :  { %v405_v39 = vor.u32 %v455_v37, %v404_v36  ;;  %v412_v41 = vld [vmem:[#allocation3 + $0x80] sm:$0xf]  ;;  %v456_v42 = vld [vmem:[#allocation3 + $0x88] sm:$0xf0]  ;;  %v409_v43 = vor.u32 %v454_v38, %v406_v40  ;;  %v451_v47 = vld [vmem:[#allocation3 + $0x64] sm:$0xf] }
   0xc   :  { %v479_v4 = vpop.eup %478  ;;  %v413_v44 = vor.u32 %v456_v42, %v412_v41  ;;  %v392_v45 = vld [vmem:[#allocation3 + $0x60] sm:$0xf]  ;;  %v452_v46 = vld [vmem:[#allocation3 + $0x68] sm:$0xf0]  ;;  %v394_v49 = vld [vmem:[#allocation3 + $0x6c] sm:$0xf0] }
   0xd   :  { %v49_v5 = vmul.f32 128.0, %v479_v4  ;;  %vm53_vm0 = vweird.f32 %v479_v4  ;;  %284 = vmatpush.bf16.msra.mxu0 %v417_v30  ;;  %298 = vmatpush.bf16.msra.mxu1 %v421_v34  ;;  %v393_v48 = vor.u32 %v452_v46, %v392_v45  ;;  %v400_v50 = vld [vmem:[#allocation3 + $0x68] sm:$0xf]  ;;  %v453_v51 = vld [vmem:[#allocation3 + $0x70] sm:$0xf0]  ;;  %v397_v52 = vor.u32 %v451_v47, %v394_v49 }
   0xe   :  { %312 = vmatpush.bf16.msra.mxu2 %v425_v35  ;;  %v401_v53 = vor.u32 %v453_v51, %v400_v50  ;;  %v380_v54 = vld [vmem:[#allocation3 + $0x48] sm:$0xf]  ;;  %v449_v55 = vld [vmem:[#allocation3 + $0x50] sm:$0xf0]  ;;  %v448_v56 = vld [vmem:[#allocation3 + $0x4c] sm:$0xf] }
   0xf   :  { %v50_v6 = vsub.f32 1.0, %v49_v5  ;;  %v381_v57 = vor.u32 %v449_v55, %v380_v54  ;;  %v382_v58 = vld [vmem:[#allocation3 + $0x54] sm:$0xf0]  ;;  %v388_v59 = vld [vmem:[#allocation3 + $0x50] sm:$0xf] }
  0x10   :  { %46 = vadd.xlane.f32.xlu0 %v466_v2  ;;  %v450_v60 = vld [vmem:[#allocation3 + $0x58] sm:$0xf0]  ;;  %v385_v62 = vor.u32 %v448_v56, %v382_v58  ;;  %v445_v3 = vld [vmem:[#allocation3 + $0x34] sm:$0xf]  ;;  %v358_v18 = vld [vmem:[#allocation3 + $0x24] sm:$0xf0] }
  0x11   :  { %v51_v7 = vmul.f32 %v479_v4, %v50_v6  ;;  %285 = vmatpush.bf16.msra.mxu0 %v405_v39  ;;  %299 = vmatpush.bf16.msra.mxu1 %v409_v43  ;;  %v389_v63 = vor.u32 %v450_v60, %v388_v59  ;;  %v370_v6 = vld [vmem:[#allocation3 + $0x3c] sm:$0xf0]  ;;  %v444_v20 = vld [vmem:[#allocation3 + $0x28] sm:$0xf0]  ;;  %v439_v26 = vld [vmem:[#allocation3 + $0x4] sm:$0xf] }
  0x12   :  { %313 = vmatpush.bf16.msra.mxu2 %v413_v44  ;;  %v364_v19 = vld [vmem:[#allocation3 + $0x20] sm:$0xf]  ;;  %v440_v25 = vld [vmem:[#allocation3 + $0x8] sm:$0xf0]  ;;  %v346_v29 = vld [vmem:[#allocation3 + $0xc] sm:$0xf0] }
  0x13   :  { %v52_v8 = vadd.f32 %v479_v4, %v51_v7  ;;  %v376_v7 = vld [vmem:[#allocation3 + $0x38] sm:$0xf]  ;;  %v365_v23 = vor.u32 %v444_v20, %v364_v19  ;;  %v344_v24 = vld [vmem:[#allocation3] sm:$0xf]  ;;  %v352_v30 = vld [vmem:[#allocation3 + $0x8] sm:$0xf]  ;;  %v349_v32 = vor.u32 %v439_v26, %v346_v29 }
  0x14   :  { %v345_v28 = vor.u32 %v440_v25, %v344_v24  ;;  %v441_v31 = vld [vmem:[#allocation3 + $0x10] sm:$0xf0]  ;;  %v476_v46 = vld [vmem:[%s590_s3] ss:$0 sm:$0xff] }
  0x15   :  { %v550_v9 = vsel %vm53_vm0, %v479_v4, %v52_v8  ;;  %286 = vmatpush.bf16.msra.mxu0 %v393_v48  ;;  %300 = vmatpush.bf16.msra.mxu1 %v397_v52  ;;  %v373_v8 = vor.u32 %v445_v3, %v370_v6  ;;  %v353_v35 = vor.u32 %v441_v31, %v352_v30  ;;  %v477_v50 = vld [vmem:[%s591_s4] ss:$0 sm:$0xff] }
  0x16   :  { %314 = vmatpush.bf16.msra.mxu2 %v401_v53 }
  0x19   :  { %287 = vmatpush.bf16.msra.mxu0 %v381_v57  ;;  %301 = vmatpush.bf16.msra.mxu1 %v385_v62 }
  0x1a   :  { %315 = vmatpush.bf16.msra.mxu2 %v389_v63 }
  0x1d   :  { %302 = vmatpush.bf16.msra.mxu1 %v373_v8 }
  0x7b   :  { %v45_v10 = vpop.xlane.xlu0 %44 }
  0x7c   :  { %v55_v11 = vmul.f32 %v550_v9, %v45_v10  ;;  %v447_v10 = vld [vmem:[#allocation3 + $0x40] sm:$0xf0] }
  0x7e   :  { %v553_v12 = vsub.f32 %v465_v1, %v55_v11  ;;  %v368_v1 = vld [vmem:[#allocation3 + $0x30] sm:$0xf]  ;;  %v377_v11 = vor.u32 %v447_v10, %v376_v7 }
  0x80   :  { %v59_v13 = vmul.f32 %v553_v12, %v553_v12  ;;  %316 = vmatpush.bf16.msra.mxu2 %v377_v11 }
  0x82   :  { %61 = vadd.xlane.f32.xlu1 %v59_v13  ;;  %v356_v13 = vld [vmem:[#allocation3 + $0x18] sm:$0xf] }
  0x83   :  { %v47_v14 = vpop.xlane.xlu0 %46 }
  0x84   :  { %v56_v15 = vmul.f32 %v550_v9, %v47_v14  ;;  %v443_v14 = vld [vmem:[#allocation3 + $0x20] sm:$0xf0]  ;;  %317 = vmatpush.bf16.msra.mxu2 %v365_v23 }
  0x86   :  { %v558_v16 = vsub.f32 %v466_v2, %v56_v15  ;;  %v446_v2 = vld [vmem:[#allocation3 + $0x38] sm:$0xf0] }
  0x87   :  { %v369_v5 = vor.u32 %v446_v2, %v368_v1  ;;  %v442_v15 = vld [vmem:[#allocation3 + $0x1c] sm:$0xf] }
  0x88   :  { %v60_v17 = vmul.f32 %v558_v16, %v558_v16  ;;  %v361_v22 = vor.u32 %v442_v15, %v358_v18  ;;  %318 = vmatpush.bf16.msra.mxu2 %v353_v35 }
  0x89   :  { %288 = vmatpush.bf16.msra.mxu0 %v369_v5 }
  0x8a   :  { %63 = vadd.xlane.f32.xlu1 %v60_v17  ;;  %v357_v17 = vor.u32 %v443_v14, %v356_v13  ;;  %303 = vmatpush.bf16.msra.mxu1 %v361_v22 }
  0x8d   :  { %289 = vmatpush.bf16.msra.mxu0 %v357_v17 }
  0x8e   :  { %304 = vmatpush.bf16.msra.mxu1 %v349_v32 }
  0x91   :  { %290 = vmatpush.bf16.msra.mxu0 %v345_v28 }
  0xf5   :  { %v62_v61 = vpop.xlane.xlu1 %61 }
  0xf6   :  { %v65_v0 = vmul.f32 %v62_v61, %v550_v9 }
  0xf8   :  { %v67_v4 = vadd.f32 1e-05, %v65_v0 }
  0xfa   :  { %480 = vrsqrt.f32 %v67_v4  ;;  %vm75_vm2 = vweird.f32 %v67_v4 }
  0xfd   :  { %v64_v21 = vpop.xlane.xlu1 %63 }
  0xfe   :  { %v66_v27 = vmul.f32 %v64_v21, %v550_v9 }
 0x100   :  { %v481_v33 = vpop.eup %480  ;;  %v68_v34 = vadd.f32 1e-05, %v66_v27 }
 0x101   :  { %v70_v36 = vmul.f32 %v481_v33, %v67_v4  ;;  %vm76_vm1 = vweird.f32 %v481_v33 }
 0x102   :  { %482 = vrsqrt.f32 %v68_v34  ;;  %vm77_vm3 = vmor %vm75_vm2, %vm76_vm1  ;;  %vm85_vm5 = vweird.f32 %v68_v34 }
 0x103   :  { %v71_v37 = vmul.f32 %v481_v33, %v70_v36 }
 0x105   :  { %v72_v38 = vmul.f32 0.5, %v71_v37 }
 0x107   :  { %v73_v39 = vsub.f32 1.5, %v72_v38 }
 0x108   :  { %v483_v9 = vpop.eup %482 }
 0x109   :  { %v74_v40 = vmul.f32 %v481_v33, %v73_v39  ;;  %v80_v41 = vmul.f32 %v483_v9, %v68_v34  ;;  %vm86_vm4 = vweird.f32 %v483_v9 }
 0x10a   :  { %vm87_vm6 = vmor %vm85_vm5, %vm86_vm4 }
 0x10b   :  { %v81_v42 = vmul.f32 %v483_v9, %v80_v41  ;;  %v78_v43 = vsel %vm77_vm3, %v481_v33, %v74_v40 }
 0x10c   :  { %v89_v47 = vmul.f32 %v78_v43, %v553_v12  ;;  %v141_v12 = vld [vmem:[%s589_s2] sm:$0x7] }
 0x10d   :  { %v82_v44 = vmul.f32 0.5, %v81_v42  ;;  %v143_v58 = vperm.slane %v141_v12, 0  ;;  %v144_v59 = vperm.slane %v141_v12, 1  ;;  %v145_v0 = vperm.slane %v141_v12, 2 }
 0x10e   :  { %v95_v51 = vmul.f32 %v476_v46, %v89_v47 }
 0x10f   :  { %v83_v45 = vsub.f32 1.5, %v82_v44 }
 0x110   :  { %v101_v54 = vadd.f32 %v477_v50, %v95_v51 }
 0x111   :  { %v84_v48 = vmul.f32 %v483_v9, %v83_v45 }
 0x113   :  { %v88_v49 = vsel %vm87_vm6, %v483_v9, %v84_v48 }
 0x114   :  { %v90_v52 = vmul.f32 %v88_v49, %v558_v16 }
 0x116   :  { %v96_v53 = vmul.f32 %v476_v46, %v90_v52 }
 0x118   :  { %v102_v55 = vadd.f32 %v477_v50, %v96_v53 }
 0x11a   :  { %v470_v56 = vpack.c.bf16 %v102_v55, %v101_v54 }
 0x11c   :  { %471 = vst [vmem:[#allocation2] sm:$0xff] %v470_v56  }
 0x123   :  { %v438_v57 = vld [vmem:[#allocation2] sm:$0xff] }
 0x124   :  { %291 = vmatmul.bf16.vlgmr.msra.gmra.mxu0 %v438_v57  ;;  %305 = vmatmul.bf16.vlgmr.msra.gmra.mxu1 %v438_v57 }
 0x125   :  { %319 = vmatmul.bf16.vlgmr.msra.gmra.mxu2 %v438_v57 }
 0x1a1   :  { %v292_v60 = vpop.f32.mrf.mxu0  ;;  %v306_v61 = vpop.f32.mrf.mxu1 }
 0x1a2   :  { %v293_v62 = vadd.f32 %v292_v60, %v143_v58  ;;  %v307_v63 = vadd.f32 %v306_v61, %v144_v59 }
 0x1a4   :  { %v325_v16 = vpack.c.bf16 %v307_v63, %v293_v62 }
 0x1a6   :  { %329 = vst [vmem:[%s592_s5] sm:$0xff] %v325_v16 }
 0x1a8   :  { %v320_v1 = vpop.f32.mrf.mxu2 }
 0x1a9   :  { %v321_v2 = vadd.f32 %v320_v1, %v145_v0  ;;  %v294_v3 = vpop.f32.mrf.mxu0  ;;  %v308_v4 = vpop.f32.mrf.mxu1 }
 0x1aa   :  { %v295_v5 = vadd.f32 %v294_v3, %v143_v58  ;;  %v309_v6 = vadd.f32 %v308_v4, %v144_v59 }
 0x1ab   :  { %v326_v7 = vpack.c.bf16 %v321_v2, %v321_v2 }
 0x1ac   :  { %v327_v8 = vpack.c.bf16 %v309_v6, %v295_v5 }
 0x1ad   :  { %330 = vst [vmem:[%s592_s5 + $0x8] sm:$0xf] %v326_v7 }
 0x1ae   :  { %331 = vst [vmem:[%s592_s5 + $0xc] sm:$0xff] %v327_v8 }
 0x1b0   :  { %v322_v10 = vpop.f32.mrf.mxu2 }
 0x1b1   :  { %v323_v11 = vadd.f32 %v322_v10, %v145_v0 }
 0x1b3   :  { %v328_v13 = vpack.c.bf16 %v323_v11, %v323_v11 }
 0x1b5   :  { %332 = vst [vmem:[%s592_s5 + $0x14] sm:$0xf] %v328_v13 }
 0x1b6   :  { %337 = vsyncpa [#allocation4], 1 }

// kernel: clip_vision_tower_forward.15
= control target key start
LH: loop header
LB: loop body
LE: loop exit
PB: predicated region body
PF: predicated region fallthrough
CT: control target
= control target key end

     0   :  { %s817_s12 = smov 0   ;;  %s819_s13 = smov 0   ;;  %s909_s0 = inlined_call_operand.vmem [shape: bf16[2,8,384], index: 0, kind: input, shape index: {}, may-alias: {0,1,2}]   ;;  %s910_s1 = inlined_call_operand.vmem [shape: bf16[2,8,384], index: 1, kind: input, shape index: {}, may-alias: {0,1,2}]   ;;  %s911_s2 = inlined_call_operand.vmem [shape: bf16[2,8,384], index: 2, kind: input, shape index: {}, may-alias: {0,1,2}]   ;;  %s912_s3 = inlined_call_operand.vmem [shape: bf16[2,8,128], index: 3, kind: output, shape index: {}]  }
   0x1   :  { %s821_s14 = smov 0  }
   0x2 LB: > { %s32_s15 = sadd.s32 1, %s788_s13  ;;  %p705_p0 = scmp.ge.s32.totalorder %s792_s14, 1  ;;  %s792_s14 = sphi %s821_s14, %s13_s14   ;;  %s788_s13 = sphi %s819_s13, %s914_s13   ;;  %s784_s12 = sphi %s817_s12, %s913_s12  }
   0x3   : > { %p34_p1 = scmp.ge.s32.totalorder %s32_s15, 2  ;;  %p209_p2 = scmp.lt.s32.totalorder %s792_s14, 3 }
   0x5   : > { %s916_s15 = smov (%p34_p1, %s32_s15), 0  ;;  %p210_p3 = pnand %p705_p0, %p209_p2 }
   0x6   : > { %p263_p4 = scmp.lt.s32.totalorder (!%p210_p3), %s784_s12, 1  ;;  %s794_s24 = smov (!%p210_p3), 64  }
   0x7   : > { %213 = sbr.rel (%p210_p3) target bundleno = 1086 (0x43e), region = 32  ;;  %s795_s25 = smov (!%p210_p3), 32  }
   0x8   : > { %s796_s26 = smov (!%p210_p3), 96  }
   0xc   : > { %s918_s12 = smov (!%p263_p4, %s784_s12), 1  ;;  %vm312_vm0 = vcmask 261120   ;;  %v306_v7 = vlaneseq  ;;  %vm334_vm2 = vcmask 64512   ;;  %vm350_vm3 = vcmask 1043456  }
   0xd   : > { %s838_s16 = smul.u32 12, %s918_s12  ;;  %vm563_vm4 = vcmask 523264   ;;  %s709_s4 = sshll.u32 %s918_s12, 2  ;;  %vm565_vm5 = vcmask 785408  }
   0xe   : > { %v307_v8 = vand.u32 127, %v306_v7  ;;  %s304_s7 = scalar_lea.vmem %s912_s3, %s709_s4 }
   0xf   : > { %s721_s17 = sadd.s32 4, %s838_s16  ;;  %s274_s23 = scalar_lea.vmem %s909_s0, %s838_s16 }
  0x10   : > { %s283_s20 = scalar_lea.vmem %s910_s1, %s721_s17  ;;  %v309_v2 = vld [vmem:[%s274_s23] sm:$0xf]  ;;  %vm308_vm1 = vcmp.lt.s32.totalorder %v307_v8, 5  ;;  %s723_s27 = sadd.s32 8, %s838_s16 }
  0x11   : > { %v310_v0 = vld [vmem:[%s283_s20] sm:$0xf]  ;;  %v368_v5 = vunpack.c.l.b16 %v309_v2  ;;  %s293_s30 = scalar_lea.vmem %s911_s2, %s723_s27 }
  0x12   : > { %v317_v1 = vsel %vm312_vm0, %v310_v0, 0  ;;  %v373_v3 = vunpack.c.l.b16 %v310_v0  ;;  %v311_v24 = vld [vmem:[%s293_s30] sm:$0xf] }
  0x13   : > { %326 = vmatpush.bf16.xpose.msra.mxu0 %v317_v1  ;;  %v369_v6 = vpack.c.b16 %v368_v5, %v368_v5  ;;  %v352_v25 = vsel %vm350_vm3, %v311_v24, 0  ;;  %v411_v51 = vunpack.c.l.b16 %v311_v24 }
  0x14   : > { %v374_v4 = vpack.c.b16 %v373_v3, %v373_v3  ;;  %361 = vmatpush.bf16.msra.mxu1 %v352_v25 }
  0x15   : > { %v412_v52 = vpack.c.b16 %v411_v51, %v411_v51 }
  0x16   : > { %436 = vrot.lane.b32.xlu2 %v374_v4, %s794_s24 }
  0x1a   : > { %710 = vmatmul.msk.bf16.vlgmr.msra.gmra.mxu0 %vm312_vm0, %v309_v2 }
  0x1e   : > { %494 = vrot.lane.b32.xlu2 %v374_v4, %s795_s25 }
  0x26   : > { %434 = vrot.lane.b32.xlu2 %v369_v6, %s794_s24 }
  0x2e   : > { %492 = vrot.lane.b32.xlu2 %v369_v6, %s795_s25 }
  0x70   : > { %v437_v14 = vpop.permute.xlu2 %436 }
  0x71   : > { %v442_v26 = vsel %vm312_vm0, %v437_v14, 0 }
  0x72   : > { %451 = vmatpush.bf16.xpose.msrb.mxu1 %v442_v26 }
  0x78   : > { %v495_v15 = vpop.permute.xlu2 %494 }
  0x79   : > { %v500_v20 = vsel %vm312_vm0, %v495_v15, 0 }
  0x7a   : > { %509 = vmatpush.bf16.xpose.msrb.mxu0 %v500_v20 }
  0x80   : > { %v435_v19 = vpop.permute.xlu2 %434 }
  0x88   : > { %v493_v23 = vpop.permute.xlu2 %492 }
  0x89   : > { %716 = vmatmul.msk.bf16.vlgmr.msrb.gmra.mxu0 %vm312_vm0, %v493_v23 }
  0x97   : > { %v328_v9 = vpop.f32.mrf.mxu0 }
  0x98   : > { %v332_v10 = vmul.f32 0.17677669, %v328_v9 }
  0x9a   : > { %v333_v11 = vsel %vm308_vm1, %v332_v10, -1e+30 }
  0x9b   : > { %v335_v12 = vsel %vm334_vm2, %v333_v11, -inf }
  0x9c   : > { %336 = vmax.xlane.f32.xlu0 %v335_v12 }
  0x9f   : > { %v330_v13 = vpop.f32.mrf.mxu0 }
  0xb0   : > { %375 = vrot.lane.b32.xlu0 %v374_v4, %s796_s26 }
 0x106   : > { %v511_v33 = vpop.f32.mrf.mxu0 }
 0x107   : > { %v515_v34 = vmul.f32 0.17677669, %v511_v33 }
 0x109   : > { %v516_v35 = vsel %vm308_vm1, %v515_v34, -1e+30 }
 0x10a   : > { %v517_v36 = vsel %vm334_vm2, %v516_v35, -inf }
 0x10e   : > { %v513_v37 = vpop.f32.mrf.mxu0 }
 0x10f   : > { %v337_v16 = vpop.xlane.xlu0 %336 }
 0x110   : > { %v338_v17 = vsub.f32 %v333_v11, %v337_v16 }
 0x112   : > { %v339_v18 = vmul.f32 1.442695, %v338_v17 }
 0x114   : > { %754 = vpow2.f32 %v339_v18 }
 0x11a   : > { %v755_v21 = vpop.eup %754 }
 0x11b   : > { %v341_v22 = vsel %vm334_vm2, %v755_v21, 0.0 }
 0x11c   : > { %342 = vadd.xlane.f32.xlu1 %v341_v22 }
 0x122   : > { %v376_v27 = vpop.permute.xlu0 %375 }
 0x123   : > { %v381_v28 = vsel %vm312_vm0, %v376_v27, 0 }
 0x124   : > { %390 = vmatpush.bf16.xpose.msra.mxu2 %v381_v28 }
 0x135   : > { %370 = vrot.lane.b32.xlu1 %v369_v6, %s796_s26 }
 0x15f   : > { %518 = vmax.xlane.f32.xlu1 %v517_v36 }
 0x18f   : > { %v343_v29 = vpop.xlane.xlu1 %342 }
 0x190   : > { %756 = vrcp.f32 %v343_v29 }
 0x196   : > { %v757_v30 = vpop.eup %756 }
 0x197   : > { %v345_v31 = vmul.f32 %v757_v30, %v755_v21 }
 0x199   : > { %v346_v32 = vpack.c.bf16 %v345_v31, %v345_v31 }
 0x19b   : > { %711 = vmatmul.msk.bf16.vlgmr.msra.gmra.mxu1 %vm334_vm2, %v346_v32 }
 0x1a7   : > { %v371_v38 = vpop.permute.xlu1 %370 }
 0x1a8   : > { %712 = vmatmul.msk.bf16.vlgmr.msra.gmra.mxu2 %vm312_vm0, %v371_v38 }
 0x1ab   : > { %714 = vmatmul.msk.bf16.vlgmr.msrb.gmra.mxu1 %vm312_vm0, %v435_v19 }
 0x1d2   : > { %v519_v55 = vpop.xlane.xlu1 %518 }
 0x1d3   : > { %v520_v59 = vsub.f32 %v516_v35, %v519_v55 }
 0x1d5   : > { %v521_v61 = vmul.f32 1.442695, %v520_v59 }
 0x218   : > { %v873_v39 = vpop.f32.mrf.mxu1 }
 0x220   : > { %v365_v40 = vpop.f32.mrf.mxu1 }
 0x228   : > { %v453_v41 = vpop.f32.mrf.mxu1 }
 0x229   : > { %v457_v42 = vmul.f32 0.17677669, %v453_v41 }
 0x22b   : > { %v392_v43 = vpop.f32.mrf.mxu2  ;;  %v458_v44 = vsel %vm308_vm1, %v457_v42, -1e+30 }
 0x22c   : > { %v396_v45 = vmul.f32 0.17677669, %v392_v43  ;;  %v459_v46 = vsel %vm334_vm2, %v458_v44, -inf }
 0x22d   : > { %460 = vmax.xlane.f32.xlu2 %v459_v46 }
 0x22e   : > { %v397_v47 = vsel %vm308_vm1, %v396_v45, -1e+30 }
 0x22f   : > { %v398_v48 = vsel %vm334_vm2, %v397_v47, -inf }
 0x230   : > { %v455_v49 = vpop.f32.mrf.mxu1  ;;  %399 = vmax.xlane.f32.xlu0 %v398_v48 }
 0x233   : > { %v394_v50 = vpop.f32.mrf.mxu2 }
 0x245   : > { %413 = vrot.lane.b32.xlu2 %v412_v52, %s796_s26 }
 0x2a0   : > { %v461_v53 = vpop.xlane.xlu2 %460 }
 0x2a1   : > { %v462_v54 = vsub.f32 %v458_v44, %v461_v53 }
 0x2a3   : > { %v463_v56 = vmul.f32 1.442695, %v462_v54  ;;  %v400_v57 = vpop.xlane.xlu0 %399 }
 0x2a4   : > { %v401_v58 = vsub.f32 %v397_v47, %v400_v57 }
 0x2a5   : > { %758 = vpow2.f32 %v463_v56 }
 0x2a6   : > { %v402_v60 = vmul.f32 1.442695, %v401_v58 }
 0x2a8   : > { %760 = vpow2.f32 %v402_v60  ;;  %v414_v4 = vpop.permute.xlu2 %413 }
 0x2a9   : > { %762 = vpow2.f32 %v521_v61  ;;  %v419_v5 = vsel %vm350_vm3, %v414_v4, 0 }
 0x2aa   : > { %428 = vmatpush.bf16.msra.mxu3 %v419_v5 }
 0x2ab   : > { %v759_v62 = vpop.eup %758 }
 0x2ac   : > { %v465_v63 = vsel %vm334_vm2, %v759_v62, 0.0 }
 0x2ad   : > { %466 = vadd.xlane.f32.xlu1 %v465_v63 }
 0x2ae   : > { %v761_v0 = vpop.eup %760 }
 0x2af   : > { %v404_v1 = vsel %vm334_vm2, %v761_v0, 0.0  ;;  %v763_v2 = vpop.eup %762 }
 0x2b0   : > { %405 = vadd.xlane.f32.xlu0 %v404_v1  ;;  %v523_v3 = vsel %vm334_vm2, %v763_v2, 0.0 }
 0x2b8   : > { %524 = vadd.xlane.f32.xlu0 %v523_v3 }
 0x2c6   : > { %471 = vrot.lane.b32.xlu1 %v412_v52, %s794_s24 }
 0x2cc   : > { %529 = vrot.lane.b32.xlu0 %v412_v52, %s795_s25 }
 0x320   : > { %v467_v9 = vpop.xlane.xlu1 %466 }
 0x323   : > { %v406_v6 = vpop.xlane.xlu0 %405 }
 0x324   : > { %764 = vrcp.f32 %v406_v6 }
 0x325   : > { %766 = vrcp.f32 %v467_v9 }
 0x32a   : > { %v765_v7 = vpop.eup %764 }
 0x32b   : > { %v408_v8 = vmul.f32 %v765_v7, %v761_v0  ;;  %v525_v11 = vpop.xlane.xlu0 %524  ;;  %v767_v12 = vpop.eup %766 }
 0x32c   : > { %768 = vrcp.f32 %v525_v11  ;;  %v469_v14 = vmul.f32 %v767_v12, %v759_v62 }
 0x32d   : > { %v409_v10 = vpack.c.bf16 %v408_v8, %v408_v8 }
 0x32e   : > { %v470_v18 = vpack.c.bf16 %v469_v14, %v469_v14 }
 0x32f   : > { %713 = vmatmul.msk.bf16.vlgmr.msra.gmra.mxu3 %vm334_vm2, %v409_v10 }
 0x332   : > { %v769_v16 = vpop.eup %768 }
 0x333   : > { %v527_v17 = vmul.f32 %v769_v16, %v763_v2 }
 0x335   : > { %v528_v21 = vpack.c.bf16 %v527_v17, %v527_v17 }
 0x338   : > { %v472_v13 = vpop.permute.xlu1 %471 }
 0x339   : > { %v477_v15 = vsel %vm350_vm3, %v472_v13, 0 }
 0x33a   : > { %486 = vmatpush.bf16.msrb.mxu3 %v477_v15 }
 0x33e   : > { %v530_v19 = vpop.permute.xlu0 %529 }
 0x33f   : > { %715 = vmatmul.msk.bf16.vlgmr.msrb.gmra.mxu3 %vm334_vm2, %v470_v18  ;;  %v535_v20 = vsel %vm350_vm3, %v530_v19, 0 }
 0x340   : > { %544 = vmatpush.bf16.msrb.mxu2 %v535_v20 }
 0x343   : > { %717 = vmatmul.msk.bf16.vlgmr.msrb.gmra.mxu2 %vm334_vm2, %v528_v21 }
 0x3b2   : > { %v430_v22 = vpop.f32.mrf.mxu3 }
 0x3b3   : > { %551 = vrot.lane.b32.xlu2 %v430_v22, %s795_s25 }
 0x3ba   : > { %v432_v23 = vpop.f32.mrf.mxu3 }
 0x3c2   : > { %v488_v24 = vpop.f32.mrf.mxu3 }
 0x3c3   : > { %555 = vrot.lane.b32.xlu2 %v488_v24, %s794_s24 }
 0x3c6   : > { %v546_v25 = vpop.f32.mrf.mxu2 }
 0x3c7   : > { %559 = vrot.lane.b32.xlu0 %v546_v25, %s796_s26 }
 0x3ca   : > { %v490_v26 = vpop.f32.mrf.mxu3 }
 0x3ce   : > { %v548_v27 = vpop.f32.mrf.mxu2 }
 0x40d   : > { %v552_v28 = vpop.permute.xlu2 %551 }
 0x40e   : > { %v562_v30 = vsel %vm312_vm0, %v873_v39, %v552_v28 }
 0x41d   : > { %v556_v29 = vpop.permute.xlu2 %555 }
 0x41e   : > { %v564_v31 = vsel %vm563_vm4, %v562_v30, %v556_v29 }
 0x439   : > { %v560_v32 = vpop.permute.xlu0 %559 }
 0x43a   : > { %v566_v33 = vsel %vm565_vm5, %v564_v31, %v560_v32 }
 0x43b   : > { %v567_v34 = vpack.c.bf16 %v566_v33, %v566_v33 }
 0x43d   : > { %568 = vst [vmem:[%s304_s7] sm:$0xf] %v567_v34 }
 0x43e PF: > { %s13_s14 = sadd.s32 1, %s792_s14   ;;  %s913_s12 = smov %s788_s13 }
 0x43f   : > { %p10_p5 = scmp.ge.s32.totalorder %s13_s14, 4   ;;  %s914_s13 = smov %s916_s15 }
 0x441   :  { %12 = sbr.rel (!%p10_p5) target bundleno = 2 (0x2), region = 68 }

// kernel: clip_vision_tower_forward.16
= control target key start
LH: loop header
LB: loop body
LE: loop exit
PB: predicated region body
PF: predicated region fallthrough
CT: control target
= control target key end

     0   :  { %s237_s1 = inlined_call_operand.vmem [shape: bf16[128,128], index: 1, kind: input, shape index: {}]   ;;  %s238_s2 = inlined_call_operand.vmem [shape: f32[1,128], index: 2, kind: input, shape index: {}]   ;;  %s239_s0 = inlined_call_operand.vmem [shape: bf16[16,128], index: 0, kind: input, shape index: {}]   ;;  %s240_s3 = inlined_call_operand.vmem [shape: bf16[16,128], index: 3, kind: input, shape index: {}]   ;;  %s241_s4 = inlined_call_operand.vmem [shape: bf16[16,128], index: 4, kind: output, shape index: {}]  }
   0x1   :  { %v165_v0 = vld [vmem:[%s237_s1 + $0x38] sm:$0xff]  ;;  %v164_v1 = vld [vmem:[%s237_s1 + $0x30] sm:$0xff]  ;;  %v163_v2 = vld [vmem:[%s237_s1 + $0x28] sm:$0xff] }
   0x2   :  { %93 = vmatpush.bf16.msra.mxu0 %v165_v0  ;;  %v162_v3 = vld [vmem:[%s237_s1 + $0x20] sm:$0xff]  ;;  %v161_v4 = vld [vmem:[%s237_s1 + $0x18] sm:$0xff]  ;;  %v160_v5 = vld [vmem:[%s237_s1 + $0x10] sm:$0xff] }
   0x3   :  { %v159_v6 = vld [vmem:[%s237_s1 + $0x8] sm:$0xff]  ;;  %v158_v7 = vld [vmem:[%s237_s1] sm:$0xff] }
   0x4   :  { %v157_v8 = vld [vmem:[%s239_s0] sm:$0xff] }
   0x5   :  { %v175_v10 = vld [vmem:[%s238_s2] ss:$0 sm:$0xff] }
   0x6   :  { %94 = vmatpush.bf16.msra.mxu0 %v164_v1  ;;  %v167_v11 = vld [vmem:[%s240_s3] sm:$0xff]  }
   0x7   :  { %v168_v13 = vunpack.c.l.bf16 %v167_v11  ;;  %v169_v14 = vunpack.c.h.bf16 %v167_v11 }
   0xa   :  { %95 = vmatpush.bf16.msra.mxu0 %v163_v2 }
   0xe   :  { %96 = vmatpush.bf16.msra.mxu0 %v162_v3 }
  0x12   :  { %97 = vmatpush.bf16.msra.mxu0 %v161_v4 }
  0x16   :  { %98 = vmatpush.bf16.msra.mxu0 %v160_v5 }
  0x1a   :  { %99 = vmatpush.bf16.msra.mxu0 %v159_v6 }
  0x1e   :  { %100 = vmatpush.bf16.msra.mxu0 %v158_v7 }
  0x21   :  { %101 = vmatmul.bf16.vlgmr.msra.gmra.mxu0 %v157_v8 }
  0x9e   :  { %v102_v9 = vpop.f32.mrf.mxu0 }
  0x9f   :  { %v103_v12 = vadd.f32 %v175_v10, %v102_v9 }
  0xa1   :  { %v111_v17 = vadd.f32 %v168_v13, %v103_v12 }
  0xa6   :  { %v104_v15 = vpop.f32.mrf.mxu0 }
  0xa7   :  { %v105_v16 = vadd.f32 %v175_v10, %v104_v15 }
  0xa9   :  { %v112_v18 = vadd.f32 %v169_v14, %v105_v16 }
  0xab   :  { %v173_v19 = vpack.c.bf16 %v112_v18, %v111_v17 }
  0xad   :  { %174 = vst [vmem:[%s241_s4] sm:$0xff] %v173_v19  }

// kernel: clip_vision_tower_forward.17
= control target key start
LH: loop header
LB: loop body
LE: loop exit
PB: predicated region body
PF: predicated region fallthrough
CT: control target
= control target key end

     0   :  { %v760_v3 = vmov 128.0   ;;  %s1131_s0 = inlined_call_operand.vmem [shape: bf16[16,128], index: 0, kind: input, shape index: {}]   ;;  %s1132_s3 = inlined_call_operand.vmem [shape: f32[1,128], index: 3, kind: input, shape index: {}]   ;;  %s1133_s4 = inlined_call_operand.vmem [shape: f32[1,128], index: 4, kind: input, shape index: {}]   ;;  %s1134_s1 = inlined_call_operand.vmem [shape: bf16[128,512], index: 1, kind: input, shape index: {}]   ;;  %s1135_s2 = inlined_call_operand.vmem [shape: f32[1,512], index: 2, kind: input, shape index: {}]   ;;  %s1136_s5 = inlined_call_operand.vmem [shape: bf16[16,512], index: 5, kind: output, shape index: {}]  }
   0x1   :  { %v711_v0 = vld [vmem:[%s1131_s0] sm:$0xff]   ;;  %722 = vrcp.f32 %v760_v3  ;;  %v708_v19 = vld [vmem:[%s1134_s1 + $0xec] sm:$0xf0]  ;;  %v657_v22 = vld [vmem:[%s1134_s1 + $0xf0] sm:$0xf0] }
   0x2   :  { %v712_v1 = vunpack.c.l.bf16 %v711_v0  ;;  %v713_v2 = vunpack.c.h.bf16 %v711_v0  ;;  %v655_v18 = vld [vmem:[%s1134_s1 + $0xe0] sm:$0xf]  ;;  %v706_v20 = vld [vmem:[%s1134_s1 + $0xe4] sm:$0xf]  ;;  %v663_v23 = vld [vmem:[%s1134_s1 + $0xe8] sm:$0xf] }
   0x3   :  { %v656_v21 = vor.u32 %v708_v19, %v655_v18  ;;  %v709_v24 = vld [vmem:[%s1134_s1 + $0xf4] sm:$0xf0]  ;;  %v660_v25 = vor.u32 %v706_v20, %v657_v22  ;;  %v707_v27 = vld [vmem:[%s1134_s1 + $0xec] sm:$0xf]  ;;  %v665_v28 = vld [vmem:[%s1134_s1 + $0xf8] sm:$0xf0] }
   0x4   :  { %28 = vadd.xlane.f32.xlu0 %v712_v1  ;;  %v664_v26 = vor.u32 %v709_v24, %v663_v23  ;;  %v668_v29 = vor.u32 %v707_v27, %v665_v28  ;;  %v639_v30 = vld [vmem:[%s1134_s1 + $0xc0] sm:$0xf]  ;;  %v704_v31 = vld [vmem:[%s1134_s1 + $0xcc] sm:$0xf0]  ;;  %v702_v32 = vld [vmem:[%s1134_s1 + $0xc4] sm:$0xf] }
   0x5   :  { %301 = vmatpush.bf16.msra.mxu0 %v656_v21  ;;  %315 = vmatpush.bf16.msra.mxu1 %v660_v25  ;;  %v640_v33 = vor.u32 %v704_v31, %v639_v30  ;;  %v641_v34 = vld [vmem:[%s1134_s1 + $0xd0] sm:$0xf0]  ;;  %v647_v35 = vld [vmem:[%s1134_s1 + $0xc8] sm:$0xf]  ;;  %v705_v36 = vld [vmem:[%s1134_s1 + $0xd4] sm:$0xf0] }
   0x6   :  { %329 = vmatpush.bf16.msra.mxu2 %v664_v26  ;;  %343 = vmatpush.bf16.msra.mxu3 %v668_v29  ;;  %v644_v37 = vor.u32 %v702_v32, %v641_v34  ;;  %v648_v38 = vor.u32 %v705_v36, %v647_v35  ;;  %v703_v39 = vld [vmem:[%s1134_s1 + $0xcc] sm:$0xf]  ;;  %v649_v40 = vld [vmem:[%s1134_s1 + $0xd8] sm:$0xf0]  ;;  %v623_v42 = vld [vmem:[%s1134_s1 + $0xa0] sm:$0xf] }
   0x7   :  { %v723_v4 = vpop.eup %722  ;;  %v652_v41 = vor.u32 %v703_v39, %v649_v40  ;;  %v700_v43 = vld [vmem:[%s1134_s1 + $0xac] sm:$0xf0]  ;;  %v698_v44 = vld [vmem:[%s1134_s1 + $0xa4] sm:$0xf]  ;;  %v625_v46 = vld [vmem:[%s1134_s1 + $0xb0] sm:$0xf0] }
   0x8   :  { %v33_v5 = vmul.f32 128.0, %v723_v4  ;;  %vm37_vm0 = vweird.f32 %v723_v4  ;;  %v624_v45 = vor.u32 %v700_v43, %v623_v42  ;;  %v631_v47 = vld [vmem:[%s1134_s1 + $0xa8] sm:$0xf]  ;;  %v701_v48 = vld [vmem:[%s1134_s1 + $0xb4] sm:$0xf0]  ;;  %v628_v49 = vor.u32 %v698_v44, %v625_v46 }
   0x9   :  { %302 = vmatpush.bf16.msra.mxu0 %v640_v33  ;;  %316 = vmatpush.bf16.msra.mxu1 %v644_v37  ;;  %v632_v50 = vor.u32 %v701_v48, %v631_v47  ;;  %v699_v51 = vld [vmem:[%s1134_s1 + $0xac] sm:$0xf]  ;;  %v633_v52 = vld [vmem:[%s1134_s1 + $0xb8] sm:$0xf0]  ;;  %v607_v54 = vld [vmem:[%s1134_s1 + $0x80] sm:$0xf] }
   0xa   :  { %v34_v6 = vsub.f32 1.0, %v33_v5  ;;  %330 = vmatpush.bf16.msra.mxu2 %v648_v38  ;;  %344 = vmatpush.bf16.msra.mxu3 %v652_v41  ;;  %v636_v53 = vor.u32 %v699_v51, %v633_v52  ;;  %v696_v55 = vld [vmem:[%s1134_s1 + $0x8c] sm:$0xf0]  ;;  %v694_v56 = vld [vmem:[%s1134_s1 + $0x84] sm:$0xf] }
   0xb   :  { %v608_v57 = vor.u32 %v696_v55, %v607_v54  ;;  %v609_v58 = vld [vmem:[%s1134_s1 + $0x90] sm:$0xf0]  ;;  %v615_v59 = vld [vmem:[%s1134_s1 + $0x88] sm:$0xf]  ;;  %v697_v60 = vld [vmem:[%s1134_s1 + $0x94] sm:$0xf0] }
   0xc   :  { %30 = vadd.xlane.f32.xlu0 %v713_v2  ;;  %v35_v7 = vmul.f32 %v723_v4, %v34_v6  ;;  %v612_v61 = vor.u32 %v694_v56, %v609_v58  ;;  %v616_v62 = vor.u32 %v697_v60, %v615_v59  ;;  %v695_v63 = vld [vmem:[%s1134_s1 + $0x8c] sm:$0xf]  ;;  %v617_v0 = vld [vmem:[%s1134_s1 + $0x98] sm:$0xf0]  ;;  %v692_v3 = vld [vmem:[%s1134_s1 + $0x6c] sm:$0xf0] }
   0xd   :  { %303 = vmatpush.bf16.msra.mxu0 %v624_v45  ;;  %317 = vmatpush.bf16.msra.mxu1 %v628_v49  ;;  %v593_v6 = vld [vmem:[%s1134_s1 + $0x70] sm:$0xf0]  ;;  %v575_v19 = vld [vmem:[%s1134_s1 + $0x40] sm:$0xf]  ;;  %v688_v20 = vld [vmem:[%s1134_s1 + $0x4c] sm:$0xf0] }
   0xe   :  { %v36_v8 = vadd.f32 %v723_v4, %v35_v7  ;;  %331 = vmatpush.bf16.msra.mxu2 %v632_v50  ;;  %345 = vmatpush.bf16.msra.mxu3 %v636_v53  ;;  %v599_v7 = vld [vmem:[%s1134_s1 + $0x68] sm:$0xf]  ;;  %v686_v21 = vld [vmem:[%s1134_s1 + $0x44] sm:$0xf]  ;;  %v576_v23 = vor.u32 %v688_v20, %v575_v19  ;;  %v577_v24 = vld [vmem:[%s1134_s1 + $0x50] sm:$0xf0] }
   0xf   :  { %v583_v25 = vld [vmem:[%s1134_s1 + $0x48] sm:$0xf]  ;;  %v580_v26 = vor.u32 %v686_v21, %v577_v24  ;;  %v689_v27 = vld [vmem:[%s1134_s1 + $0x54] sm:$0xf0]  ;;  %v687_v28 = vld [vmem:[%s1134_s1 + $0x4c] sm:$0xf] }
  0x10   :  { %v794_v9 = vsel %vm37_vm0, %v723_v4, %v36_v8  ;;  %v690_v4 = vld [vmem:[%s1134_s1 + $0x64] sm:$0xf]  ;;  %v693_v8 = vld [vmem:[%s1134_s1 + $0x74] sm:$0xf0]  ;;  %v585_v29 = vld [vmem:[%s1134_s1 + $0x58] sm:$0xf0]  ;;  %v584_v30 = vor.u32 %v689_v27, %v583_v25 }
  0x11   :  { %304 = vmatpush.bf16.msra.mxu0 %v608_v57  ;;  %318 = vmatpush.bf16.msra.mxu1 %v612_v61  ;;  %v588_v31 = vor.u32 %v687_v28, %v585_v29  ;;  %v559_v32 = vld [vmem:[%s1134_s1 + $0x20] sm:$0xf]  ;;  %v684_v33 = vld [vmem:[%s1134_s1 + $0x2c] sm:$0xf0]  ;;  %v682_v34 = vld [vmem:[%s1134_s1 + $0x24] sm:$0xf] }
  0x12   :  { %332 = vmatpush.bf16.msra.mxu2 %v616_v62  ;;  %v560_v35 = vor.u32 %v684_v33, %v559_v32  ;;  %v561_v36 = vld [vmem:[%s1134_s1 + $0x30] sm:$0xf0]  ;;  %v567_v37 = vld [vmem:[%s1134_s1 + $0x28] sm:$0xf]  ;;  %v685_v38 = vld [vmem:[%s1134_s1 + $0x34] sm:$0xf0] }
  0x13   :  { %v564_v40 = vor.u32 %v682_v34, %v561_v36  ;;  %v568_v41 = vor.u32 %v685_v38, %v567_v37  ;;  %v683_v42 = vld [vmem:[%s1134_s1 + $0x2c] sm:$0xf]  ;;  %v569_v43 = vld [vmem:[%s1134_s1 + $0x38] sm:$0xf0]  ;;  %v543_v44 = vld [vmem:[%s1134_s1] sm:$0xf] }
  0x14   :  { %v572_v46 = vor.u32 %v683_v42, %v569_v43  ;;  %v680_v47 = vld [vmem:[%s1134_s1 + $0xc] sm:$0xf0]  ;;  %v678_v48 = vld [vmem:[%s1134_s1 + $0x4] sm:$0xf]  ;;  %v545_v49 = vld [vmem:[%s1134_s1 + $0x10] sm:$0xf0] }
  0x15   :  { %v544_v50 = vor.u32 %v680_v47, %v543_v44  ;;  %v548_v51 = vor.u32 %v678_v48, %v545_v49  ;;  %v681_v52 = vld [vmem:[%s1134_s1 + $0x14] sm:$0xf0]  ;;  %v679_v53 = vld [vmem:[%s1134_s1 + $0xc] sm:$0xf]  ;;  %v553_v57 = vld [vmem:[%s1134_s1 + $0x18] sm:$0xf0] }
  0x16   :  { %v556_v59 = vor.u32 %v679_v53, %v553_v57 }
  0x77   :  { %v29_v10 = vpop.xlane.xlu0 %28 }
  0x78   :  { %v39_v11 = vmul.f32 %v794_v9, %v29_v10 }
  0x7a   :  { %v797_v12 = vsub.f32 %v712_v1, %v39_v11  ;;  %v620_v1 = vor.u32 %v695_v63, %v617_v0  ;;  %v596_v11 = vor.u32 %v690_v4, %v593_v6  ;;  %v720_v6 = vld [vmem:[%s1132_s3] ss:$0 sm:$0xff] }
  0x7c   :  { %v43_v13 = vmul.f32 %v797_v12, %v797_v12  ;;  %346 = vmatpush.bf16.msra.mxu3 %v620_v1  ;;  %319 = vmatpush.bf16.msra.mxu1 %v596_v11  ;;  %v721_v11 = vld [vmem:[%s1133_s4] ss:$0 sm:$0xff] }
  0x7e   :  { %45 = vadd.xlane.f32.xlu1 %v43_v13  ;;  %v600_v13 = vor.u32 %v693_v8, %v599_v7 }
  0x7f   :  { %v31_v14 = vpop.xlane.xlu0 %30 }
  0x80   :  { %v40_v15 = vmul.f32 %v794_v9, %v31_v14  ;;  %v691_v14 = vld [vmem:[%s1134_s1 + $0x6c] sm:$0xf]  ;;  %333 = vmatpush.bf16.msra.mxu2 %v600_v13  ;;  %320 = vmatpush.bf16.msra.mxu1 %v580_v26 }
  0x82   :  { %v802_v16 = vsub.f32 %v713_v2, %v40_v15  ;;  %v591_v2 = vld [vmem:[%s1134_s1 + $0x60] sm:$0xf]  ;;  %v601_v15 = vld [vmem:[%s1134_s1 + $0x78] sm:$0xf0] }
  0x83   :  { %v592_v5 = vor.u32 %v692_v3, %v591_v2  ;;  %v604_v18 = vor.u32 %v691_v14, %v601_v15 }
  0x84   :  { %v44_v17 = vmul.f32 %v802_v16, %v802_v16  ;;  %334 = vmatpush.bf16.msra.mxu2 %v584_v30  ;;  %321 = vmatpush.bf16.msra.mxu1 %v564_v40 }
  0x85   :  { %305 = vmatpush.bf16.msra.mxu0 %v592_v5  ;;  %347 = vmatpush.bf16.msra.mxu3 %v604_v18 }
  0x86   :  { %47 = vadd.xlane.f32.xlu1 %v44_v17 }
  0x88   :  { %335 = vmatpush.bf16.msra.mxu2 %v568_v41  ;;  %322 = vmatpush.bf16.msra.mxu1 %v548_v51 }
  0x89   :  { %306 = vmatpush.bf16.msra.mxu0 %v576_v23  ;;  %348 = vmatpush.bf16.msra.mxu3 %v588_v31 }
  0x8d   :  { %307 = vmatpush.bf16.msra.mxu0 %v560_v35  ;;  %349 = vmatpush.bf16.msra.mxu3 %v572_v46 }
  0x91   :  { %308 = vmatpush.bf16.msra.mxu0 %v544_v50  ;;  %350 = vmatpush.bf16.msra.mxu3 %v556_v59 }
  0xf1   :  { %v46_v10 = vpop.xlane.xlu1 %45 }
  0xf2   :  { %v49_v17 = vmul.f32 %v46_v10, %v794_v9 }
  0xf4   :  { %v936_v22 = vadd.f32 1e-05, %v49_v17 }
  0xf6   :  { %724 = vrsqrt.f32 %v936_v22  ;;  %vm59_vm2 = vweird.f32 %v936_v22 }
  0xf9   :  { %v48_v39 = vpop.xlane.xlu1 %47 }
  0xfa   :  { %v50_v45 = vmul.f32 %v48_v39, %v794_v9  ;;  %v551_v9 = vld [vmem:[%s1134_s1 + $0x8] sm:$0xf] }
  0xfb   :  { %v552_v56 = vor.u32 %v681_v52, %v551_v9 }
  0xfc   :  { %v725_v54 = vpop.eup %724  ;;  %v52_v55 = vadd.f32 1e-05, %v50_v45 }
  0xfd   :  { %v54_v58 = vmul.f32 %v725_v54, %v936_v22  ;;  %336 = vmatpush.bf16.msra.mxu2 %v552_v56  ;;  %vm60_vm1 = vweird.f32 %v725_v54 }
  0xfe   :  { %726 = vrsqrt.f32 %v52_v55  ;;  %vm61_vm3 = vmor %vm59_vm2, %vm60_vm1  ;;  %vm69_vm5 = vweird.f32 %v52_v55 }
  0xff   :  { %v55_v60 = vmul.f32 %v725_v54, %v54_v58 }
 0x101   :  { %v56_v61 = vmul.f32 0.5, %v55_v60 }
 0x103   :  { %v57_v62 = vsub.f32 1.5, %v56_v61 }
 0x104   :  { %v727_v63 = vpop.eup %726 }
 0x105   :  { %v58_v0 = vmul.f32 %v725_v54, %v57_v62  ;;  %v64_v1 = vmul.f32 %v727_v63, %v52_v55  ;;  %vm70_vm4 = vweird.f32 %v727_v63 }
 0x106   :  { %vm71_vm6 = vmor %vm69_vm5, %vm70_vm4 }
 0x107   :  { %v65_v2 = vmul.f32 %v727_v63, %v64_v1  ;;  %v62_v3 = vsel %vm61_vm3, %v725_v54, %v58_v0 }
 0x108   :  { %v73_v7 = vmul.f32 %v62_v3, %v797_v12  ;;  %v125_v12 = vld [vmem:[%s1135_s2] sm:$0xf] }
 0x109   :  { %v66_v4 = vmul.f32 0.5, %v65_v2  ;;  %v127_v21 = vperm.slane %v125_v12, 0  ;;  %v128_v22 = vperm.slane %v125_v12, 1  ;;  %v129_v28 = vperm.slane %v125_v12, 2 }
 0x10a   :  { %v79_v13 = vmul.f32 %v720_v6, %v73_v7  ;;  %v130_v29 = vperm.slane %v125_v12, 3 }
 0x10b   :  { %v67_v5 = vsub.f32 1.5, %v66_v4 }
 0x10c   :  { %v85_v17 = vadd.f32 %v721_v11, %v79_v13 }
 0x10d   :  { %v68_v8 = vmul.f32 %v727_v63, %v67_v5 }
 0x10f   :  { %v72_v10 = vsel %vm71_vm6, %v727_v63, %v68_v8 }
 0x110   :  { %v74_v14 = vmul.f32 %v72_v10, %v802_v16 }
 0x112   :  { %v80_v15 = vmul.f32 %v720_v6, %v74_v14 }
 0x114   :  { %v86_v18 = vadd.f32 %v721_v11, %v80_v15 }
 0x116   :  { %v717_v19 = vpack.c.bf16 %v86_v18, %v85_v17 }
 0x118   :  { %718 = vst [vmem:[#allocation2] sm:$0xff] %v717_v19  }
 0x11f   :  { %v677_v20 = vld [vmem:[#allocation2] sm:$0xff] }
 0x120   :  { %309 = vmatmul.bf16.vlgmr.msra.gmra.mxu0 %v677_v20  ;;  %323 = vmatmul.bf16.vlgmr.msra.gmra.mxu1 %v677_v20 }
 0x121   :  { %337 = vmatmul.bf16.vlgmr.msra.gmra.mxu2 %v677_v20  ;;  %351 = vmatmul.bf16.vlgmr.msra.gmra.mxu3 %v677_v20 }
 0x19d   :  { %v310_v23 = vpop.f32.mrf.mxu0  ;;  %v324_v24 = vpop.f32.mrf.mxu1 }
 0x19e   :  { %v1016_v25 = vadd.f32 %v310_v23, %v127_v21  ;;  %v1018_v16 = vadd.f32 %v324_v24, %v128_v22 }
 0x1a0   :  { %v669_v26 = vmul.f32 -1.702, %v1016_v25  ;;  %v670_v27 = vmul.f32 -1.702, %v1018_v16 }
 0x1a2   :  { %v373_v30 = vmul.f32 1.442695, %v669_v26  ;;  %v375_v31 = vmul.f32 1.442695, %v670_v27 }
 0x1a4   :  { %728 = vpow2.f32 %v373_v30  ;;  %v338_v32 = vpop.f32.mrf.mxu2  ;;  %v352_v33 = vpop.f32.mrf.mxu3 }
 0x1a5   :  { %730 = vpow2.f32 %v375_v31  ;;  %v1022_v34 = vadd.f32 %v338_v32, %v129_v28  ;;  %v1024_v35 = vadd.f32 %v352_v33, %v130_v29  ;;  %v312_v36 = vpop.f32.mrf.mxu0  ;;  %v326_v37 = vpop.f32.mrf.mxu1 }
 0x1a6   :  { %v1026_v38 = vadd.f32 %v312_v36, %v127_v21  ;;  %v1028_v39 = vadd.f32 %v326_v37, %v128_v22 }
 0x1a7   :  { %v671_v40 = vmul.f32 -1.702, %v1022_v34  ;;  %v672_v41 = vmul.f32 -1.702, %v1024_v35 }
 0x1a8   :  { %v673_v42 = vmul.f32 -1.702, %v1026_v38  ;;  %v674_v43 = vmul.f32 -1.702, %v1028_v39 }
 0x1a9   :  { %v377_v44 = vmul.f32 1.442695, %v671_v40  ;;  %v379_v45 = vmul.f32 1.442695, %v672_v41 }
 0x1aa   :  { %v729_v46 = vpop.eup %728  ;;  %v381_v49 = vmul.f32 1.442695, %v673_v42  ;;  %v383_v51 = vmul.f32 1.442695, %v674_v43 }
 0x1ab   :  { %v731_v47 = vpop.eup %730  ;;  %v389_v48 = vadd.f32 1.0, %v729_v46  ;;  %732 = vpow2.f32 %v377_v44 }
 0x1ac   :  { %v390_v50 = vadd.f32 1.0, %v731_v47  ;;  %734 = vpow2.f32 %v379_v45  ;;  %v340_v9 = vpop.f32.mrf.mxu2  ;;  %v354_v53 = vpop.f32.mrf.mxu3 }
 0x1ad   :  { %736 = vrcp.f32 %v389_v48  ;;  %v1034_v52 = vadd.f32 %v340_v9, %v129_v28  ;;  %v406_v57 = vand.u32 2147483647, %v389_v48  ;;  %v408_v60 = vand.u32 2147483648, %v389_v48 }
 0x1ae   :  { %738 = vrcp.f32 %v390_v50  ;;  %v421_v61 = vand.u32 2147483647, %v390_v50  ;;  %v1041_v63 = vadd.f32 %v354_v53, %v130_v29  ;;  %vm402_vm7 = vweird.f32 %v389_v48 }
 0x1af   :  { %740 = vpow2.f32 %v381_v49  ;;  %v675_v55 = vmul.f32 -1.702, %v1034_v52  ;;  %v423_v4 = vand.u32 2147483648, %v390_v50  ;;  %vm1044_vm8 = vcmp.eq.f32.partialorder %v406_v57, 8.507059e+37 }
 0x1b0   :  { %742 = vpow2.f32 %v383_v51  ;;  %vm417_vm9 = vweird.f32 %v390_v50  ;;  %v409_v10 = vor.u32 1.1754944e-38, %v408_v60  ;;  %vm1049_vm10 = vcmp.eq.f32.partialorder %v421_v61, 8.507059e+37 }
 0x1b1   :  { %v733_v54 = vpop.eup %732  ;;  %v385_v5 = vmul.f32 1.442695, %v675_v55  ;;  %v676_v14 = vmul.f32 -1.702, %v1041_v63  ;;  %v424_v20 = vor.u32 1.1754944e-38, %v423_v4 }
 0x1b2   :  { %v735_v56 = vpop.eup %734  ;;  %v1037_v58 = vadd.f32 1.0, %v733_v54 }
 0x1b3   :  { %v737_v59 = vpop.eup %736  ;;  %v1039_v62 = vadd.f32 1.0, %v735_v56  ;;  %v387_v30 = vmul.f32 1.442695, %v676_v14 }
 0x1b4   :  { %v739_v0 = vpop.eup %738  ;;  %v398_v1 = vmul.f32 %v737_v59, %v389_v48  ;;  %744 = vrcp.f32 %v1037_v58  ;;  %vm403_vm11 = vweird.f32 %v737_v59  ;;  %vm432_vm13 = vweird.f32 %v1037_v58 }
 0x1b5   :  { %v741_v2 = vpop.eup %740  ;;  %v413_v3 = vmul.f32 %v739_v0, %v390_v50  ;;  %746 = vrcp.f32 %v1039_v62  ;;  %vm418_vm12 = vweird.f32 %v739_v0  ;;  %v436_v22 = vand.u32 2147483647, %v1037_v58  ;;  %vm404_vm14 = vmor %vm402_vm7, %vm403_vm11 }
 0x1b6   :  { %v743_v6 = vpop.eup %742  ;;  %v399_v7 = vsub.f32 1.0, %v398_v1  ;;  %v1054_v17 = vadd.f32 1.0, %v741_v2  ;;  %748 = vpow2.f32 %v385_v5  ;;  %v438_v26 = vand.u32 2147483648, %v1037_v58  ;;  %vm419_vm0 = vmor %vm417_vm9, %vm418_vm12 }
 0x1b7   :  { %v414_v11 = vsub.f32 1.0, %v413_v3  ;;  %v1056_v18 = vadd.f32 1.0, %v743_v6  ;;  %vm447_vm15 = vweird.f32 %v1039_v62  ;;  %v451_v29 = vand.u32 2147483647, %v1039_v62 }
 0x1b8   :  { %v400_v15 = vmul.f32 %v737_v59, %v399_v7  ;;  %750 = vrcp.f32 %v1054_v17  ;;  %vm1075_vm1 = vcmp.eq.f32.partialorder %v436_v22, 8.507059e+37  ;;  %v453_v42 = vand.u32 2147483648, %v1039_v62 }
 0x1b9   :  { %v415_v19 = vmul.f32 %v739_v0, %v414_v11  ;;  %752 = vrcp.f32 %v1056_v18  ;;  %v439_v48 = vor.u32 1.1754944e-38, %v438_v26  ;;  %vm1086_vm5 = vcmp.eq.f32.partialorder %v451_v29, 8.507059e+37 }
 0x1ba   :  { %v745_v12 = vpop.eup %744  ;;  %v401_v21 = vadd.f32 %v737_v59, %v400_v15  ;;  %754 = vpow2.f32 %v387_v30  ;;  %v454_v54 = vor.u32 1.1754944e-38, %v453_v42  ;;  %vm462_vm6 = vweird.f32 %v1054_v17 }
 0x1bb   :  { %v416_v23 = vadd.f32 %v739_v0, %v415_v19  ;;  %v428_v24 = vmul.f32 %v745_v12, %v1037_v58  ;;  %v747_v27 = vpop.eup %746  ;;  %vm433_vm2 = vweird.f32 %v745_v12  ;;  %v466_v60 = vand.u32 2147483647, %v1054_v17 }
 0x1bc   :  { %v405_v28 = vsel %vm404_vm14, %v737_v59, %v401_v21  ;;  %v443_v36 = vmul.f32 %v747_v27, %v1039_v62  ;;  %v749_v43 = vpop.eup %748  ;;  %vm448_vm3 = vweird.f32 %v747_v27  ;;  %vm434_vm4 = vmor %vm432_vm13, %vm433_vm2  ;;  %v468_v61 = vand.u32 2147483648, %v1054_v17 }
 0x1bd   :  { %v410_v31 = vsel %vm1044_vm8, %v409_v10, %v405_v28  ;;  %v420_v32 = vsel %vm419_vm0, %v739_v0, %v416_v23  ;;  %v429_v33 = vsub.f32 1.0, %v428_v24  ;;  %v1081_v49 = vadd.f32 1.0, %v749_v43  ;;  %vm449_vm7 = vmor %vm447_vm15, %vm448_vm3 }
 0x1be   :  { %v517_v37 = vmul.f32 %v410_v31, %v1016_v25  ;;  %v425_v40 = vsel %vm1049_vm10, %v424_v20, %v420_v32  ;;  %v444_v46 = vsub.f32 1.0, %v443_v36  ;;  %v751_v47 = vpop.eup %750  ;;  %v481_v6 = vand.u32 2147483647, %v1056_v18 }
 0x1bf   :  { %v518_v44 = vmul.f32 %v425_v40, %v1018_v16  ;;  %v430_v45 = vmul.f32 %v745_v12, %v429_v33  ;;  %v458_v9 = vmul.f32 %v751_v47, %v1054_v17  ;;  %v753_v53 = vpop.eup %752  ;;  %756 = vrcp.f32 %v1081_v49 }
 0x1c0   :  { %v445_v51 = vmul.f32 %v747_v27, %v444_v46  ;;  %v473_v59 = vmul.f32 %v753_v53, %v1056_v18  ;;  %vm463_vm8 = vweird.f32 %v751_v47  ;;  %v755_v4 = vpop.eup %754  ;;  %vm478_vm9 = vweird.f32 %v753_v53 }
 0x1c1   :  { %v525_v25 = vpack.c.bf16 %v518_v44, %v517_v37  ;;  %v431_v50 = vadd.f32 %v745_v12, %v430_v45  ;;  %v459_v57 = vsub.f32 1.0, %v458_v9  ;;  %v483_v62 = vand.u32 2147483648, %v1056_v18  ;;  %vm464_vm10 = vmor %vm462_vm6, %vm463_vm8 }
 0x1c2   :  { %v446_v56 = vadd.f32 %v747_v27, %v445_v51  ;;  %v474_v3 = vsub.f32 1.0, %v473_v59  ;;  %v396_v11 = vadd.f32 1.0, %v755_v4  ;;  %vm467_vm11 = vcmp.eq.f32.partialorder %v466_v60, 8.507059e+37 }
 0x1c3   :  { %529 = vst [vmem:[%s1136_s5] sm:$0xff] %v525_v25  ;;  %v435_v55 = vsel %vm434_vm4, %v745_v12, %v431_v50  ;;  %v460_v2 = vmul.f32 %v751_v47, %v459_v57  ;;  %vm477_vm12 = vweird.f32 %v1056_v18  ;;  %vm482_vm14 = vcmp.eq.f32.partialorder %v481_v6, 8.507059e+37 }
 0x1c4   :  { %v440_v58 = vsel %vm1075_vm1, %v439_v48, %v435_v55  ;;  %v450_v1 = vsel %vm449_vm7, %v747_v27, %v446_v56  ;;  %v475_v10 = vmul.f32 %v753_v53, %v474_v3  ;;  %vm479_vm13 = vmor %vm477_vm12, %vm478_vm9  ;;  %758 = vrcp.f32 %v396_v11 }
 0x1c5   :  { %v519_v0 = vmul.f32 %v440_v58, %v1022_v34  ;;  %v455_v5 = vsel %vm1086_vm5, %v454_v54, %v450_v1  ;;  %v461_v8 = vadd.f32 %v751_v47, %v460_v2  ;;  %v757_v13 = vpop.eup %756  ;;  %v469_v34 = vor.u32 1.1754944e-38, %v468_v61 }
 0x1c6   :  { %v520_v7 = vmul.f32 %v455_v5, %v1024_v35  ;;  %v476_v19 = vadd.f32 %v753_v53, %v475_v10  ;;  %v488_v20 = vmul.f32 %v757_v13, %v1081_v49  ;;  %v484_v35 = vor.u32 1.1754944e-38, %v483_v62 }
 0x1c7   :  { %v465_v15 = vsel %vm464_vm10, %v751_v47, %v461_v8  ;;  %vm493_vm15 = vweird.f32 %v757_v13  ;;  %v498_v29 = vand.u32 2147483648, %v1081_v49  ;;  %vm492_vm0 = vweird.f32 %v1081_v49 }
 0x1c8   :  { %v526_v14 = vpack.c.bf16 %v520_v7, %v519_v0  ;;  %v470_v12 = vsel %vm467_vm11, %v469_v34, %v465_v15  ;;  %v480_v21 = vsel %vm479_vm13, %v753_v53, %v476_v19  ;;  %v489_v22 = vsub.f32 1.0, %v488_v20  ;;  %vm494_vm1 = vmor %vm492_vm0, %vm493_vm15 }
 0x1c9   :  { %v521_v17 = vmul.f32 %v470_v12, %v1026_v38  ;;  %v485_v18 = vsel %vm482_vm14, %v484_v35, %v480_v21  ;;  %v496_v38 = vand.u32 2147483647, %v1081_v49  ;;  %v513_v33 = vand.u32 2147483648, %v396_v11 }
 0x1ca   :  { %530 = vst [vmem:[%s1136_s5 + $0x8] sm:$0xff] %v526_v14  ;;  %v522_v23 = vmul.f32 %v485_v18, %v1028_v39  ;;  %v490_v24 = vmul.f32 %v757_v13, %v489_v22  ;;  %v759_v28 = vpop.eup %758  ;;  %v499_v39 = vor.u32 1.1754944e-38, %v498_v29  ;;  %v511_v37 = vand.u32 2147483647, %v396_v11 }
 0x1cb   :  { %v503_v30 = vmul.f32 %v759_v28, %v396_v11  ;;  %vm497_vm2 = vcmp.eq.f32.partialorder %v496_v38, 8.507059e+37  ;;  %vm508_vm3 = vweird.f32 %v759_v28  ;;  %vm507_vm4 = vweird.f32 %v396_v11 }
 0x1cc   :  { %v527_v26 = vpack.c.bf16 %v522_v23, %v521_v17  ;;  %v491_v27 = vadd.f32 %v757_v13, %v490_v24  ;;  %vm509_vm5 = vmor %vm507_vm4, %vm508_vm3  ;;  %v514_v42 = vor.u32 1.1754944e-38, %v513_v33  ;;  %vm512_vm6 = vcmp.eq.f32.partialorder %v511_v37, 8.507059e+37 }
 0x1cd   :  { %v504_v32 = vsub.f32 1.0, %v503_v30 }
 0x1ce   :  { %531 = vst [vmem:[%s1136_s5 + $0x10] sm:$0xff] %v527_v26  ;;  %v495_v31 = vsel %vm494_vm1, %v757_v13, %v491_v27 }
 0x1cf   :  { %v505_v36 = vmul.f32 %v759_v28, %v504_v32  ;;  %v500_v40 = vsel %vm497_vm2, %v499_v39, %v495_v31 }
 0x1d0   :  { %v523_v43 = vmul.f32 %v500_v40, %v1034_v52 }
 0x1d1   :  { %v506_v41 = vadd.f32 %v759_v28, %v505_v36 }
 0x1d3   :  { %v510_v44 = vsel %vm509_vm5, %v759_v28, %v506_v41 }
 0x1d4   :  { %v515_v45 = vsel %vm512_vm6, %v514_v42, %v510_v44 }
 0x1d5   :  { %v524_v46 = vmul.f32 %v515_v45, %v1041_v63 }
 0x1d7   :  { %v528_v47 = vpack.c.bf16 %v524_v46, %v523_v43 }
 0x1d9   :  { %532 = vst [vmem:[%s1136_s5 + $0x18] sm:$0xff] %v528_v47 }

// kernel: clip_vision_tower_forward.18
= control target key start
LH: loop header
LB: loop body
LE: loop exit
PB: predicated region body
PF: predicated region fallthrough
CT: control target
= control target key end

     0   :  { %s715_s1 = inlined_call_operand.vmem [shape: bf16[512,128], index: 1, kind: input, shape index: {}]   ;;  %s716_s2 = inlined_call_operand.vmem [shape: f32[1,128], index: 2, kind: input, shape index: {}]   ;;  %s717_s0 = inlined_call_operand.vmem [shape: bf16[16,512], index: 0, kind: input, shape index: {}]   ;;  %s718_s3 = inlined_call_operand.vmem [shape: bf16[16,128], index: 3, kind: input, shape index: {}]   ;;  %s719_s4 = inlined_call_operand.vmem [shape: bf16[16,128], index: 4, kind: output, shape index: {}]  }
   0x1   :  { %v526_v0 = vld [vmem:[%s715_s1 + $0x38] sm:$0xff]  ;;  %v525_v4 = vld [vmem:[%s715_s1 + $0x30] sm:$0xff]  ;;  %v524_v8 = vld [vmem:[%s715_s1 + $0x28] sm:$0xff] }
   0x2   :  { %v534_v1 = vld [vmem:[%s715_s1 + $0x78] sm:$0xff]  ;;  %301 = vmatpush.bf16.msra.mxu0 %v526_v0  ;;  %v533_v5 = vld [vmem:[%s715_s1 + $0x70] sm:$0xff]  ;;  %v532_v9 = vld [vmem:[%s715_s1 + $0x68] sm:$0xff] }
   0x3   :  { %v542_v2 = vld [vmem:[%s715_s1 + $0xb8] sm:$0xff]  ;;  %315 = vmatpush.bf16.msra.mxu1 %v534_v1  ;;  %v541_v6 = vld [vmem:[%s715_s1 + $0xb0] sm:$0xff]  ;;  %v540_v10 = vld [vmem:[%s715_s1 + $0xa8] sm:$0xff] }
   0x4   :  { %v550_v3 = vld [vmem:[%s715_s1 + $0xf8] sm:$0xff]  ;;  %329 = vmatpush.bf16.msra.mxu2 %v542_v2  ;;  %v549_v7 = vld [vmem:[%s715_s1 + $0xf0] sm:$0xff]  ;;  %v548_v11 = vld [vmem:[%s715_s1 + $0xe8] sm:$0xff] }
   0x5   :  { %343 = vmatpush.bf16.msra.mxu3 %v550_v3  ;;  %v523_v12 = vld [vmem:[%s715_s1 + $0x20] sm:$0xff]  ;;  %v522_v16 = vld [vmem:[%s715_s1 + $0x18] sm:$0xff]  ;;  %v521_v20 = vld [vmem:[%s715_s1 + $0x10] sm:$0xff] }
   0x6   :  { %302 = vmatpush.bf16.msra.mxu0 %v525_v4  ;;  %v531_v13 = vld [vmem:[%s715_s1 + $0x60] sm:$0xff]  ;;  %v530_v17 = vld [vmem:[%s715_s1 + $0x58] sm:$0xff]  ;;  %v529_v21 = vld [vmem:[%s715_s1 + $0x50] sm:$0xff] }
   0x7   :  { %316 = vmatpush.bf16.msra.mxu1 %v533_v5  ;;  %v539_v14 = vld [vmem:[%s715_s1 + $0xa0] sm:$0xff]  ;;  %v538_v18 = vld [vmem:[%s715_s1 + $0x98] sm:$0xff]  ;;  %v537_v22 = vld [vmem:[%s715_s1 + $0x90] sm:$0xff] }
   0x8   :  { %330 = vmatpush.bf16.msra.mxu2 %v541_v6  ;;  %v547_v15 = vld [vmem:[%s715_s1 + $0xe0] sm:$0xff]  ;;  %v546_v19 = vld [vmem:[%s715_s1 + $0xd8] sm:$0xff]  ;;  %v545_v23 = vld [vmem:[%s715_s1 + $0xd0] sm:$0xff] }
   0x9   :  { %344 = vmatpush.bf16.msra.mxu3 %v549_v7  ;;  %v520_v24 = vld [vmem:[%s715_s1 + $0x8] sm:$0xff]  ;;  %v519_v28 = vld [vmem:[%s715_s1] sm:$0xff]  ;;  %v517_v33 = vld [vmem:[%s717_s0 + $0xc] sm:$0xf0] }
   0xa   :  { %303 = vmatpush.bf16.msra.mxu0 %v524_v8  ;;  %v528_v25 = vld [vmem:[%s715_s1 + $0x48] sm:$0xff]  ;;  %v527_v29 = vld [vmem:[%s715_s1 + $0x40] sm:$0xff]  ;;  %v375_v35 = vld [vmem:[%s717_s0 + $0x10] sm:$0xf0] }
   0xb   :  { %317 = vmatpush.bf16.msra.mxu1 %v532_v9  ;;  %v536_v26 = vld [vmem:[%s715_s1 + $0x88] sm:$0xff]  ;;  %v535_v30 = vld [vmem:[%s715_s1 + $0x80] sm:$0xff]  ;;  %v518_v37 = vld [vmem:[%s717_s0 + $0x14] sm:$0xf0] }
   0xc   :  { %331 = vmatpush.bf16.msra.mxu2 %v540_v10  ;;  %v544_v27 = vld [vmem:[%s715_s1 + $0xc8] sm:$0xff]  ;;  %v543_v31 = vld [vmem:[%s715_s1 + $0xc0] sm:$0xff]  ;;  %v383_v39 = vld [vmem:[%s717_s0 + $0x18] sm:$0xf0] }
   0xd   :  { %345 = vmatpush.bf16.msra.mxu3 %v548_v11  ;;  %v373_v32 = vld [vmem:[%s717_s0] sm:$0xf]  ;;  %v515_v34 = vld [vmem:[%s717_s0 + $0x4] sm:$0xf]  ;;  %v381_v36 = vld [vmem:[%s717_s0 + $0x8] sm:$0xf] }
   0xe   :  { %304 = vmatpush.bf16.msra.mxu0 %v523_v12  ;;  %v516_v38 = vld [vmem:[%s717_s0 + $0xc] sm:$0xf]  ;;  %v374_v40 = vor.u32 %v517_v33, %v373_v32  ;;  %v378_v41 = vor.u32 %v515_v34, %v375_v35  ;;  %v382_v42 = vor.u32 %v518_v37, %v381_v36  ;;  %v560_v44 = vld [vmem:[%s716_s2] ss:$0 sm:$0xff] }
   0xf   :  { %318 = vmatpush.bf16.msra.mxu1 %v531_v13  ;;  %v386_v43 = vor.u32 %v516_v38, %v383_v39  ;;  %v552_v54 = vld [vmem:[%s718_s3] sm:$0xff]  }
  0x10   :  { %332 = vmatpush.bf16.msra.mxu2 %v539_v14  ;;  %v553_v59 = vunpack.c.l.bf16 %v552_v54  ;;  %v554_v61 = vunpack.c.h.bf16 %v552_v54 }
  0x11   :  { %346 = vmatpush.bf16.msra.mxu3 %v547_v15 }
  0x12   :  { %305 = vmatpush.bf16.msra.mxu0 %v522_v16 }
  0x13   :  { %319 = vmatpush.bf16.msra.mxu1 %v530_v17 }
  0x14   :  { %333 = vmatpush.bf16.msra.mxu2 %v538_v18 }
  0x15   :  { %347 = vmatpush.bf16.msra.mxu3 %v546_v19 }
  0x16   :  { %306 = vmatpush.bf16.msra.mxu0 %v521_v20 }
  0x17   :  { %320 = vmatpush.bf16.msra.mxu1 %v529_v21 }
  0x18   :  { %334 = vmatpush.bf16.msra.mxu2 %v537_v22 }
  0x19   :  { %348 = vmatpush.bf16.msra.mxu3 %v545_v23 }
  0x1a   :  { %307 = vmatpush.bf16.msra.mxu0 %v520_v24 }
  0x1b   :  { %321 = vmatpush.bf16.msra.mxu1 %v528_v25 }
  0x1c   :  { %335 = vmatpush.bf16.msra.mxu2 %v536_v26 }
  0x1d   :  { %349 = vmatpush.bf16.msra.mxu3 %v544_v27 }
  0x1e   :  { %308 = vmatpush.bf16.msra.mxu0 %v519_v28 }
  0x1f   :  { %322 = vmatpush.bf16.msra.mxu1 %v527_v29 }
  0x20   :  { %336 = vmatpush.bf16.msra.mxu2 %v535_v30 }
  0x21   :  { %350 = vmatpush.bf16.msra.mxu3 %v543_v31  ;;  %309 = vmatmul.bf16.vlgmr.msra.gmra.mxu0 %v374_v40 }
  0x22   :  { %323 = vmatmul.bf16.vlgmr.msra.gmra.mxu1 %v378_v41 }
  0x23   :  { %337 = vmatmul.bf16.vlgmr.msra.gmra.mxu2 %v382_v42 }
  0x24   :  { %351 = vmatmul.bf16.vlgmr.msra.gmra.mxu3 %v386_v43 }
  0x9e   :  { %v310_v45 = vpop.f32.mrf.mxu0 }
  0x9f   :  { %v324_v46 = vpop.f32.mrf.mxu1  ;;  %v311_v47 = vadd.f32 %v560_v44, %v310_v45 }
  0xa1   :  { %v325_v50 = vadd.f32 %v324_v46, %v311_v47 }
  0xa6   :  { %v338_v48 = vpop.f32.mrf.mxu2  ;;  %v312_v51 = vpop.f32.mrf.mxu0 }
  0xa7   :  { %v352_v49 = vpop.f32.mrf.mxu3  ;;  %v313_v52 = vadd.f32 %v560_v44, %v312_v51  ;;  %v339_v53 = vadd.f32 %v338_v48, %v325_v50  ;;  %v326_v55 = vpop.f32.mrf.mxu1 }
  0xa9   :  { %v327_v56 = vadd.f32 %v326_v55, %v313_v52  ;;  %v353_v58 = vadd.f32 %v352_v49, %v339_v53 }
  0xab   :  { %v361_v0 = vadd.f32 %v553_v59, %v353_v58 }
  0xae   :  { %v340_v57 = vpop.f32.mrf.mxu2 }
  0xaf   :  { %v341_v60 = vadd.f32 %v340_v57, %v327_v56  ;;  %v354_v62 = vpop.f32.mrf.mxu3 }
  0xb1   :  { %v355_v63 = vadd.f32 %v354_v62, %v341_v60 }
  0xb3   :  { %v362_v1 = vadd.f32 %v554_v61, %v355_v63 }
  0xb5   :  { %v558_v2 = vpack.c.bf16 %v362_v1, %v361_v0 }
  0xb7   :  { %559 = vst [vmem:[%s719_s4] sm:$0xff] %v558_v2  }

// kernel: clip_vision_tower_forward.21
= control target key start
LH: loop header
LB: loop body
LE: loop exit
PB: predicated region body
PF: predicated region fallthrough
CT: control target
= control target key end

     0   :  { %9 = vsyncpa [#allocation3], 0  ;;  %s222_s18 = smov [#allocation2]   ;;  %s223_s20 = smov 64   ;;  %s265_s0 = inlined_call_operand.vmem [shape: bf16[16,128], index: 0, kind: input, shape index: {}]   ;;  %s266_s1 = inlined_call_operand.hbm [shape: bf16[128,128], index: 1, kind: input, shape index: {}]   ;;  %s267_s2 = inlined_call_operand.vmem [shape: f32[1,128], index: 2, kind: input, shape index: {}]   ;;  %s268_s3 = inlined_call_operand.vmem [shape: bf16[16,128], index: 3, kind: input, shape index: {}]   ;;  %s269_s4 = inlined_call_operand.vmem [shape: bf16[16,128], index: 4, kind: output, shape index: {}]  }
   0x1   :  { %s16_s17 = sshll.u32 %s266_s1, 4  ;;  %s18_s19 = sshll.u32 %s222_s18, 4  ;;  %s17_s17 = int_to_ptr.hbm [resolvable:$true] %s16_s17  ;;  %s19_s19 = int_to_ptr.vmem [resolvable:$true] %s18_s19 }
   0x2   :  { %s224_s21 = smov 4  }
   0x3   :  { %24 = dma.hbm_to_vmem [thread:$0]  %s17_s17, 1024, %s19_s19, [#allocation3], %s223_s20, %s223_s20, %s224_s21  }
   0x4   :  { %220 = dma.done.wait [#allocation3], 1024  }
   0x5   :  { %221 = vsyncadd [#allocation3], 4294966272  ;;  %v182_v0 = vld [vmem:[#allocation2 + $0x38] sm:$0xff]  ;;  %v181_v1 = vld [vmem:[#allocation2 + $0x30] sm:$0xff] }
   0x6   :  { %109 = vmatpush.bf16.msra.mxu0 %v182_v0  ;;  %v180_v2 = vld [vmem:[#allocation2 + $0x28] sm:$0xff]  ;;  %v179_v3 = vld [vmem:[#allocation2 + $0x20] sm:$0xff]  ;;  %v178_v4 = vld [vmem:[#allocation2 + $0x18] sm:$0xff] }
   0x7   :  { %v177_v5 = vld [vmem:[#allocation2 + $0x10] sm:$0xff]  ;;  %v176_v6 = vld [vmem:[#allocation2 + $0x8] sm:$0xff]  ;;  %v175_v7 = vld [vmem:[#allocation2] sm:$0xff] }
   0x8   :  { %v174_v8 = vld [vmem:[%s265_s0] sm:$0xff] }
   0x9   :  { %v195_v10 = vld [vmem:[%s267_s2] ss:$0 sm:$0xff] }
   0xa   :  { %110 = vmatpush.bf16.msra.mxu0 %v181_v1  ;;  %v184_v11 = vld [vmem:[%s268_s3] sm:$0xff]  }
   0xb   :  { %v185_v13 = vunpack.c.l.bf16 %v184_v11  ;;  %v186_v14 = vunpack.c.h.bf16 %v184_v11 }
   0xe   :  { %111 = vmatpush.bf16.msra.mxu0 %v180_v2 }
  0x12   :  { %112 = vmatpush.bf16.msra.mxu0 %v179_v3 }
  0x16   :  { %113 = vmatpush.bf16.msra.mxu0 %v178_v4 }
  0x1a   :  { %114 = vmatpush.bf16.msra.mxu0 %v177_v5 }
  0x1e   :  { %115 = vmatpush.bf16.msra.mxu0 %v176_v6 }
  0x22   :  { %116 = vmatpush.bf16.msra.mxu0 %v175_v7 }
  0x25   :  { %117 = vmatmul.bf16.vlgmr.msra.gmra.mxu0 %v174_v8 }
  0xa2   :  { %v118_v9 = vpop.f32.mrf.mxu0 }
  0xa3   :  { %v119_v12 = vadd.f32 %v195_v10, %v118_v9 }
  0xa5   :  { %v127_v17 = vadd.f32 %v185_v13, %v119_v12 }
  0xaa   :  { %v120_v15 = vpop.f32.mrf.mxu0 }
  0xab   :  { %v121_v16 = vadd.f32 %v195_v10, %v120_v15 }
  0xad   :  { %v128_v18 = vadd.f32 %v186_v14, %v121_v16 }
  0xaf   :  { %v190_v19 = vpack.c.bf16 %v128_v18, %v127_v17 }
  0xb1   :  { %191 = vst [vmem:[%s269_s4] sm:$0xff] %v190_v19  }
  0xb2   :  { %137 = vsyncpa [#allocation3], 1 }

// kernel: clip_vision_tower_forward.23
= control target key start
LH: loop header
LB: loop body
LE: loop exit
PB: predicated region body
PF: predicated region fallthrough
CT: control target
= control target key end

     0   :  { %9 = vsyncpa [#allocation3], 0  ;;  %s607_s18 = smov [#allocation2]   ;;  %s608_s20 = smov 64   ;;  %s671_s0 = inlined_call_operand.vmem [shape: bf16[16,512], index: 0, kind: input, shape index: {}]   ;;  %s672_s1 = inlined_call_operand.hbm [shape: bf16[512,128], index: 1, kind: input, shape index: {}]   ;;  %s673_s2 = inlined_call_operand.vmem [shape: f32[1,128], index: 2, kind: input, shape index: {}]   ;;  %s674_s3 = inlined_call_operand.vmem [shape: bf16[16,128], index: 3, kind: input, shape index: {}]   ;;  %s675_s4 = inlined_call_operand.vmem [shape: bf16[16,128], index: 4, kind: output, shape index: {}]  }
   0x1   :  { %s16_s17 = sshll.u32 %s672_s1, 4  ;;  %s18_s19 = sshll.u32 %s607_s18, 4  ;;  %s17_s17 = int_to_ptr.hbm [resolvable:$true] %s16_s17  ;;  %s19_s19 = int_to_ptr.vmem [resolvable:$true] %s18_s19 }
   0x2   :  { %s609_s21 = smov 4  }
   0x3   :  { %24 = dma.hbm_to_vmem [thread:$0]  %s17_s17, 4096, %s19_s19, [#allocation3], %s608_s20, %s608_s20, %s609_s21  }
   0x4   :  { %605 = dma.done.wait [#allocation3], 4096  }
   0x5   :  { %606 = vsyncadd [#allocation3], 4294963200  ;;  %v543_v0 = vld [vmem:[#allocation2 + $0x38] sm:$0xff]  ;;  %v542_v4 = vld [vmem:[#allocation2 + $0x30] sm:$0xff] }
   0x6   :  { %v551_v1 = vld [vmem:[#allocation2 + $0x78] sm:$0xff]  ;;  %317 = vmatpush.bf16.msra.mxu0 %v543_v0  ;;  %v550_v5 = vld [vmem:[#allocation2 + $0x70] sm:$0xff]  ;;  %v541_v8 = vld [vmem:[#allocation2 + $0x28] sm:$0xff] }
   0x7   :  { %v559_v2 = vld [vmem:[#allocation2 + $0xb8] sm:$0xff]  ;;  %331 = vmatpush.bf16.msra.mxu1 %v551_v1  ;;  %v558_v6 = vld [vmem:[#allocation2 + $0xb0] sm:$0xff]  ;;  %v549_v9 = vld [vmem:[#allocation2 + $0x68] sm:$0xff] }
   0x8   :  { %v567_v3 = vld [vmem:[#allocation2 + $0xf8] sm:$0xff]  ;;  %345 = vmatpush.bf16.msra.mxu2 %v559_v2  ;;  %v566_v7 = vld [vmem:[#allocation2 + $0xf0] sm:$0xff]  ;;  %v557_v10 = vld [vmem:[#allocation2 + $0xa8] sm:$0xff] }
   0x9   :  { %359 = vmatpush.bf16.msra.mxu3 %v567_v3  ;;  %v565_v11 = vld [vmem:[#allocation2 + $0xe8] sm:$0xff]  ;;  %v540_v12 = vld [vmem:[#allocation2 + $0x20] sm:$0xff]  ;;  %v539_v16 = vld [vmem:[#allocation2 + $0x18] sm:$0xff] }
   0xa   :  { %318 = vmatpush.bf16.msra.mxu0 %v542_v4  ;;  %v548_v13 = vld [vmem:[#allocation2 + $0x60] sm:$0xff]  ;;  %v547_v17 = vld [vmem:[#allocation2 + $0x58] sm:$0xff]  ;;  %v538_v20 = vld [vmem:[#allocation2 + $0x10] sm:$0xff] }
   0xb   :  { %332 = vmatpush.bf16.msra.mxu1 %v550_v5  ;;  %v556_v14 = vld [vmem:[#allocation2 + $0xa0] sm:$0xff]  ;;  %v555_v18 = vld [vmem:[#allocation2 + $0x98] sm:$0xff]  ;;  %v546_v21 = vld [vmem:[#allocation2 + $0x50] sm:$0xff] }
   0xc   :  { %346 = vmatpush.bf16.msra.mxu2 %v558_v6  ;;  %v564_v15 = vld [vmem:[#allocation2 + $0xe0] sm:$0xff]  ;;  %v563_v19 = vld [vmem:[#allocation2 + $0xd8] sm:$0xff]  ;;  %v554_v22 = vld [vmem:[#allocation2 + $0x90] sm:$0xff] }
   0xd   :  { %360 = vmatpush.bf16.msra.mxu3 %v566_v7  ;;  %v562_v23 = vld [vmem:[#allocation2 + $0xd0] sm:$0xff]  ;;  %v537_v24 = vld [vmem:[#allocation2 + $0x8] sm:$0xff]  ;;  %v536_v28 = vld [vmem:[#allocation2] sm:$0xff] }
   0xe   :  { %319 = vmatpush.bf16.msra.mxu0 %v541_v8  ;;  %v545_v25 = vld [vmem:[#allocation2 + $0x48] sm:$0xff]  ;;  %v544_v29 = vld [vmem:[#allocation2 + $0x40] sm:$0xff]  ;;  %v534_v33 = vld [vmem:[%s671_s0 + $0xc] sm:$0xf0] }
   0xf   :  { %333 = vmatpush.bf16.msra.mxu1 %v549_v9  ;;  %v553_v26 = vld [vmem:[#allocation2 + $0x88] sm:$0xff]  ;;  %v552_v30 = vld [vmem:[#allocation2 + $0x80] sm:$0xff]  ;;  %v392_v35 = vld [vmem:[%s671_s0 + $0x10] sm:$0xf0] }
  0x10   :  { %347 = vmatpush.bf16.msra.mxu2 %v557_v10  ;;  %v561_v27 = vld [vmem:[#allocation2 + $0xc8] sm:$0xff]  ;;  %v560_v31 = vld [vmem:[#allocation2 + $0xc0] sm:$0xff]  ;;  %v535_v37 = vld [vmem:[%s671_s0 + $0x14] sm:$0xf0] }
  0x11   :  { %361 = vmatpush.bf16.msra.mxu3 %v565_v11  ;;  %v390_v32 = vld [vmem:[%s671_s0] sm:$0xf]  ;;  %v532_v34 = vld [vmem:[%s671_s0 + $0x4] sm:$0xf]  ;;  %v398_v36 = vld [vmem:[%s671_s0 + $0x8] sm:$0xf] }
  0x12   :  { %320 = vmatpush.bf16.msra.mxu0 %v540_v12  ;;  %v533_v38 = vld [vmem:[%s671_s0 + $0xc] sm:$0xf]  ;;  %v400_v39 = vld [vmem:[%s671_s0 + $0x18] sm:$0xf0]  ;;  %v391_v40 = vor.u32 %v534_v33, %v390_v32  ;;  %v395_v41 = vor.u32 %v532_v34, %v392_v35  ;;  %v399_v42 = vor.u32 %v535_v37, %v398_v36  ;;  %v580_v44 = vld [vmem:[%s673_s2] ss:$0 sm:$0xff] }
  0x13   :  { %334 = vmatpush.bf16.msra.mxu1 %v548_v13  ;;  %v403_v43 = vor.u32 %v533_v38, %v400_v39  ;;  %v569_v54 = vld [vmem:[%s674_s3] sm:$0xff]  }
  0x14   :  { %348 = vmatpush.bf16.msra.mxu2 %v556_v14  ;;  %v570_v59 = vunpack.c.l.bf16 %v569_v54  ;;  %v571_v61 = vunpack.c.h.bf16 %v569_v54 }
  0x15   :  { %362 = vmatpush.bf16.msra.mxu3 %v564_v15 }
  0x16   :  { %321 = vmatpush.bf16.msra.mxu0 %v539_v16 }
  0x17   :  { %335 = vmatpush.bf16.msra.mxu1 %v547_v17 }
  0x18   :  { %349 = vmatpush.bf16.msra.mxu2 %v555_v18 }
  0x19   :  { %363 = vmatpush.bf16.msra.mxu3 %v563_v19 }
  0x1a   :  { %322 = vmatpush.bf16.msra.mxu0 %v538_v20 }
  0x1b   :  { %336 = vmatpush.bf16.msra.mxu1 %v546_v21 }
  0x1c   :  { %350 = vmatpush.bf16.msra.mxu2 %v554_v22 }
  0x1d   :  { %364 = vmatpush.bf16.msra.mxu3 %v562_v23 }
  0x1e   :  { %323 = vmatpush.bf16.msra.mxu0 %v537_v24 }
  0x1f   :  { %337 = vmatpush.bf16.msra.mxu1 %v545_v25 }
  0x20   :  { %351 = vmatpush.bf16.msra.mxu2 %v553_v26 }
  0x21   :  { %365 = vmatpush.bf16.msra.mxu3 %v561_v27 }
  0x22   :  { %324 = vmatpush.bf16.msra.mxu0 %v536_v28 }
  0x23   :  { %338 = vmatpush.bf16.msra.mxu1 %v544_v29 }
  0x24   :  { %352 = vmatpush.bf16.msra.mxu2 %v552_v30 }
  0x25   :  { %366 = vmatpush.bf16.msra.mxu3 %v560_v31  ;;  %325 = vmatmul.bf16.vlgmr.msra.gmra.mxu0 %v391_v40 }
  0x26   :  { %339 = vmatmul.bf16.vlgmr.msra.gmra.mxu1 %v395_v41 }
  0x27   :  { %353 = vmatmul.bf16.vlgmr.msra.gmra.mxu2 %v399_v42 }
  0x28   :  { %367 = vmatmul.bf16.vlgmr.msra.gmra.mxu3 %v403_v43 }
  0xa2   :  { %v326_v45 = vpop.f32.mrf.mxu0 }
  0xa3   :  { %v340_v46 = vpop.f32.mrf.mxu1  ;;  %v327_v47 = vadd.f32 %v580_v44, %v326_v45 }
  0xa5   :  { %v341_v50 = vadd.f32 %v340_v46, %v327_v47 }
  0xaa   :  { %v354_v48 = vpop.f32.mrf.mxu2  ;;  %v328_v51 = vpop.f32.mrf.mxu0 }
  0xab   :  { %v368_v49 = vpop.f32.mrf.mxu3  ;;  %v329_v52 = vadd.f32 %v580_v44, %v328_v51  ;;  %v355_v53 = vadd.f32 %v354_v48, %v341_v50  ;;  %v342_v55 = vpop.f32.mrf.mxu1 }
  0xad   :  { %v343_v56 = vadd.f32 %v342_v55, %v329_v52  ;;  %v369_v58 = vadd.f32 %v368_v49, %v355_v53 }
  0xaf   :  { %v377_v0 = vadd.f32 %v570_v59, %v369_v58 }
  0xb2   :  { %v356_v57 = vpop.f32.mrf.mxu2 }
  0xb3   :  { %v357_v60 = vadd.f32 %v356_v57, %v343_v56  ;;  %v370_v62 = vpop.f32.mrf.mxu3 }
  0xb5   :  { %v371_v63 = vadd.f32 %v370_v62, %v357_v60 }
  0xb7   :  { %v378_v1 = vadd.f32 %v571_v61, %v371_v63 }
  0xb9   :  { %v575_v2 = vpack.c.bf16 %v378_v1, %v377_v0 }
  0xbb   :  { %576 = vst [vmem:[%s675_s4] sm:$0xff] %v575_v2  }
  0xbc   :  { %387 = vsyncpa [#allocation3], 1 }

// kernel: clip_vision_tower_forward.22
= control target key start
LH: loop header
LB: loop body
LE: loop exit
PB: predicated region body
PF: predicated region fallthrough
CT: control target
= control target key end

     0   :  { %10 = vsyncpa [#allocation4], 0  ;;  %s806_s21 = smov [#allocation3]   ;;  %s807_s23 = smov 256   ;;  %s991_s0 = inlined_call_operand.vmem [shape: bf16[16,128], index: 0, kind: input, shape index: {}]   ;;  %s992_s1 = inlined_call_operand.hbm [shape: bf16[128,512], index: 1, kind: input, shape index: {}]   ;;  %s993_s2 = inlined_call_operand.vmem [shape: f32[1,512], index: 2, kind: input, shape index: {}]   ;;  %s994_s3 = inlined_call_operand.vmem [shape: f32[1,128], index: 3, kind: input, shape index: {}]   ;;  %s995_s4 = inlined_call_operand.vmem [shape: f32[1,128], index: 4, kind: input, shape index: {}]   ;;  %s996_s5 = inlined_call_operand.vmem [shape: bf16[16,512], index: 5, kind: output, shape index: {}]  }
   0x1   :  { %s17_s20 = sshll.u32 %s992_s1, 4  ;;  %s19_s22 = sshll.u32 %s806_s21, 4  ;;  %s18_s20 = int_to_ptr.hbm [resolvable:$true] %s17_s20  ;;  %s20_s22 = int_to_ptr.vmem [resolvable:$true] %s19_s22 }
   0x2   :  { %s808_s24 = smov 16  }
   0x3   :  { %25 = dma.hbm_to_vmem [thread:$0]  %s18_s20, 4096, %s20_s22, [#allocation4], %s807_s23, %s807_s23, %s808_s24  }
   0x4   :  { %804 = dma.done.wait [#allocation4], 4096  }
   0x5   :  { %805 = vsyncadd [#allocation4], 4294963200  ;;  %v728_v0 = vld [vmem:[%s991_s0] sm:$0xff]   ;;  %v809_v3 = vmov 128.0   ;;  %v672_v18 = vld [vmem:[#allocation3 + $0xe0] sm:$0xf] }
   0x6   :  { %v729_v1 = vunpack.c.l.bf16 %v728_v0  ;;  %v730_v2 = vunpack.c.h.bf16 %v728_v0  ;;  %742 = vrcp.f32 %v809_v3  ;;  %v725_v19 = vld [vmem:[#allocation3 + $0xec] sm:$0xf0]  ;;  %v723_v20 = vld [vmem:[#allocation3 + $0xe4] sm:$0xf]  ;;  %v674_v22 = vld [vmem:[#allocation3 + $0xf0] sm:$0xf0] }
   0x7   :  { %v673_v21 = vor.u32 %v725_v19, %v672_v18  ;;  %v680_v23 = vld [vmem:[#allocation3 + $0xe8] sm:$0xf]  ;;  %v726_v24 = vld [vmem:[#allocation3 + $0xf4] sm:$0xf0]  ;;  %v677_v25 = vor.u32 %v723_v20, %v674_v22  ;;  %v724_v27 = vld [vmem:[#allocation3 + $0xec] sm:$0xf] }
   0x8   :  { %44 = vadd.xlane.f32.xlu0 %v729_v1  ;;  %v681_v26 = vor.u32 %v726_v24, %v680_v23  ;;  %v682_v28 = vld [vmem:[#allocation3 + $0xf8] sm:$0xf0]  ;;  %v656_v30 = vld [vmem:[#allocation3 + $0xc0] sm:$0xf]  ;;  %v721_v31 = vld [vmem:[#allocation3 + $0xcc] sm:$0xf0] }
   0x9   :  { %317 = vmatpush.bf16.msra.mxu0 %v673_v21  ;;  %v685_v29 = vor.u32 %v724_v27, %v682_v28  ;;  %331 = vmatpush.bf16.msra.mxu1 %v677_v25  ;;  %v719_v32 = vld [vmem:[#allocation3 + $0xc4] sm:$0xf]  ;;  %v657_v33 = vor.u32 %v721_v31, %v656_v30  ;;  %v658_v34 = vld [vmem:[#allocation3 + $0xd0] sm:$0xf0]  ;;  %v664_v35 = vld [vmem:[#allocation3 + $0xc8] sm:$0xf] }
   0xa   :  { %345 = vmatpush.bf16.msra.mxu2 %v681_v26  ;;  %v722_v36 = vld [vmem:[#allocation3 + $0xd4] sm:$0xf0]  ;;  %v661_v37 = vor.u32 %v719_v32, %v658_v34  ;;  %v720_v39 = vld [vmem:[#allocation3 + $0xcc] sm:$0xf]  ;;  %v666_v40 = vld [vmem:[#allocation3 + $0xd8] sm:$0xf0] }
   0xb   :  { %359 = vmatpush.bf16.msra.mxu3 %v685_v29  ;;  %v665_v38 = vor.u32 %v722_v36, %v664_v35  ;;  %v669_v41 = vor.u32 %v720_v39, %v666_v40  ;;  %v640_v42 = vld [vmem:[#allocation3 + $0xa0] sm:$0xf]  ;;  %v717_v43 = vld [vmem:[#allocation3 + $0xac] sm:$0xf0]  ;;  %v715_v44 = vld [vmem:[#allocation3 + $0xa4] sm:$0xf] }
   0xc   :  { %v743_v4 = vpop.eup %742  ;;  %v641_v45 = vor.u32 %v717_v43, %v640_v42  ;;  %v642_v46 = vld [vmem:[#allocation3 + $0xb0] sm:$0xf0]  ;;  %v648_v47 = vld [vmem:[#allocation3 + $0xa8] sm:$0xf]  ;;  %v718_v48 = vld [vmem:[#allocation3 + $0xb4] sm:$0xf0] }
   0xd   :  { %v49_v5 = vmul.f32 128.0, %v743_v4  ;;  %vm53_vm0 = vweird.f32 %v743_v4  ;;  %318 = vmatpush.bf16.msra.mxu0 %v657_v33  ;;  %332 = vmatpush.bf16.msra.mxu1 %v661_v37  ;;  %v645_v49 = vor.u32 %v715_v44, %v642_v46  ;;  %v649_v50 = vor.u32 %v718_v48, %v648_v47  ;;  %v716_v51 = vld [vmem:[#allocation3 + $0xac] sm:$0xf]  ;;  %v650_v52 = vld [vmem:[#allocation3 + $0xb8] sm:$0xf0] }
   0xe   :  { %346 = vmatpush.bf16.msra.mxu2 %v665_v38  ;;  %v653_v53 = vor.u32 %v716_v51, %v650_v52  ;;  %v624_v54 = vld [vmem:[#allocation3 + $0x80] sm:$0xf]  ;;  %v713_v55 = vld [vmem:[#allocation3 + $0x8c] sm:$0xf0]  ;;  %v711_v56 = vld [vmem:[#allocation3 + $0x84] sm:$0xf] }
   0xf   :  { %v50_v6 = vsub.f32 1.0, %v49_v5  ;;  %360 = vmatpush.bf16.msra.mxu3 %v669_v41  ;;  %v625_v57 = vor.u32 %v713_v55, %v624_v54  ;;  %v626_v58 = vld [vmem:[#allocation3 + $0x90] sm:$0xf0]  ;;  %v632_v59 = vld [vmem:[#allocation3 + $0x88] sm:$0xf] }
  0x10   :  { %46 = vadd.xlane.f32.xlu0 %v730_v2  ;;  %v714_v60 = vld [vmem:[#allocation3 + $0x94] sm:$0xf0]  ;;  %v629_v61 = vor.u32 %v711_v56, %v626_v58  ;;  %v712_v63 = vld [vmem:[#allocation3 + $0x8c] sm:$0xf]  ;;  %v634_v0 = vld [vmem:[#allocation3 + $0x98] sm:$0xf0] }
  0x11   :  { %v51_v7 = vmul.f32 %v743_v4, %v50_v6  ;;  %319 = vmatpush.bf16.msra.mxu0 %v641_v45  ;;  %333 = vmatpush.bf16.msra.mxu1 %v645_v49  ;;  %v633_v62 = vor.u32 %v714_v60, %v632_v59  ;;  %v709_v3 = vld [vmem:[#allocation3 + $0x6c] sm:$0xf0]  ;;  %v610_v6 = vld [vmem:[#allocation3 + $0x70] sm:$0xf0]  ;;  %v592_v19 = vld [vmem:[#allocation3 + $0x40] sm:$0xf] }
  0x12   :  { %347 = vmatpush.bf16.msra.mxu2 %v649_v50  ;;  %v705_v20 = vld [vmem:[#allocation3 + $0x4c] sm:$0xf0]  ;;  %v703_v21 = vld [vmem:[#allocation3 + $0x44] sm:$0xf]  ;;  %v594_v24 = vld [vmem:[#allocation3 + $0x50] sm:$0xf0] }
  0x13   :  { %v52_v8 = vadd.f32 %v743_v4, %v51_v7  ;;  %361 = vmatpush.bf16.msra.mxu3 %v653_v53  ;;  %v616_v7 = vld [vmem:[#allocation3 + $0x68] sm:$0xf]  ;;  %v593_v23 = vor.u32 %v705_v20, %v592_v19  ;;  %v597_v26 = vor.u32 %v703_v21, %v594_v24  ;;  %v706_v27 = vld [vmem:[#allocation3 + $0x54] sm:$0xf0]  ;;  %v704_v28 = vld [vmem:[#allocation3 + $0x4c] sm:$0xf] }
  0x14   :  { %v600_v25 = vld [vmem:[#allocation3 + $0x48] sm:$0xf]  ;;  %v602_v29 = vld [vmem:[#allocation3 + $0x58] sm:$0xf0]  ;;  %v576_v32 = vld [vmem:[#allocation3 + $0x20] sm:$0xf] }
  0x15   :  { %v846_v9 = vsel %vm53_vm0, %v743_v4, %v52_v8  ;;  %320 = vmatpush.bf16.msra.mxu0 %v625_v57  ;;  %334 = vmatpush.bf16.msra.mxu1 %v629_v61  ;;  %v707_v4 = vld [vmem:[#allocation3 + $0x64] sm:$0xf]  ;;  %v710_v8 = vld [vmem:[#allocation3 + $0x74] sm:$0xf0]  ;;  %v601_v30 = vor.u32 %v706_v27, %v600_v25  ;;  %v605_v31 = vor.u32 %v704_v28, %v602_v29  ;;  %v701_v33 = vld [vmem:[#allocation3 + $0x2c] sm:$0xf0] }
  0x16   :  { %348 = vmatpush.bf16.msra.mxu2 %v633_v62  ;;  %v699_v34 = vld [vmem:[#allocation3 + $0x24] sm:$0xf]  ;;  %v577_v35 = vor.u32 %v701_v33, %v576_v32  ;;  %v578_v36 = vld [vmem:[#allocation3 + $0x30] sm:$0xf0]  ;;  %v584_v37 = vld [vmem:[#allocation3 + $0x28] sm:$0xf] }
  0x17   :  { %v702_v38 = vld [vmem:[#allocation3 + $0x34] sm:$0xf0]  ;;  %v581_v40 = vor.u32 %v699_v34, %v578_v36  ;;  %v700_v42 = vld [vmem:[#allocation3 + $0x2c] sm:$0xf]  ;;  %v586_v43 = vld [vmem:[#allocation3 + $0x38] sm:$0xf0] }
  0x18   :  { %v585_v41 = vor.u32 %v702_v38, %v584_v37  ;;  %v560_v44 = vld [vmem:[#allocation3] sm:$0xf]  ;;  %v589_v46 = vor.u32 %v700_v42, %v586_v43  ;;  %v697_v47 = vld [vmem:[#allocation3 + $0xc] sm:$0xf0]  ;;  %v695_v48 = vld [vmem:[#allocation3 + $0x4] sm:$0xf] }
  0x19   :  { %v562_v49 = vld [vmem:[#allocation3 + $0x10] sm:$0xf0]  ;;  %v561_v50 = vor.u32 %v697_v47, %v560_v44  ;;  %v568_v52 = vld [vmem:[#allocation3 + $0x8] sm:$0xf]  ;;  %v698_v53 = vld [vmem:[#allocation3 + $0x14] sm:$0xf0] }
  0x1a   :  { %v565_v51 = vor.u32 %v695_v48, %v562_v49  ;;  %v696_v54 = vld [vmem:[#allocation3 + $0xc] sm:$0xf]  ;;  %v569_v57 = vor.u32 %v698_v53, %v568_v52  ;;  %v570_v58 = vld [vmem:[#allocation3 + $0x18] sm:$0xf0] }
  0x7b   :  { %v45_v10 = vpop.xlane.xlu0 %44 }
  0x7c   :  { %v55_v11 = vmul.f32 %v846_v9, %v45_v10 }
  0x7e   :  { %v849_v12 = vsub.f32 %v729_v1, %v55_v11  ;;  %v637_v1 = vor.u32 %v712_v63, %v634_v0  ;;  %v613_v11 = vor.u32 %v707_v4, %v610_v6  ;;  %v740_v6 = vld [vmem:[%s994_s3] ss:$0 sm:$0xff] }
  0x80   :  { %v59_v13 = vmul.f32 %v849_v12, %v849_v12  ;;  %362 = vmatpush.bf16.msra.mxu3 %v637_v1  ;;  %335 = vmatpush.bf16.msra.mxu1 %v613_v11  ;;  %v741_v11 = vld [vmem:[%s995_s4] ss:$0 sm:$0xff] }
  0x82   :  { %61 = vadd.xlane.f32.xlu1 %v59_v13  ;;  %v617_v13 = vor.u32 %v710_v8, %v616_v7 }
  0x83   :  { %v47_v14 = vpop.xlane.xlu0 %46 }
  0x84   :  { %v56_v15 = vmul.f32 %v846_v9, %v47_v14  ;;  %v708_v14 = vld [vmem:[#allocation3 + $0x6c] sm:$0xf]  ;;  %349 = vmatpush.bf16.msra.mxu2 %v617_v13  ;;  %336 = vmatpush.bf16.msra.mxu1 %v597_v26 }
  0x86   :  { %v854_v16 = vsub.f32 %v730_v2, %v56_v15  ;;  %v608_v2 = vld [vmem:[#allocation3 + $0x60] sm:$0xf]  ;;  %v618_v15 = vld [vmem:[#allocation3 + $0x78] sm:$0xf0] }
  0x87   :  { %v609_v5 = vor.u32 %v709_v3, %v608_v2  ;;  %v621_v18 = vor.u32 %v708_v14, %v618_v15 }
  0x88   :  { %v60_v17 = vmul.f32 %v854_v16, %v854_v16  ;;  %350 = vmatpush.bf16.msra.mxu2 %v601_v30  ;;  %337 = vmatpush.bf16.msra.mxu1 %v581_v40 }
  0x89   :  { %321 = vmatpush.bf16.msra.mxu0 %v609_v5  ;;  %363 = vmatpush.bf16.msra.mxu3 %v621_v18 }
  0x8a   :  { %63 = vadd.xlane.f32.xlu1 %v60_v17 }
  0x8c   :  { %351 = vmatpush.bf16.msra.mxu2 %v585_v41  ;;  %338 = vmatpush.bf16.msra.mxu1 %v565_v51 }
  0x8d   :  { %322 = vmatpush.bf16.msra.mxu0 %v593_v23  ;;  %364 = vmatpush.bf16.msra.mxu3 %v605_v31 }
  0x90   :  { %352 = vmatpush.bf16.msra.mxu2 %v569_v57 }
  0x91   :  { %323 = vmatpush.bf16.msra.mxu0 %v577_v35  ;;  %365 = vmatpush.bf16.msra.mxu3 %v589_v46 }
  0x95   :  { %324 = vmatpush.bf16.msra.mxu0 %v561_v50 }
  0xf5   :  { %v62_v10 = vpop.xlane.xlu1 %61 }
  0xf6   :  { %v65_v17 = vmul.f32 %v62_v10, %v846_v9 }
  0xf8   :  { %v859_v22 = vadd.f32 1e-05, %v65_v17 }
  0xfa   :  { %744 = vrsqrt.f32 %v859_v22  ;;  %vm75_vm2 = vweird.f32 %v859_v22 }
  0xfd   :  { %v64_v39 = vpop.xlane.xlu1 %63 }
  0xfe   :  { %v66_v45 = vmul.f32 %v64_v39, %v846_v9  ;;  %v573_v9 = vor.u32 %v696_v54, %v570_v58 }
 0x100   :  { %v745_v55 = vpop.eup %744  ;;  %v68_v56 = vadd.f32 1e-05, %v66_v45  ;;  %366 = vmatpush.bf16.msra.mxu3 %v573_v9 }
 0x101   :  { %v70_v59 = vmul.f32 %v745_v55, %v859_v22  ;;  %vm76_vm1 = vweird.f32 %v745_v55 }
 0x102   :  { %746 = vrsqrt.f32 %v68_v56  ;;  %vm77_vm3 = vmor %vm75_vm2, %vm76_vm1  ;;  %vm85_vm5 = vweird.f32 %v68_v56 }
 0x103   :  { %v71_v60 = vmul.f32 %v745_v55, %v70_v59 }
 0x105   :  { %v72_v61 = vmul.f32 0.5, %v71_v60 }
 0x107   :  { %v73_v62 = vsub.f32 1.5, %v72_v61 }
 0x108   :  { %v747_v63 = vpop.eup %746 }
 0x109   :  { %v74_v0 = vmul.f32 %v745_v55, %v73_v62  ;;  %v80_v1 = vmul.f32 %v747_v63, %v68_v56  ;;  %vm86_vm4 = vweird.f32 %v747_v63 }
 0x10a   :  { %vm87_vm6 = vmor %vm85_vm5, %vm86_vm4 }
 0x10b   :  { %v81_v2 = vmul.f32 %v747_v63, %v80_v1  ;;  %v78_v3 = vsel %vm77_vm3, %v745_v55, %v74_v0 }
 0x10c   :  { %v89_v7 = vmul.f32 %v78_v3, %v849_v12  ;;  %v141_v12 = vld [vmem:[%s993_s2] sm:$0xf] }
 0x10d   :  { %v82_v4 = vmul.f32 0.5, %v81_v2  ;;  %v143_v21 = vperm.slane %v141_v12, 0  ;;  %v144_v22 = vperm.slane %v141_v12, 1  ;;  %v145_v28 = vperm.slane %v141_v12, 2 }
 0x10e   :  { %v95_v13 = vmul.f32 %v740_v6, %v89_v7  ;;  %v146_v29 = vperm.slane %v141_v12, 3 }
 0x10f   :  { %v83_v5 = vsub.f32 1.5, %v82_v4 }
 0x110   :  { %v101_v17 = vadd.f32 %v741_v11, %v95_v13 }
 0x111   :  { %v84_v8 = vmul.f32 %v747_v63, %v83_v5 }
 0x113   :  { %v88_v10 = vsel %vm87_vm6, %v747_v63, %v84_v8 }
 0x114   :  { %v90_v14 = vmul.f32 %v88_v10, %v854_v16 }
 0x116   :  { %v96_v15 = vmul.f32 %v740_v6, %v90_v14 }
 0x118   :  { %v102_v18 = vadd.f32 %v741_v11, %v96_v15 }
 0x11a   :  { %v734_v19 = vpack.c.bf16 %v102_v18, %v101_v17 }
 0x11c   :  { %735 = vst [vmem:[#allocation2] sm:$0xff] %v734_v19  }
 0x123   :  { %v694_v20 = vld [vmem:[#allocation2] sm:$0xff] }
 0x124   :  { %325 = vmatmul.bf16.vlgmr.msra.gmra.mxu0 %v694_v20  ;;  %339 = vmatmul.bf16.vlgmr.msra.gmra.mxu1 %v694_v20 }
 0x125   :  { %353 = vmatmul.bf16.vlgmr.msra.gmra.mxu2 %v694_v20  ;;  %367 = vmatmul.bf16.vlgmr.msra.gmra.mxu3 %v694_v20 }
 0x1a1   :  { %v326_v23 = vpop.f32.mrf.mxu0  ;;  %v340_v24 = vpop.f32.mrf.mxu1 }
 0x1a2   :  { %v876_v25 = vadd.f32 %v326_v23, %v143_v21  ;;  %v878_v16 = vadd.f32 %v340_v24, %v144_v22 }
 0x1a4   :  { %v686_v26 = vmul.f32 -1.702, %v876_v25  ;;  %v687_v27 = vmul.f32 -1.702, %v878_v16 }
 0x1a6   :  { %v389_v30 = vmul.f32 1.442695, %v686_v26  ;;  %v391_v31 = vmul.f32 1.442695, %v687_v27 }
 0x1a8   :  { %748 = vpow2.f32 %v389_v30  ;;  %v354_v32 = vpop.f32.mrf.mxu2  ;;  %v368_v33 = vpop.f32.mrf.mxu3 }
 0x1a9   :  { %750 = vpow2.f32 %v391_v31  ;;  %v882_v34 = vadd.f32 %v354_v32, %v145_v28  ;;  %v884_v35 = vadd.f32 %v368_v33, %v146_v29  ;;  %v328_v36 = vpop.f32.mrf.mxu0  ;;  %v342_v37 = vpop.f32.mrf.mxu1 }
 0x1aa   :  { %v886_v38 = vadd.f32 %v328_v36, %v143_v21  ;;  %v888_v39 = vadd.f32 %v342_v37, %v144_v22 }
 0x1ab   :  { %v688_v40 = vmul.f32 -1.702, %v882_v34  ;;  %v689_v41 = vmul.f32 -1.702, %v884_v35 }
 0x1ac   :  { %v690_v42 = vmul.f32 -1.702, %v886_v38  ;;  %v691_v43 = vmul.f32 -1.702, %v888_v39 }
 0x1ad   :  { %v393_v44 = vmul.f32 1.442695, %v688_v40  ;;  %v395_v45 = vmul.f32 1.442695, %v689_v41 }
 0x1ae   :  { %v749_v46 = vpop.eup %748  ;;  %v397_v49 = vmul.f32 1.442695, %v690_v42  ;;  %v399_v51 = vmul.f32 1.442695, %v691_v43 }
 0x1af   :  { %v751_v47 = vpop.eup %750  ;;  %v405_v48 = vadd.f32 1.0, %v749_v46  ;;  %752 = vpow2.f32 %v393_v44 }
 0x1b0   :  { %v406_v50 = vadd.f32 1.0, %v751_v47  ;;  %754 = vpow2.f32 %v395_v45  ;;  %v356_v52 = vpop.f32.mrf.mxu2  ;;  %v370_v54 = vpop.f32.mrf.mxu3 }
 0x1b1   :  { %756 = vrcp.f32 %v405_v48  ;;  %v894_v53 = vadd.f32 %v356_v52, %v145_v28  ;;  %v422_v58 = vand.u32 2147483647, %v405_v48  ;;  %v424_v60 = vand.u32 2147483648, %v405_v48 }
 0x1b2   :  { %758 = vrcp.f32 %v406_v50  ;;  %v437_v61 = vand.u32 2147483647, %v406_v50  ;;  %v901_v63 = vadd.f32 %v370_v54, %v146_v29  ;;  %vm418_vm7 = vweird.f32 %v405_v48 }
 0x1b3   :  { %760 = vpow2.f32 %v397_v49  ;;  %v692_v56 = vmul.f32 -1.702, %v894_v53  ;;  %v439_v4 = vand.u32 2147483648, %v406_v50  ;;  %vm904_vm8 = vcmp.eq.f32.partialorder %v422_v58, 8.507059e+37 }
 0x1b4   :  { %762 = vpow2.f32 %v399_v51  ;;  %vm433_vm9 = vweird.f32 %v406_v50  ;;  %v425_v10 = vor.u32 1.1754944e-38, %v424_v60  ;;  %vm909_vm10 = vcmp.eq.f32.partialorder %v437_v61, 8.507059e+37 }
 0x1b5   :  { %v753_v55 = vpop.eup %752  ;;  %v401_v5 = vmul.f32 1.442695, %v692_v56  ;;  %v693_v14 = vmul.f32 -1.702, %v901_v63  ;;  %v440_v20 = vor.u32 1.1754944e-38, %v439_v4 }
 0x1b6   :  { %v755_v57 = vpop.eup %754  ;;  %v897_v59 = vadd.f32 1.0, %v753_v55 }
 0x1b7   :  { %v757_v9 = vpop.eup %756  ;;  %v899_v62 = vadd.f32 1.0, %v755_v57  ;;  %v403_v30 = vmul.f32 1.442695, %v693_v14 }
 0x1b8   :  { %v759_v0 = vpop.eup %758  ;;  %v414_v1 = vmul.f32 %v757_v9, %v405_v48  ;;  %764 = vrcp.f32 %v897_v59  ;;  %vm419_vm11 = vweird.f32 %v757_v9  ;;  %vm448_vm13 = vweird.f32 %v897_v59 }
 0x1b9   :  { %v761_v2 = vpop.eup %760  ;;  %v429_v3 = vmul.f32 %v759_v0, %v406_v50  ;;  %766 = vrcp.f32 %v899_v62  ;;  %vm434_vm12 = vweird.f32 %v759_v0  ;;  %v452_v22 = vand.u32 2147483647, %v897_v59  ;;  %vm420_vm14 = vmor %vm418_vm7, %vm419_vm11 }
 0x1ba   :  { %v763_v6 = vpop.eup %762  ;;  %v415_v7 = vsub.f32 1.0, %v414_v1  ;;  %v914_v17 = vadd.f32 1.0, %v761_v2  ;;  %768 = vpow2.f32 %v401_v5  ;;  %v454_v26 = vand.u32 2147483648, %v897_v59  ;;  %vm435_vm0 = vmor %vm433_vm9, %vm434_vm12 }
 0x1bb   :  { %v430_v11 = vsub.f32 1.0, %v429_v3  ;;  %v916_v18 = vadd.f32 1.0, %v763_v6  ;;  %vm463_vm15 = vweird.f32 %v899_v62  ;;  %v467_v29 = vand.u32 2147483647, %v899_v62 }
 0x1bc   :  { %v416_v15 = vmul.f32 %v757_v9, %v415_v7  ;;  %770 = vrcp.f32 %v914_v17  ;;  %vm935_vm1 = vcmp.eq.f32.partialorder %v452_v22, 8.507059e+37  ;;  %v469_v42 = vand.u32 2147483648, %v899_v62 }
 0x1bd   :  { %v431_v19 = vmul.f32 %v759_v0, %v430_v11  ;;  %772 = vrcp.f32 %v916_v18  ;;  %v455_v48 = vor.u32 1.1754944e-38, %v454_v26  ;;  %vm946_vm5 = vcmp.eq.f32.partialorder %v467_v29, 8.507059e+37 }
 0x1be   :  { %v765_v12 = vpop.eup %764  ;;  %v417_v21 = vadd.f32 %v757_v9, %v416_v15  ;;  %774 = vpow2.f32 %v403_v30  ;;  %v470_v55 = vor.u32 1.1754944e-38, %v469_v42  ;;  %vm478_vm6 = vweird.f32 %v914_v17 }
 0x1bf   :  { %v432_v23 = vadd.f32 %v759_v0, %v431_v19  ;;  %v444_v24 = vmul.f32 %v765_v12, %v897_v59  ;;  %v767_v27 = vpop.eup %766  ;;  %vm449_vm2 = vweird.f32 %v765_v12  ;;  %v482_v60 = vand.u32 2147483647, %v914_v17 }
 0x1c0   :  { %v421_v28 = vsel %vm420_vm14, %v757_v9, %v417_v21  ;;  %v459_v36 = vmul.f32 %v767_v27, %v899_v62  ;;  %v769_v43 = vpop.eup %768  ;;  %vm464_vm3 = vweird.f32 %v767_v27  ;;  %vm450_vm4 = vmor %vm448_vm13, %vm449_vm2  ;;  %v484_v61 = vand.u32 2147483648, %v914_v17 }
 0x1c1   :  { %v426_v31 = vsel %vm904_vm8, %v425_v10, %v421_v28  ;;  %v436_v32 = vsel %vm435_vm0, %v759_v0, %v432_v23  ;;  %v445_v33 = vsub.f32 1.0, %v444_v24  ;;  %v941_v49 = vadd.f32 1.0, %v769_v43  ;;  %vm465_vm7 = vmor %vm463_vm15, %vm464_vm3 }
 0x1c2   :  { %v533_v37 = vmul.f32 %v426_v31, %v876_v25  ;;  %v441_v40 = vsel %vm909_vm10, %v440_v20, %v436_v32  ;;  %v460_v46 = vsub.f32 1.0, %v459_v36  ;;  %v771_v47 = vpop.eup %770  ;;  %v497_v6 = vand.u32 2147483647, %v916_v18 }
 0x1c3   :  { %v534_v44 = vmul.f32 %v441_v40, %v878_v16  ;;  %v446_v45 = vmul.f32 %v765_v12, %v445_v33  ;;  %v474_v52 = vmul.f32 %v771_v47, %v914_v17  ;;  %v773_v54 = vpop.eup %772  ;;  %776 = vrcp.f32 %v941_v49 }
 0x1c4   :  { %v461_v51 = vmul.f32 %v767_v27, %v460_v46  ;;  %v489_v9 = vmul.f32 %v773_v54, %v916_v18  ;;  %vm479_vm8 = vweird.f32 %v771_v47  ;;  %v775_v4 = vpop.eup %774  ;;  %vm494_vm9 = vweird.f32 %v773_v54 }
 0x1c5   :  { %v541_v25 = vpack.c.bf16 %v534_v44, %v533_v37  ;;  %v447_v50 = vadd.f32 %v765_v12, %v446_v45  ;;  %v475_v58 = vsub.f32 1.0, %v474_v52  ;;  %v499_v62 = vand.u32 2147483648, %v916_v18  ;;  %vm480_vm10 = vmor %vm478_vm6, %vm479_vm8 }
 0x1c6   :  { %v462_v57 = vadd.f32 %v767_v27, %v461_v51  ;;  %v490_v3 = vsub.f32 1.0, %v489_v9  ;;  %v412_v11 = vadd.f32 1.0, %v775_v4  ;;  %vm483_vm11 = vcmp.eq.f32.partialorder %v482_v60, 8.507059e+37 }
 0x1c7   :  { %545 = vst [vmem:[%s996_s5] sm:$0xff] %v541_v25  ;;  %v451_v56 = vsel %vm450_vm4, %v765_v12, %v447_v50  ;;  %v476_v2 = vmul.f32 %v771_v47, %v475_v58  ;;  %vm493_vm12 = vweird.f32 %v916_v18  ;;  %vm498_vm14 = vcmp.eq.f32.partialorder %v497_v6, 8.507059e+37 }
 0x1c8   :  { %v456_v59 = vsel %vm935_vm1, %v455_v48, %v451_v56  ;;  %v466_v1 = vsel %vm465_vm7, %v767_v27, %v462_v57  ;;  %v491_v10 = vmul.f32 %v773_v54, %v490_v3  ;;  %vm495_vm13 = vmor %vm493_vm12, %vm494_vm9  ;;  %778 = vrcp.f32 %v412_v11 }
 0x1c9   :  { %v535_v0 = vmul.f32 %v456_v59, %v882_v34  ;;  %v471_v5 = vsel %vm946_vm5, %v470_v55, %v466_v1  ;;  %v477_v8 = vadd.f32 %v771_v47, %v476_v2  ;;  %v777_v13 = vpop.eup %776  ;;  %v485_v34 = vor.u32 1.1754944e-38, %v484_v61 }
 0x1ca   :  { %v536_v7 = vmul.f32 %v471_v5, %v884_v35  ;;  %v492_v19 = vadd.f32 %v773_v54, %v491_v10  ;;  %v504_v20 = vmul.f32 %v777_v13, %v941_v49  ;;  %v500_v35 = vor.u32 1.1754944e-38, %v499_v62 }
 0x1cb   :  { %v481_v15 = vsel %vm480_vm10, %v771_v47, %v477_v8  ;;  %vm509_vm15 = vweird.f32 %v777_v13  ;;  %v514_v29 = vand.u32 2147483648, %v941_v49  ;;  %vm508_vm0 = vweird.f32 %v941_v49 }
 0x1cc   :  { %v542_v14 = vpack.c.bf16 %v536_v7, %v535_v0  ;;  %v486_v12 = vsel %vm483_vm11, %v485_v34, %v481_v15  ;;  %v496_v21 = vsel %vm495_vm13, %v773_v54, %v492_v19  ;;  %v505_v22 = vsub.f32 1.0, %v504_v20  ;;  %vm510_vm1 = vmor %vm508_vm0, %vm509_vm15 }
 0x1cd   :  { %v537_v17 = vmul.f32 %v486_v12, %v886_v38  ;;  %v501_v18 = vsel %vm498_vm14, %v500_v35, %v496_v21  ;;  %v512_v38 = vand.u32 2147483647, %v941_v49  ;;  %v529_v33 = vand.u32 2147483648, %v412_v11 }
 0x1ce   :  { %546 = vst [vmem:[%s996_s5 + $0x8] sm:$0xff] %v542_v14  ;;  %v538_v23 = vmul.f32 %v501_v18, %v888_v39  ;;  %v506_v24 = vmul.f32 %v777_v13, %v505_v22  ;;  %v779_v28 = vpop.eup %778  ;;  %v515_v39 = vor.u32 1.1754944e-38, %v514_v29  ;;  %v527_v37 = vand.u32 2147483647, %v412_v11 }
 0x1cf   :  { %v519_v30 = vmul.f32 %v779_v28, %v412_v11  ;;  %vm513_vm2 = vcmp.eq.f32.partialorder %v512_v38, 8.507059e+37  ;;  %vm524_vm3 = vweird.f32 %v779_v28  ;;  %vm523_vm4 = vweird.f32 %v412_v11 }
 0x1d0   :  { %v543_v26 = vpack.c.bf16 %v538_v23, %v537_v17  ;;  %v507_v27 = vadd.f32 %v777_v13, %v506_v24  ;;  %vm525_vm5 = vmor %vm523_vm4, %vm524_vm3  ;;  %v530_v42 = vor.u32 1.1754944e-38, %v529_v33  ;;  %vm528_vm6 = vcmp.eq.f32.partialorder %v527_v37, 8.507059e+37 }
 0x1d1   :  { %v520_v32 = vsub.f32 1.0, %v519_v30 }
 0x1d2   :  { %547 = vst [vmem:[%s996_s5 + $0x10] sm:$0xff] %v543_v26  ;;  %v511_v31 = vsel %vm510_vm1, %v777_v13, %v507_v27 }
 0x1d3   :  { %v521_v36 = vmul.f32 %v779_v28, %v520_v32  ;;  %v516_v40 = vsel %vm513_vm2, %v515_v39, %v511_v31 }
 0x1d4   :  { %v539_v43 = vmul.f32 %v516_v40, %v894_v53 }
 0x1d5   :  { %v522_v41 = vadd.f32 %v779_v28, %v521_v36 }
 0x1d7   :  { %v526_v44 = vsel %vm525_vm5, %v779_v28, %v522_v41 }
 0x1d8   :  { %v531_v45 = vsel %vm528_vm6, %v530_v42, %v526_v44 }
 0x1d9   :  { %v540_v46 = vmul.f32 %v531_v45, %v901_v63 }
 0x1db   :  { %v544_v47 = vpack.c.bf16 %v540_v46, %v539_v43 }
 0x1dd   :  { %548 = vst [vmem:[%s996_s5 + $0x18] sm:$0xff] %v544_v47 }
 0x1de   :  { %553 = vsyncpa [#allocation4], 1 }

</bundles_post_ra>
